<compile_context>
chip_gen: v6e
topology: v6e:2x2x1
jax: 0.10.0
libtpu: 0.0.40
codegen_flags: <defaults>
</compile_context>

<pallas_src>
import functools

import numpy as np
import jax
import jax.numpy as jnp
from jax.experimental import pallas as pl
from jax.experimental.pallas import tpu as pltpu


# -----------------------------------------------------------------------------
# Glue: window partition / reverse (pure permutations, plain JAX)
# -----------------------------------------------------------------------------
def window_partition(x, ws):
    B, H, W, C = x.shape
    x = x.reshape(B, H // ws, ws, W // ws, ws, C)
    return x.transpose(0, 1, 3, 2, 4, 5).reshape(-1, ws, ws, C)


def window_reverse(windows, ws, H, W):
    B = windows.shape[0] // (H * W // ws // ws)
    x = windows.reshape(B, H // ws, W // ws, ws, ws, -1)
    return x.transpose(0, 1, 3, 2, 4, 5).reshape(B, H, W, -1)


# -----------------------------------------------------------------------------
# Fused Pallas kernel: LN1 + window attention + proj + residual + LN2 + MLP
# -----------------------------------------------------------------------------
def _swin_block_kernel(x_ref, mask_ref, rb_ref,
                       wqkv_ref, bqkv_ref, wp_ref, bp_ref,
                       g1_ref, b1_ref, g2_ref, b2_ref,
                       w1_ref, fb1_ref, w2_ref, fb2_ref, o_ref,
                       *, num_heads, head_dim, win_n, eps):
    x = x_ref[...].astype(jnp.float32)                 # (R, C) stacked window rows
    R, C = x.shape
    wg = R // win_n                                    # windows in this group

    # ---- LayerNorm1 (single-pass stats; per-token so it commutes with the
    #      window permutation done in the wrapper) ----
    m1 = jnp.mean(x, axis=-1, keepdims=True)
    m2 = jnp.mean(x * x, axis=-1, keepdims=True)
    xn = (x - m1) * jax.lax.rsqrt(m2 - m1 * m1 + eps)
    xn = xn * g1_ref[...] + b1_ref[...]

    # ---- fused QKV projection: one (R, C) x (C, 3C) bf16 MXU matmul.
    #      The attention scale is already folded into the Q columns. ----
    qkv = jnp.dot(xn.astype(jnp.bfloat16), wqkv_ref[...],
                  preferred_element_type=jnp.float32) + bqkv_ref[...]

    rb = rb_ref[...]                                   # (nh, N, N) rel-pos bias
    msk = mask_ref[...]                                # (wg, N, N) shift mask
    head_outs = []
    for h in range(num_heads):                         # static unroll (few heads)
        lo = h * head_dim
        qh = qkv[:, lo:lo + head_dim].reshape(wg, win_n, head_dim)
        kh = qkv[:, C + lo:C + lo + head_dim].reshape(wg, win_n, head_dim)
        vh = qkv[:, 2 * C + lo:2 * C + lo + head_dim].reshape(wg, win_n, head_dim)

        s = jnp.einsum('wqd,wkd->wqk', qh, kh,
                       preferred_element_type=jnp.float32)       # (wg, N, N)
        s = s + rb[h] + msk
        s = s - jnp.max(s, axis=-1, keepdims=True)
        p = jnp.exp(s)
        p = p * pl.reciprocal(jnp.sum(p, axis=-1, keepdims=True), approx=True)
        oh = jnp.einsum('wqk,wkd->wqd', p.astype(jnp.bfloat16),
                        vh.astype(jnp.bfloat16),
                        preferred_element_type=jnp.float32)      # (wg, N, hd)
        head_outs.append(oh.reshape(R, head_dim))

    # heads concatenated along channels, single (R, C) x (C, C) bf16 projection
    attn = jnp.concatenate(head_outs, axis=-1).astype(jnp.bfloat16)
    attn = jnp.dot(attn, wp_ref[...],
                   preferred_element_type=jnp.float32) + bp_ref[...]

    # ---- residual 1 ----
    y = x + attn

    # ---- LayerNorm2 (single-pass) + MLP (fc1 -> exact GELU -> fc2) + residual 2
    n1 = jnp.mean(y, axis=-1, keepdims=True)
    n2 = jnp.mean(y * y, axis=-1, keepdims=True)
    yn = (y - n1) * jax.lax.rsqrt(n2 - n1 * n1 + eps)
    yn = yn * g2_ref[...] + b2_ref[...]

    h1 = jnp.dot(yn.astype(jnp.bfloat16), w1_ref[...],
                 preferred_element_type=jnp.float32) + fb1_ref[...]
    h1 = 0.5 * h1 * (1.0 + jax.lax.erf(h1 * 0.7071067811865476))   # torch GELU
    m = jnp.dot(h1.astype(jnp.bfloat16), w2_ref[...],
                preferred_element_type=jnp.float32) + fb2_ref[...]

    o_ref[...] = (y + m).astype(o_ref.dtype)


def _full_spec(arr):
    nd = arr.ndim
    return pl.BlockSpec(arr.shape, lambda *_: (0,) * nd)


def _pick_window_group(Bn, N, nW, max_rows=512):
    """Windows per grid step.

    Constraints: wg | Bn (even grid), (wg*N) % 8 == 0 (sublane-aligned rows),
    wg | nW or nW | wg (shift-mask periodicity maps onto the BlockSpec),
    wg*N <= max_rows (VMEM tile; sweep per generation), and >= 2 grid steps so
    both v7x TensorCores get work under the "parallel" axis.
    """
    best = 0
    for wg in range(1, Bn + 1):
        if Bn % wg or (wg * N) % 8:
            continue
        if not (nW % wg == 0 or wg % nW == 0):
            continue
        if wg * N > max_rows:
            break
        if Bn >= 2 and Bn // wg < 2:
            continue
        best = wg
    if best == 0:
        # Last resort: everything in one block (block dims == array dims).
        # TODO(synk): for ws=7 (N=49) pick wg as a multiple of 8 instead.
        best = Bn
    return best


def swin_block_pallas(x_rows, p, rel_bias, attn_mask, *, num_heads, win_n,
                      max_rows=512):
    Rtot, C = x_rows.shape
    Bn = Rtot // win_n
    nW = attn_mask.shape[0]
    nh = num_heads
    wg = _pick_window_group(Bn, win_n, nW, max_rows)
    n_groups = Bn // wg
    R = wg * win_n

    # Per-group shift-mask slab.  Window i (batch-major order from
    # window_partition) uses mask i % nW; either wg | nW (select a block of the
    # mask per group) or nW | wg (replicate the tiny mask once, host side).
    if wg > nW:
        mask_rep = jnp.tile(attn_mask, (wg // nW, 1, 1))
    else:
        mask_rep = attn_mask
    nblk = mask_rep.shape[0] // wg

    kernel = functools.partial(
        _swin_block_kernel, num_heads=nh, head_dim=C // nh,
        win_n=win_n, eps=1e-5)

    in_specs = [
        pl.BlockSpec((R, C), lambda g: (g, 0)),
        pl.BlockSpec((wg, win_n, win_n), lambda g: (g % nblk, 0, 0)),
        _full_spec(rel_bias),
        _full_spec(p['wqkv']), _full_spec(p['bqkv']),
        _full_spec(p['wp']), _full_spec(p['bp']),
        _full_spec(p['ln1_g']), _full_spec(p['ln1_b']),
        _full_spec(p['ln2_g']), _full_spec(p['ln2_b']),
        _full_spec(p['w1']), _full_spec(p['b1']),
        _full_spec(p['w2']), _full_spec(p['b2']),
    ]
    out_spec = pl.BlockSpec((R, C), lambda g: (g, 0))

    # VMEM budget: constant blocks are (default) double-buffered, activation
    # tiles double-buffered in + out, plus headroom for temporaries.
    nbytes = lambda a: int(a.size) * a.dtype.itemsize
    weight_bytes = sum(nbytes(p[k]) for k in
                       ('wqkv', 'bqkv', 'wp', 'bp', 'ln1_g', 'ln1_b',
                        'ln2_g', 'ln2_b', 'w1', 'b1', 'w2', 'b2'))
    vmem_limit = int(2 * weight_bytes
                     + 2 * 2 * (R * C * 4)
                     + 2 * (wg * win_n * win_n * 4) + nbytes(rel_bias)
                     + (16 << 20))
    vmem_limit = min(max(vmem_limit, 32 << 20), 64 << 20)

    return pl.pallas_call(
        kernel,
        out_shape=jax.ShapeDtypeStruct((Rtot, C), jnp.float32),
        grid=(n_groups,),
        in_specs=in_specs,
        out_specs=out_spec,
        compiler_params=pltpu.CompilerParams(
            dimension_semantics=("parallel",),
            vmem_limit_bytes=vmem_limit),
    )(x_rows, mask_rep, rel_bias,
      p['wqkv'], p['bqkv'], p['wp'], p['bp'],
      p['ln1_g'], p['ln1_b'], p['ln2_g'], p['ln2_b'],
      p['w1'], p['b1'], p['w2'], p['b2'])


# -----------------------------------------------------------------------------
# Full SwinTransformerBlock forward (roll / window permutations are XLA glue)
# -----------------------------------------------------------------------------
def swin_block_forward(x, p, rel_bias, attn_mask, H, W, ws, shift, num_heads):
    B, L, C = x.shape
    assert L == H * W
    xi = x.reshape(B, H, W, C)
    if shift > 0:
        xi = jnp.roll(xi, shift=(-shift, -shift), axis=(1, 2))
    x_win = window_partition(xi, ws)                     # (Bn, ws, ws, C)
    Bn = x_win.shape[0]
    N = ws * ws
    x_rows = x_win.reshape(Bn * N, C)

    out_rows = swin_block_pallas(x_rows, p, rel_bias, attn_mask,
                                 num_heads=num_heads, win_n=N)

    out_win = out_rows.reshape(Bn, ws, ws, C)
    xo = window_reverse(out_win, ws, H, W)
    if shift > 0:
        xo = jnp.roll(xo, shift=(shift, shift), axis=(1, 2))
    return xo.reshape(B, L, C)


# -----------------------------------------------------------------------------
# Pure-JAX reference (same math as PyTorch module, f32, no Pallas)
# -----------------------------------------------------------------------------
def _ln_ref(x, g, b, eps=1e-5):
    mu = x.mean(-1, keepdims=True)
    var = ((x - mu) ** 2).mean(-1, keepdims=True)
    return (x - mu) / jnp.sqrt(var + eps) * g + b


def swin_block_ref(x, p, rel_bias, attn_mask, H, W, ws, shift, num_heads, scale):
    B, L, C = x.shape
    nh = num_heads
    hd = C // nh
    shortcut = x
    xn = _ln_ref(x, p['ln1_g'][0], p['ln1_b'][0])
    xi = xn.reshape(B, H, W, C)
    if shift > 0:
        xi = jnp.roll(xi, shift=(-shift, -shift), axis=(1, 2))
    xw = window_partition(xi, ws).reshape(-1, ws * ws, C)
    Bn, N, _ = xw.shape
    nW = attn_mask.shape[0]

    qkv = xw @ p['wqkv'] + p['bqkv'][0]                  # (Bn, N, 3C)
    qkv = qkv.reshape(Bn, N, 3, nh, hd).transpose(2, 0, 3, 1, 4)
    q, k, v = qkv[0], qkv[1], qkv[2]
    attn = jnp.einsum('bhqd,bhkd->bhqk', q * scale, k)
    attn = attn + rel_bias[None]
    attn = attn + attn_mask[jnp.arange(Bn) % nW][:, None]
    attn = jax.nn.softmax(attn, axis=-1)
    out = jnp.einsum('bhqk,bhkd->bhqd', attn, v)
    out = out.transpose(0, 2, 1, 3).reshape(Bn, N, C)
    out = out @ p['wp'] + p['bp'][0]

    out = out.reshape(-1, ws, ws, C)
    xo = window_reverse(out, ws, H, W)
    if shift > 0:
        xo = jnp.roll(xo, shift=(shift, shift), axis=(1, 2))
    y = shortcut + xo.reshape(B, L, C)

    yn = _ln_ref(y, p['ln2_g'][0], p['ln2_b'][0])
    h = yn @ p['w1'] + p['b1'][0]
    h = jax.nn.gelu(h, approximate=False)
    m = h @ p['w2'] + p['b2'][0]
    return y + m


# -----------------------------------------------------------------------------
# Main
# -----------------------------------------------------------------------------
if __name__ == "__main__":
    # Config: dim=32, heads=4, window=4, input_resolution=(8,8), shift=2
    # (SW-MSA path with attention mask), batch=2, mlp_ratio=4.
    C, num_heads, ws, shift = 32, 4, 4, 2
    H = W = 8
    B = 2
    mlp_ratio = 4.0
    hd = C // num_heads
    hidden = int(C * mlp_ratio)
    N = ws * ws
    L = H * W
    scale = hd ** (-0.5)

    key = jax.random.PRNGKey(0)
    keys = jax.random.split(key, 12)

    def nrm(k, shape, std=0.02):
        return (std * jax.random.normal(k, shape)).astype(jnp.float32)

    # qkv linear: torch weight (3C, C); y = x @ W.T + b  -> fused (C, 3C) layout
    W_qkv = nrm(keys[0], (3 * C, C))
    b_qkv = nrm(keys[1], (3 * C,))
    wqkv_f32 = W_qkv.T                                   # (C, 3C)
    bqkv_f32 = b_qkv.reshape(1, 3 * C)

    # proj linear: torch weight (C, C)
    W_proj = nrm(keys[2], (C, C))
    b_proj = nrm(keys[3], (C,))
    wp_f32 = W_proj.T                                    # (C, C)
    bp_f32 = b_proj.reshape(1, C)

    # MLP
    w1_f32 = nrm(keys[4], (hidden, C)).T                 # (C, hidden)
    b1_f32 = nrm(keys[5], (hidden,)).reshape(1, hidden)
    w2_f32 = nrm(keys[6], (C, hidden)).T                 # (hidden, C)
    b2_f32 = nrm(keys[7], (C,)).reshape(1, C)

    ln = dict(
        ln1_g=jnp.ones((1, C), jnp.float32), ln1_b=jnp.zeros((1, C), jnp.float32),
        ln2_g=jnp.ones((1, C), jnp.float32), ln2_b=jnp.zeros((1, C), jnp.float32))

    # Reference params: f32, torch-equivalent layouts, no folding.
    params_ref = dict(ln, wqkv=wqkv_f32, bqkv=bqkv_f32, wp=wp_f32, bp=bp_f32,
                      w1=w1_f32, b1=b1_f32, w2=w2_f32, b2=b2_f32)

    # Kernel params: attention scale folded into the Q columns; matmul weights
    # stored bf16 (f32 accumulation in-kernel); biases / LN params stay f32.
    qscale = jnp.concatenate([jnp.full((C,), scale, jnp.float32),
                              jnp.ones((2 * C,), jnp.float32)])
    params_krn = dict(
        ln,
        wqkv=(wqkv_f32 * qscale[None, :]).astype(jnp.bfloat16),
        bqkv=bqkv_f32 * qscale[None, :],
        wp=wp_f32.astype(jnp.bfloat16), bp=bp_f32,
        w1=w1_f32.astype(jnp.bfloat16), b1=b1_f32,
        w2=w2_f32.astype(jnp.bfloat16), b2=b2_f32,
    )

    # Relative position bias table + index (as in WindowAttention.__init__)
    table = nrm(keys[8], ((2 * ws - 1) * (2 * ws - 1), num_heads))
    coords = np.stack(np.meshgrid(np.arange(ws), np.arange(ws), indexing='ij'))
    coords_flat = coords.reshape(2, -1)
    rel = coords_flat[:, :, None] - coords_flat[:, None, :]
    rel = rel.transpose(1, 2, 0).astype(np.int64)
    rel[:, :, 0] += ws - 1
    rel[:, :, 1] += ws - 1
    rel[:, :, 0] *= 2 * ws - 1
    rel_index = rel.sum(-1)                              # (N, N)
    rel_bias = table[jnp.asarray(rel_index.reshape(-1))].reshape(N, N, num_heads)
    rel_bias = rel_bias.transpose(2, 0, 1).astype(jnp.float32)   # (nh, N, N)

    # Shifted-window attention mask (as in SwinTransformerBlock.__init__)
    nW = (H // ws) * (W // ws)
    if shift > 0:
        img_mask = np.zeros((1, H, W, 1), np.float32)
        cnt = 0
        slices = (slice(0, -ws), slice(-ws, -shift), slice(-shift, None))
        for hs in slices:
            for wsl in slices:
                img_mask[:, hs, wsl, :] = cnt
                cnt += 1
        mw = np.asarray(window_partition(jnp.asarray(img_mask), ws)).reshape(-1, N)
        am = mw[:, None, :] - mw[:, :, None]
        attn_mask = jnp.asarray(np.where(am != 0, -100.0, 0.0).astype(np.float32))
    else:
        attn_mask = jnp.zeros((nW, N, N), jnp.float32)

    # Input: (B, L, C) tokens
    x = jax.random.normal(keys[9], (B, L, C), jnp.float32)

    out = swin_block_forward(x, params_krn, rel_bias, attn_mask,
                             H, W, ws, shift, num_heads)
    out = jax.block_until_ready(out)

    ref = swin_block_ref(x, params_ref, rel_bias, attn_mask,
                         H, W, ws, shift, num_heads, scale)
    ref = jax.block_until_ready(ref)

    if not bool(jnp.allclose(out, ref, atol=3e-3, rtol=3e-3)):
        raise AssertionError(
            f"mismatch: max abs diff = {float(jnp.max(jnp.abs(out - ref)))}")

    print("KERNEL_OK")
</pallas_src>

<mosaic_0001>
module attributes {stable_mosaic.version = 11 : i64} {
  func.func @_swin_block_kernel(%arg0: i32, %arg1: memref<64x32xf32, #tpu.memory_space<vmem>>, %arg2: memref<4x16x16xf32, #tpu.memory_space<vmem>>, %arg3: memref<4x16x16xf32, #tpu.memory_space<vmem>>, %arg4: memref<32x96xbf16, #tpu.memory_space<vmem>>, %arg5: memref<1x96xf32, #tpu.memory_space<vmem>>, %arg6: memref<32x32xbf16, #tpu.memory_space<vmem>>, %arg7: memref<1x32xf32, #tpu.memory_space<vmem>>, %arg8: memref<1x32xf32, #tpu.memory_space<vmem>>, %arg9: memref<1x32xf32, #tpu.memory_space<vmem>>, %arg10: memref<1x32xf32, #tpu.memory_space<vmem>>, %arg11: memref<1x32xf32, #tpu.memory_space<vmem>>, %arg12: memref<32x128xbf16, #tpu.memory_space<vmem>>, %arg13: memref<1x128xf32, #tpu.memory_space<vmem>>, %arg14: memref<128x32xbf16, #tpu.memory_space<vmem>>, %arg15: memref<1x32xf32, #tpu.memory_space<vmem>>, %arg16: memref<64x32xf32, #tpu.memory_space<vmem>>) attributes {dimension_semantics = [#tpu.dimension_semantics<parallel>], iteration_bounds = array<i64: 2>, scalar_prefetch = 0 : i64, scratch_operands = 0 : i64, tpu.core_type = #tpu.core_type<tc>, window_params = [{transform_indices = @transform_0, window_bounds = array<i64: 64, 32>}, {transform_indices = @transform_1, window_bounds = array<i64: 4, 16, 16>}, {pipeline_mode = #tpu.pipeline_mode<synchronous>, transform_indices = @transform_2, window_bounds = array<i64: 4, 16, 16>}, {pipeline_mode = #tpu.pipeline_mode<synchronous>, transform_indices = @transform_3, window_bounds = array<i64: 32, 96>}, {pipeline_mode = #tpu.pipeline_mode<synchronous>, transform_indices = @transform_4, window_bounds = array<i64: 1, 96>}, {pipeline_mode = #tpu.pipeline_mode<synchronous>, transform_indices = @transform_5, window_bounds = array<i64: 32, 32>}, {pipeline_mode = #tpu.pipeline_mode<synchronous>, transform_indices = @transform_6, window_bounds = array<i64: 1, 32>}, {pipeline_mode = #tpu.pipeline_mode<synchronous>, transform_indices = @transform_7, window_bounds = array<i64: 1, 32>}, {pipeline_mode = #tpu.pipeline_mode<synchronous>, transform_indices = @transform_8, window_bounds = array<i64: 1, 32>}, {pipeline_mode = #tpu.pipeline_mode<synchronous>, transform_indices = @transform_9, window_bounds = array<i64: 1, 32>}, {pipeline_mode = #tpu.pipeline_mode<synchronous>, transform_indices = @transform_10, window_bounds = array<i64: 1, 32>}, {pipeline_mode = #tpu.pipeline_mode<synchronous>, transform_indices = @transform_11, window_bounds = array<i64: 32, 128>}, {pipeline_mode = #tpu.pipeline_mode<synchronous>, transform_indices = @transform_12, window_bounds = array<i64: 1, 128>}, {pipeline_mode = #tpu.pipeline_mode<synchronous>, transform_indices = @transform_13, window_bounds = array<i64: 128, 32>}, {pipeline_mode = #tpu.pipeline_mode<synchronous>, transform_indices = @transform_14, window_bounds = array<i64: 1, 32>}, {transform_indices = @transform_15, window_bounds = array<i64: 64, 32>}]} {
    %c0 = arith.constant 0 : index
    %c0_0 = arith.constant 0 : index
    %0 = vector.load %arg1[%c0, %c0_0] : memref<64x32xf32, #tpu.memory_space<vmem>>, vector<64x32xf32>
    %cst = arith.constant dense<0.000000e+00> : vector<64xf32>
    %1 = vector.multi_reduction <add>, %0, %cst [1] : vector<64x32xf32> to vector<64xf32>
    %2 = vector.shape_cast %1 : vector<64xf32> to vector<64x1xf32>
    %cst_1 = arith.constant 3.200000e+01 : f32
    %3 = vector.broadcast %cst_1 : f32 to vector<64x1xf32>
    %4 = arith.divf %2, %3 : vector<64x1xf32>
    %5 = arith.mulf %0, %0 : vector<64x32xf32>
    %cst_2 = arith.constant dense<0.000000e+00> : vector<64xf32>
    %6 = vector.multi_reduction <add>, %5, %cst_2 [1] : vector<64x32xf32> to vector<64xf32>
    %7 = vector.shape_cast %6 : vector<64xf32> to vector<64x1xf32>
    %cst_3 = arith.constant 3.200000e+01 : f32
    %8 = vector.broadcast %cst_3 : f32 to vector<64x1xf32>
    %9 = arith.divf %7, %8 : vector<64x1xf32>
    %10 = vector.broadcast %4 : vector<64x1xf32> to vector<64x32xf32>
    %11 = arith.subf %0, %10 : vector<64x32xf32>
    %12 = arith.mulf %4, %4 : vector<64x1xf32>
    %13 = arith.subf %9, %12 : vector<64x1xf32>
    %cst_4 = arith.constant 9.99999974E-6 : f32
    %14 = vector.broadcast %cst_4 : f32 to vector<64x1xf32>
    %15 = arith.addf %13, %14 : vector<64x1xf32>
    %16 = math.rsqrt %15 : vector<64x1xf32>
    %17 = vector.broadcast %16 : vector<64x1xf32> to vector<64x32xf32>
    %18 = arith.mulf %11, %17 : vector<64x32xf32>
    %c0_5 = arith.constant 0 : index
    %c0_6 = arith.constant 0 : index
    %19 = vector.load %arg8[%c0_5, %c0_6] : memref<1x32xf32, #tpu.memory_space<vmem>>, vector<1x32xf32>
    %20 = vector.broadcast %19 : vector<1x32xf32> to vector<64x32xf32>
    %21 = arith.mulf %18, %20 : vector<64x32xf32>
    %c0_7 = arith.constant 0 : index
    %c0_8 = arith.constant 0 : index
    %22 = vector.load %arg9[%c0_7, %c0_8] : memref<1x32xf32, #tpu.memory_space<vmem>>, vector<1x32xf32>
    %23 = vector.broadcast %22 : vector<1x32xf32> to vector<64x32xf32>
    %24 = arith.addf %21, %23 : vector<64x32xf32>
    %25 = arith.truncf %24 : vector<64x32xf32> to vector<64x32xbf16>
    %c0_9 = arith.constant 0 : index
    %c0_10 = arith.constant 0 : index
    %26 = vector.load %arg4[%c0_9, %c0_10] : memref<32x96xbf16, #tpu.memory_space<vmem>>, vector<32x96xbf16>
    %cst_11 = arith.constant dense<0.000000e+00> : vector<64x96xf32>
    %27 = tpu.matmul %25, %26, %cst_11 {dimension_numbers = #tpu.dot_dimension_numbers<[1], [0], [0], [1], [0, 0, 1, 1], [], []>} : vector<64x32xbf16>, vector<32x96xbf16>, vector<64x96xf32> -> vector<64x96xf32>
    %c0_12 = arith.constant 0 : index
    %c0_13 = arith.constant 0 : index
    %28 = vector.load %arg5[%c0_12, %c0_13] : memref<1x96xf32, #tpu.memory_space<vmem>>, vector<1x96xf32>
    %29 = vector.broadcast %28 : vector<1x96xf32> to vector<64x96xf32>
    %30 = arith.addf %27, %29 : vector<64x96xf32>
    %c0_14 = arith.constant 0 : index
    %c0_15 = arith.constant 0 : index
    %c0_16 = arith.constant 0 : index
    %31 = vector.load %arg3[%c0_14, %c0_15, %c0_16] : memref<4x16x16xf32, #tpu.memory_space<vmem>>, vector<4x16x16xf32>
    %c0_17 = arith.constant 0 : index
    %c0_18 = arith.constant 0 : index
    %c0_19 = arith.constant 0 : index
    %32 = vector.load %arg2[%c0_17, %c0_18, %c0_19] : memref<4x16x16xf32, #tpu.memory_space<vmem>>, vector<4x16x16xf32>
    %33 = vector.extract_strided_slice %30 {offsets = [0, 0], sizes = [64, 8], strides = [1, 1]} : vector<64x96xf32> to vector<64x8xf32>
    %34 = vector.shape_cast %33 : vector<64x8xf32> to vector<4x16x8xf32>
    %35 = vector.extract_strided_slice %30 {offsets = [0, 32], sizes = [64, 8], strides = [1, 1]} : vector<64x96xf32> to vector<64x8xf32>
    %36 = vector.shape_cast %35 : vector<64x8xf32> to vector<4x16x8xf32>
    %37 = vector.extract_strided_slice %30 {offsets = [0, 64], sizes = [64, 8], strides = [1, 1]} : vector<64x96xf32> to vector<64x8xf32>
    %38 = vector.shape_cast %37 : vector<64x8xf32> to vector<4x16x8xf32>
    "tpu.trace_start"() <{level = 10 : i32, message = "wqd,wkd->wqk"}> : () -> ()
    %cst_20 = arith.constant dense<0.000000e+00> : vector<4x16x16xf32>
    %39 = tpu.matmul %34, %36, %cst_20 {dimension_numbers = #tpu.dot_dimension_numbers<[2], [2], [1], [1], [0, 0, 0, 1, 1, 1], [0], [0]>} : vector<4x16x8xf32>, vector<4x16x8xf32>, vector<4x16x16xf32> -> vector<4x16x16xf32>
    "tpu.trace_stop"() : () -> ()
    %40 = vector.extract_strided_slice %31 {offsets = [0, 0, 0], sizes = [1, 16, 16], strides = [1, 1, 1]} : vector<4x16x16xf32> to vector<1x16x16xf32>
    %41 = vector.shape_cast %40 : vector<1x16x16xf32> to vector<16x16xf32>
    %42 = vector.shape_cast %41 : vector<16x16xf32> to vector<1x16x16xf32>
    %43 = vector.broadcast %42 : vector<1x16x16xf32> to vector<4x16x16xf32>
    %44 = arith.addf %39, %43 : vector<4x16x16xf32>
    %45 = arith.addf %44, %32 : vector<4x16x16xf32>
    %cst_21 = arith.constant dense<0xFF800000> : vector<4x16xf32>
    %46 = vector.multi_reduction <maximumf>, %45, %cst_21 [2] : vector<4x16x16xf32> to vector<4x16xf32>
    %47 = vector.shape_cast %46 : vector<4x16xf32> to vector<4x16x1xf32>
    %48 = vector.broadcast %47 : vector<4x16x1xf32> to vector<4x16x16xf32>
    %49 = arith.subf %45, %48 : vector<4x16x16xf32>
    %50 = math.exp %49 : vector<4x16x16xf32>
    %cst_22 = arith.constant dense<0.000000e+00> : vector<4x16xf32>
    %51 = vector.multi_reduction <add>, %50, %cst_22 [2] : vector<4x16x16xf32> to vector<4x16xf32>
    %52 = vector.shape_cast %51 : vector<4x16xf32> to vector<4x16x1xf32>
    %53 = tpu.reciprocal %52 {approx = true} : vector<4x16x1xf32> -> vector<4x16x1xf32>
    %54 = vector.broadcast %53 : vector<4x16x1xf32> to vector<4x16x16xf32>
    %55 = arith.mulf %50, %54 : vector<4x16x16xf32>
    %56 = arith.truncf %55 : vector<4x16x16xf32> to vector<4x16x16xbf16>
    %57 = arith.truncf %38 : vector<4x16x8xf32> to vector<4x16x8xbf16>
    "tpu.trace_start"() <{level = 10 : i32, message = "wqk,wkd->wqd"}> : () -> ()
    %cst_23 = arith.constant dense<0.000000e+00> : vector<4x16x8xf32>
    %58 = tpu.matmul %56, %57, %cst_23 {dimension_numbers = #tpu.dot_dimension_numbers<[2], [1], [1], [2], [0, 0, 0, 1, 1, 2], [0], [0]>} : vector<4x16x16xbf16>, vector<4x16x8xbf16>, vector<4x16x8xf32> -> vector<4x16x8xf32>
    "tpu.trace_stop"() : () -> ()
    %59 = vector.shape_cast %58 : vector<4x16x8xf32> to vector<64x8xf32>
    %60 = vector.extract_strided_slice %30 {offsets = [0, 8], sizes = [64, 8], strides = [1, 1]} : vector<64x96xf32> to vector<64x8xf32>
    %61 = vector.shape_cast %60 : vector<64x8xf32> to vector<4x16x8xf32>
    %62 = vector.extract_strided_slice %30 {offsets = [0, 40], sizes = [64, 8], strides = [1, 1]} : vector<64x96xf32> to vector<64x8xf32>
    %63 = vector.shape_cast %62 : vector<64x8xf32> to vector<4x16x8xf32>
    %64 = vector.extract_strided_slice %30 {offsets = [0, 72], sizes = [64, 8], strides = [1, 1]} : vector<64x96xf32> to vector<64x8xf32>
    %65 = vector.shape_cast %64 : vector<64x8xf32> to vector<4x16x8xf32>
    "tpu.trace_start"() <{level = 10 : i32, message = "wqd,wkd->wqk"}> : () -> ()
    %cst_24 = arith.constant dense<0.000000e+00> : vector<4x16x16xf32>
    %66 = tpu.matmul %61, %63, %cst_24 {dimension_numbers = #tpu.dot_dimension_numbers<[2], [2], [1], [1], [0, 0, 0, 1, 1, 1], [0], [0]>} : vector<4x16x8xf32>, vector<4x16x8xf32>, vector<4x16x16xf32> -> vector<4x16x16xf32>
    "tpu.trace_stop"() : () -> ()
    %67 = vector.extract_strided_slice %31 {offsets = [1, 0, 0], sizes = [1, 16, 16], strides = [1, 1, 1]} : vector<4x16x16xf32> to vector<1x16x16xf32>
    %68 = vector.shape_cast %67 : vector<1x16x16xf32> to vector<16x16xf32>
    %69 = vector.shape_cast %68 : vector<16x16xf32> to vector<1x16x16xf32>
    %70 = vector.broadcast %69 : vector<1x16x16xf32> to vector<4x16x16xf32>
    %71 = arith.addf %66, %70 : vector<4x16x16xf32>
    %72 = arith.addf %71, %32 : vector<4x16x16xf32>
    %cst_25 = arith.constant dense<0xFF800000> : vector<4x16xf32>
    %73 = vector.multi_reduction <maximumf>, %72, %cst_25 [2] : vector<4x16x16xf32> to vector<4x16xf32>
    %74 = vector.shape_cast %73 : vector<4x16xf32> to vector<4x16x1xf32>
    %75 = vector.broadcast %74 : vector<4x16x1xf32> to vector<4x16x16xf32>
    %76 = arith.subf %72, %75 : vector<4x16x16xf32>
    %77 = math.exp %76 : vector<4x16x16xf32>
    %cst_26 = arith.constant dense<0.000000e+00> : vector<4x16xf32>
    %78 = vector.multi_reduction <add>, %77, %cst_26 [2] : vector<4x16x16xf32> to vector<4x16xf32>
    %79 = vector.shape_cast %78 : vector<4x16xf32> to vector<4x16x1xf32>
    %80 = tpu.reciprocal %79 {approx = true} : vector<4x16x1xf32> -> vector<4x16x1xf32>
    %81 = vector.broadcast %80 : vector<4x16x1xf32> to vector<4x16x16xf32>
    %82 = arith.mulf %77, %81 : vector<4x16x16xf32>
    %83 = arith.truncf %82 : vector<4x16x16xf32> to vector<4x16x16xbf16>
    %84 = arith.truncf %65 : vector<4x16x8xf32> to vector<4x16x8xbf16>
    "tpu.trace_start"() <{level = 10 : i32, message = "wqk,wkd->wqd"}> : () -> ()
    %cst_27 = arith.constant dense<0.000000e+00> : vector<4x16x8xf32>
    %85 = tpu.matmul %83, %84, %cst_27 {dimension_numbers = #tpu.dot_dimension_numbers<[2], [1], [1], [2], [0, 0, 0, 1, 1, 2], [0], [0]>} : vector<4x16x16xbf16>, vector<4x16x8xbf16>, vector<4x16x8xf32> -> vector<4x16x8xf32>
    "tpu.trace_stop"() : () -> ()
    %86 = vector.shape_cast %85 : vector<4x16x8xf32> to vector<64x8xf32>
    %87 = vector.extract_strided_slice %30 {offsets = [0, 16], sizes = [64, 8], strides = [1, 1]} : vector<64x96xf32> to vector<64x8xf32>
    %88 = vector.shape_cast %87 : vector<64x8xf32> to vector<4x16x8xf32>
    %89 = vector.extract_strided_slice %30 {offsets = [0, 48], sizes = [64, 8], strides = [1, 1]} : vector<64x96xf32> to vector<64x8xf32>
    %90 = vector.shape_cast %89 : vector<64x8xf32> to vector<4x16x8xf32>
    %91 = vector.extract_strided_slice %30 {offsets = [0, 80], sizes = [64, 8], strides = [1, 1]} : vector<64x96xf32> to vector<64x8xf32>
    %92 = vector.shape_cast %91 : vector<64x8xf32> to vector<4x16x8xf32>
    "tpu.trace_start"() <{level = 10 : i32, message = "wqd,wkd->wqk"}> : () -> ()
    %cst_28 = arith.constant dense<0.000000e+00> : vector<4x16x16xf32>
    %93 = tpu.matmul %88, %90, %cst_28 {dimension_numbers = #tpu.dot_dimension_numbers<[2], [2], [1], [1], [0, 0, 0, 1, 1, 1], [0], [0]>} : vector<4x16x8xf32>, vector<4x16x8xf32>, vector<4x16x16xf32> -> vector<4x16x16xf32>
    "tpu.trace_stop"() : () -> ()
    %94 = vector.extract_strided_slice %31 {offsets = [2, 0, 0], sizes = [1, 16, 16], strides = [1, 1, 1]} : vector<4x16x16xf32> to vector<1x16x16xf32>
    %95 = vector.shape_cast %94 : vector<1x16x16xf32> to vector<16x16xf32>
    %96 = vector.shape_cast %95 : vector<16x16xf32> to vector<1x16x16xf32>
    %97 = vector.broadcast %96 : vector<1x16x16xf32> to vector<4x16x16xf32>
    %98 = arith.addf %93, %97 : vector<4x16x16xf32>
    %99 = arith.addf %98, %32 : vector<4x16x16xf32>
    %cst_29 = arith.constant dense<0xFF800000> : vector<4x16xf32>
    %100 = vector.multi_reduction <maximumf>, %99, %cst_29 [2] : vector<4x16x16xf32> to vector<4x16xf32>
    %101 = vector.shape_cast %100 : vector<4x16xf32> to vector<4x16x1xf32>
    %102 = vector.broadcast %101 : vector<4x16x1xf32> to vector<4x16x16xf32>
    %103 = arith.subf %99, %102 : vector<4x16x16xf32>
    %104 = math.exp %103 : vector<4x16x16xf32>
    %cst_30 = arith.constant dense<0.000000e+00> : vector<4x16xf32>
    %105 = vector.multi_reduction <add>, %104, %cst_30 [2] : vector<4x16x16xf32> to vector<4x16xf32>
    %106 = vector.shape_cast %105 : vector<4x16xf32> to vector<4x16x1xf32>
    %107 = tpu.reciprocal %106 {approx = true} : vector<4x16x1xf32> -> vector<4x16x1xf32>
    %108 = vector.broadcast %107 : vector<4x16x1xf32> to vector<4x16x16xf32>
    %109 = arith.mulf %104, %108 : vector<4x16x16xf32>
    %110 = arith.truncf %109 : vector<4x16x16xf32> to vector<4x16x16xbf16>
    %111 = arith.truncf %92 : vector<4x16x8xf32> to vector<4x16x8xbf16>
    "tpu.trace_start"() <{level = 10 : i32, message = "wqk,wkd->wqd"}> : () -> ()
    %cst_31 = arith.constant dense<0.000000e+00> : vector<4x16x8xf32>
    %112 = tpu.matmul %110, %111, %cst_31 {dimension_numbers = #tpu.dot_dimension_numbers<[2], [1], [1], [2], [0, 0, 0, 1, 1, 2], [0], [0]>} : vector<4x16x16xbf16>, vector<4x16x8xbf16>, vector<4x16x8xf32> -> vector<4x16x8xf32>
    "tpu.trace_stop"() : () -> ()
    %113 = vector.shape_cast %112 : vector<4x16x8xf32> to vector<64x8xf32>
    %114 = vector.extract_strided_slice %30 {offsets = [0, 24], sizes = [64, 8], strides = [1, 1]} : vector<64x96xf32> to vector<64x8xf32>
    %115 = vector.shape_cast %114 : vector<64x8xf32> to vector<4x16x8xf32>
    %116 = vector.extract_strided_slice %30 {offsets = [0, 56], sizes = [64, 8], strides = [1, 1]} : vector<64x96xf32> to vector<64x8xf32>
    %117 = vector.shape_cast %116 : vector<64x8xf32> to vector<4x16x8xf32>
    %118 = vector.extract_strided_slice %30 {offsets = [0, 88], sizes = [64, 8], strides = [1, 1]} : vector<64x96xf32> to vector<64x8xf32>
    %119 = vector.shape_cast %118 : vector<64x8xf32> to vector<4x16x8xf32>
    "tpu.trace_start"() <{level = 10 : i32, message = "wqd,wkd->wqk"}> : () -> ()
    %cst_32 = arith.constant dense<0.000000e+00> : vector<4x16x16xf32>
    %120 = tpu.matmul %115, %117, %cst_32 {dimension_numbers = #tpu.dot_dimension_numbers<[2], [2], [1], [1], [0, 0, 0, 1, 1, 1], [0], [0]>} : vector<4x16x8xf32>, vector<4x16x8xf32>, vector<4x16x16xf32> -> vector<4x16x16xf32>
    "tpu.trace_stop"() : () -> ()
    %121 = vector.extract_strided_slice %31 {offsets = [3, 0, 0], sizes = [1, 16, 16], strides = [1, 1, 1]} : vector<4x16x16xf32> to vector<1x16x16xf32>
    %122 = vector.shape_cast %121 : vector<1x16x16xf32> to vector<16x16xf32>
    %123 = vector.shape_cast %122 : vector<16x16xf32> to vector<1x16x16xf32>
    %124 = vector.broadcast %123 : vector<1x16x16xf32> to vector<4x16x16xf32>
    %125 = arith.addf %120, %124 : vector<4x16x16xf32>
    %126 = arith.addf %125, %32 : vector<4x16x16xf32>
    %cst_33 = arith.constant dense<0xFF800000> : vector<4x16xf32>
    %127 = vector.multi_reduction <maximumf>, %126, %cst_33 [2] : vector<4x16x16xf32> to vector<4x16xf32>
    %128 = vector.shape_cast %127 : vector<4x16xf32> to vector<4x16x1xf32>
    %129 = vector.broadcast %128 : vector<4x16x1xf32> to vector<4x16x16xf32>
    %130 = arith.subf %126, %129 : vector<4x16x16xf32>
    %131 = math.exp %130 : vector<4x16x16xf32>
    %cst_34 = arith.constant dense<0.000000e+00> : vector<4x16xf32>
    %132 = vector.multi_reduction <add>, %131, %cst_34 [2] : vector<4x16x16xf32> to vector<4x16xf32>
    %133 = vector.shape_cast %132 : vector<4x16xf32> to vector<4x16x1xf32>
    %134 = tpu.reciprocal %133 {approx = true} : vector<4x16x1xf32> -> vector<4x16x1xf32>
    %135 = vector.broadcast %134 : vector<4x16x1xf32> to vector<4x16x16xf32>
    %136 = arith.mulf %131, %135 : vector<4x16x16xf32>
    %137 = arith.truncf %136 : vector<4x16x16xf32> to vector<4x16x16xbf16>
    %138 = arith.truncf %119 : vector<4x16x8xf32> to vector<4x16x8xbf16>
    "tpu.trace_start"() <{level = 10 : i32, message = "wqk,wkd->wqd"}> : () -> ()
    %cst_35 = arith.constant dense<0.000000e+00> : vector<4x16x8xf32>
    %139 = tpu.matmul %137, %138, %cst_35 {dimension_numbers = #tpu.dot_dimension_numbers<[2], [1], [1], [2], [0, 0, 0, 1, 1, 2], [0], [0]>} : vector<4x16x16xbf16>, vector<4x16x8xbf16>, vector<4x16x8xf32> -> vector<4x16x8xf32>
    "tpu.trace_stop"() : () -> ()
    %140 = vector.shape_cast %139 : vector<4x16x8xf32> to vector<64x8xf32>
    %141 = tpu.concatenate %59, %86, %113, %140 in 1 : vector<64x8xf32>, vector<64x8xf32>, vector<64x8xf32>, vector<64x8xf32> -> vector<64x32xf32>
    %142 = arith.truncf %141 : vector<64x32xf32> to vector<64x32xbf16>
    %c0_36 = arith.constant 0 : index
    %c0_37 = arith.constant 0 : index
    %143 = vector.load %arg6[%c0_36, %c0_37] : memref<32x32xbf16, #tpu.memory_space<vmem>>, vector<32x32xbf16>
    %cst_38 = arith.constant dense<0.000000e+00> : vector<64x32xf32>
    %144 = tpu.matmul %142, %143, %cst_38 {dimension_numbers = #tpu.dot_dimension_numbers<[1], [0], [0], [1], [0, 0, 1, 1], [], []>} : vector<64x32xbf16>, vector<32x32xbf16>, vector<64x32xf32> -> vector<64x32xf32>
    %c0_39 = arith.constant 0 : index
    %c0_40 = arith.constant 0 : index
    %145 = vector.load %arg7[%c0_39, %c0_40] : memref<1x32xf32, #tpu.memory_space<vmem>>, vector<1x32xf32>
    %146 = vector.broadcast %145 : vector<1x32xf32> to vector<64x32xf32>
    %147 = arith.addf %144, %146 : vector<64x32xf32>
    %148 = arith.addf %0, %147 : vector<64x32xf32>
    %cst_41 = arith.constant dense<0.000000e+00> : vector<64xf32>
    %149 = vector.multi_reduction <add>, %148, %cst_41 [1] : vector<64x32xf32> to vector<64xf32>
    %150 = vector.shape_cast %149 : vector<64xf32> to vector<64x1xf32>
    %cst_42 = arith.constant 3.200000e+01 : f32
    %151 = vector.broadcast %cst_42 : f32 to vector<64x1xf32>
    %152 = arith.divf %150, %151 : vector<64x1xf32>
    %153 = arith.mulf %148, %148 : vector<64x32xf32>
    %cst_43 = arith.constant dense<0.000000e+00> : vector<64xf32>
    %154 = vector.multi_reduction <add>, %153, %cst_43 [1] : vector<64x32xf32> to vector<64xf32>
    %155 = vector.shape_cast %154 : vector<64xf32> to vector<64x1xf32>
    %cst_44 = arith.constant 3.200000e+01 : f32
    %156 = vector.broadcast %cst_44 : f32 to vector<64x1xf32>
    %157 = arith.divf %155, %156 : vector<64x1xf32>
    %158 = vector.broadcast %152 : vector<64x1xf32> to vector<64x32xf32>
    %159 = arith.subf %148, %158 : vector<64x32xf32>
    %160 = arith.mulf %152, %152 : vector<64x1xf32>
    %161 = arith.subf %157, %160 : vector<64x1xf32>
    %cst_45 = arith.constant 9.99999974E-6 : f32
    %162 = vector.broadcast %cst_45 : f32 to vector<64x1xf32>
    %163 = arith.addf %161, %162 : vector<64x1xf32>
    %164 = math.rsqrt %163 : vector<64x1xf32>
    %165 = vector.broadcast %164 : vector<64x1xf32> to vector<64x32xf32>
    %166 = arith.mulf %159, %165 : vector<64x32xf32>
    %c0_46 = arith.constant 0 : index
    %c0_47 = arith.constant 0 : index
    %167 = vector.load %arg10[%c0_46, %c0_47] : memref<1x32xf32, #tpu.memory_space<vmem>>, vector<1x32xf32>
    %168 = vector.broadcast %167 : vector<1x32xf32> to vector<64x32xf32>
    %169 = arith.mulf %166, %168 : vector<64x32xf32>
    %c0_48 = arith.constant 0 : index
    %c0_49 = arith.constant 0 : index
    %170 = vector.load %arg11[%c0_48, %c0_49] : memref<1x32xf32, #tpu.memory_space<vmem>>, vector<1x32xf32>
    %171 = vector.broadcast %170 : vector<1x32xf32> to vector<64x32xf32>
    %172 = arith.addf %169, %171 : vector<64x32xf32>
    %173 = arith.truncf %172 : vector<64x32xf32> to vector<64x32xbf16>
    %c0_50 = arith.constant 0 : index
    %c0_51 = arith.constant 0 : index
    %174 = vector.load %arg12[%c0_50, %c0_51] : memref<32x128xbf16, #tpu.memory_space<vmem>>, vector<32x128xbf16>
    %cst_52 = arith.constant dense<0.000000e+00> : vector<64x128xf32>
    %175 = tpu.matmul %173, %174, %cst_52 {dimension_numbers = #tpu.dot_dimension_numbers<[1], [0], [0], [1], [0, 0, 1, 1], [], []>} : vector<64x32xbf16>, vector<32x128xbf16>, vector<64x128xf32> -> vector<64x128xf32>
    %c0_53 = arith.constant 0 : index
    %c0_54 = arith.constant 0 : index
    %176 = vector.load %arg13[%c0_53, %c0_54] : memref<1x128xf32, #tpu.memory_space<vmem>>, vector<1x128xf32>
    %177 = vector.broadcast %176 : vector<1x128xf32> to vector<64x128xf32>
    %178 = arith.addf %175, %177 : vector<64x128xf32>
    %cst_55 = arith.constant 5.000000e-01 : f32
    %179 = vector.broadcast %cst_55 : f32 to vector<64x128xf32>
    %180 = arith.mulf %179, %178 : vector<64x128xf32>
    %cst_56 = arith.constant 0.707106769 : f32
    %181 = vector.broadcast %cst_56 : f32 to vector<64x128xf32>
    %182 = arith.mulf %178, %181 : vector<64x128xf32>
    %183 = math.erf %182 : vector<64x128xf32>
    %cst_57 = arith.constant 1.000000e+00 : f32
    %184 = vector.broadcast %cst_57 : f32 to vector<64x128xf32>
    %185 = arith.addf %184, %183 : vector<64x128xf32>
    %186 = arith.mulf %180, %185 : vector<64x128xf32>
    %187 = arith.truncf %186 : vector<64x128xf32> to vector<64x128xbf16>
    %c0_58 = arith.constant 0 : index
    %c0_59 = arith.constant 0 : index
    %188 = vector.load %arg14[%c0_58, %c0_59] : memref<128x32xbf16, #tpu.memory_space<vmem>>, vector<128x32xbf16>
    %cst_60 = arith.constant dense<0.000000e+00> : vector<64x32xf32>
    %189 = tpu.matmul %187, %188, %cst_60 {dimension_numbers = #tpu.dot_dimension_numbers<[1], [0], [0], [1], [0, 0, 1, 1], [], []>} : vector<64x128xbf16>, vector<128x32xbf16>, vector<64x32xf32> -> vector<64x32xf32>
    %c0_61 = arith.constant 0 : index
    %c0_62 = arith.constant 0 : index
    %190 = vector.load %arg15[%c0_61, %c0_62] : memref<1x32xf32, #tpu.memory_space<vmem>>, vector<1x32xf32>
    %191 = vector.broadcast %190 : vector<1x32xf32> to vector<64x32xf32>
    %192 = arith.addf %189, %191 : vector<64x32xf32>
    %193 = arith.addf %148, %192 : vector<64x32xf32>
    %c0_63 = arith.constant 0 : index
    %c0_64 = arith.constant 0 : index
    %194 = vector.load %arg16[%c0_63, %c0_64] : memref<64x32xf32, #tpu.memory_space<vmem>>, vector<64x32xf32>
    tpu.vector_store %arg16[%c0_63, %c0_64], %193 {strides = array<i32>} : memref<64x32xf32, #tpu.memory_space<vmem>>, vector<64x32xf32>,
    return
  }
  func.func @transform_0(%arg0: i32) -> (i32, i32) {
    %c0_i32 = arith.constant 0 : i32
    %c0_i32_0 = arith.constant 0 : i32
    return %arg0, %c0_i32 : i32, i32
  }
  func.func @transform_1(%arg0: i32) -> (i32, i32, i32) {
    %c1_i32 = arith.constant 1 : i32
    %c0_i32 = arith.constant 0 : i32
    %0 = arith.cmpi eq, %c1_i32, %c0_i32 : i32
    %c1_i32_0 = arith.constant 1 : i32
    %1 = arith.select %0, %c1_i32_0, %c1_i32 : i32
    %2 = arith.remsi %arg0, %1 : i32
    %c0_i32_1 = arith.constant 0 : i32
    %3 = arith.cmpi ne, %2, %c0_i32_1 : i32
    %c0_i32_2 = arith.constant 0 : i32
    %4 = arith.cmpi slt, %2, %c0_i32_2 : i32
    %c0_i32_3 = arith.constant 0 : i32
    %5 = arith.cmpi slt, %1, %c0_i32_3 : i32
    %6 = arith.xori %4, %5 : i1
    %7 = arith.andi %6, %3 : i1
    %8 = arith.addi %2, %1 : i32
    %9 = arith.select %7, %8, %2 : i32
    %c0_i32_4 = arith.constant 0 : i32
    %c0_i32_5 = arith.constant 0 : i32
    %c0_i32_6 = arith.constant 0 : i32
    return %9, %c0_i32_4, %c0_i32_5 : i32, i32, i32
  }
  func.func @transform_2(%arg0: i32) -> (i32, i32, i32) {
    %c0_i32 = arith.constant 0 : i32
    %c0_i32_0 = arith.constant 0 : i32
    %c0_i32_1 = arith.constant 0 : i32
    %c0_i32_2 = arith.constant 0 : i32
    return %c0_i32, %c0_i32_0, %c0_i32_1 : i32, i32, i32
  }
  func.func @transform_3(%arg0: i32) -> (i32, i32) {
    %c0_i32 = arith.constant 0 : i32
    %c0_i32_0 = arith.constant 0 : i32
    %c0_i32_1 = arith.constant 0 : i32
    return %c0_i32, %c0_i32_0 : i32, i32
  }
  func.func @transform_4(%arg0: i32) -> (i32, i32) {
    %c0_i32 = arith.constant 0 : i32
    %c0_i32_0 = arith.constant 0 : i32
    %c0_i32_1 = arith.constant 0 : i32
    return %c0_i32, %c0_i32_0 : i32, i32
  }
  func.func @transform_5(%arg0: i32) -> (i32, i32) {
    %c0_i32 = arith.constant 0 : i32
    %c0_i32_0 = arith.constant 0 : i32
    %c0_i32_1 = arith.constant 0 : i32
    return %c0_i32, %c0_i32_0 : i32, i32
  }
  func.func @transform_6(%arg0: i32) -> (i32, i32) {
    %c0_i32 = arith.constant 0 : i32
    %c0_i32_0 = arith.constant 0 : i32
    %c0_i32_1 = arith.constant 0 : i32
    return %c0_i32, %c0_i32_0 : i32, i32
  }
  func.func @transform_7(%arg0: i32) -> (i32, i32) {
    %c0_i32 = arith.constant 0 : i32
    %c0_i32_0 = arith.constant 0 : i32
    %c0_i32_1 = arith.constant 0 : i32
    return %c0_i32, %c0_i32_0 : i32, i32
  }
  func.func @transform_8(%arg0: i32) -> (i32, i32) {
    %c0_i32 = arith.constant 0 : i32
    %c0_i32_0 = arith.constant 0 : i32
    %c0_i32_1 = arith.constant 0 : i32
    return %c0_i32, %c0_i32_0 : i32, i32
  }
  func.func @transform_9(%arg0: i32) -> (i32, i32) {
    %c0_i32 = arith.constant 0 : i32
    %c0_i32_0 = arith.constant 0 : i32
    %c0_i32_1 = arith.constant 0 : i32
    return %c0_i32, %c0_i32_0 : i32, i32
  }
  func.func @transform_10(%arg0: i32) -> (i32, i32) {
    %c0_i32 = arith.constant 0 : i32
    %c0_i32_0 = arith.constant 0 : i32
    %c0_i32_1 = arith.constant 0 : i32
    return %c0_i32, %c0_i32_0 : i32, i32
  }
  func.func @transform_11(%arg0: i32) -> (i32, i32) {
    %c0_i32 = arith.constant 0 : i32
    %c0_i32_0 = arith.constant 0 : i32
    %c0_i32_1 = arith.constant 0 : i32
    return %c0_i32, %c0_i32_0 : i32, i32
  }
  func.func @transform_12(%arg0: i32) -> (i32, i32) {
    %c0_i32 = arith.constant 0 : i32
    %c0_i32_0 = arith.constant 0 : i32
    %c0_i32_1 = arith.constant 0 : i32
    return %c0_i32, %c0_i32_0 : i32, i32
  }
  func.func @transform_13(%arg0: i32) -> (i32, i32) {
    %c0_i32 = arith.constant 0 : i32
    %c0_i32_0 = arith.constant 0 : i32
    %c0_i32_1 = arith.constant 0 : i32
    return %c0_i32, %c0_i32_0 : i32, i32
  }
  func.func @transform_14(%arg0: i32) -> (i32, i32) {
    %c0_i32 = arith.constant 0 : i32
    %c0_i32_0 = arith.constant 0 : i32
    %c0_i32_1 = arith.constant 0 : i32
    return %c0_i32, %c0_i32_0 : i32, i32
  }
  func.func @transform_15(%arg0: i32) -> (i32, i32) {
    %c0_i32 = arith.constant 0 : i32
    %c0_i32_0 = arith.constant 0 : i32
    return %arg0, %c0_i32 : i32, i32
  }
}

</mosaic_0001>

<bundles_post_ra>
// kernel: tpu_custom_call.1
= control target key start
LH: loop header
LB: loop body
LE: loop exit
PB: predicated region body
PF: predicated region fallthrough
CT: control target
= control target key end

     0   :  { %s5041_s18 = smov 0   ;;  %s6133_s0 = inlined_call_operand.vmem [shape: f32[128,32], index: 0, kind: input, shape index: {}]   ;;  %s6134_s1 = inlined_call_operand.vmem [shape: f32[4,16,16], index: 1, kind: input, shape index: {}]   ;;  %s6135_s2 = inlined_call_operand.vmem [shape: f32[4,16,16], index: 2, kind: input, shape index: {}]   ;;  %s6136_s3 = inlined_call_operand.vmem [shape: bf16[32,96], index: 3, kind: input, shape index: {}]   ;;  %s6137_s4 = inlined_call_operand.vmem [shape: f32[1,96], index: 4, kind: input, shape index: {}]   ;;  %s6138_s5 = inlined_call_operand.vmem [shape: bf16[32,32], index: 5, kind: input, shape index: {}]   ;;  %s6139_s6 = inlined_call_operand.vmem [shape: f32[1,32], index: 6, kind: input, shape index: {}]   ;;  %s6140_s7 = inlined_call_operand.vmem [shape: f32[1,32], index: 7, kind: input, shape index: {}]   ;;  %s6141_s8 = inlined_call_operand.vmem [shape: f32[1,32], index: 8, kind: input, shape index: {}]   ;;  %s6142_s9 = inlined_call_operand.vmem [shape: f32[1,32], index: 9, kind: input, shape index: {}]   ;;  %s6143_s10 = inlined_call_operand.vmem [shape: f32[1,32], index: 10, kind: input, shape index: {}]   ;;  %s6144_s11 = inlined_call_operand.vmem [shape: bf16[32,128], index: 11, kind: input, shape index: {}]   ;;  %s6145_s12 = inlined_call_operand.vmem [shape: f32[1,128], index: 12, kind: input, shape index: {}]   ;;  %s6146_s13 = inlined_call_operand.vmem [shape: bf16[128,32], index: 13, kind: input, shape index: {}]   ;;  %s6147_s14 = inlined_call_operand.vmem [shape: f32[1,32], index: 14, kind: input, shape index: {}]   ;;  %s6148_s15 = inlined_call_operand.vmem [shape: f32[128,32], index: 15, kind: output, shape index: {}]  }
   0x1 LB: > { %s4128_s19 = sadd.s32 4294967295, %s4943_s18   ;;  %p4132_p0 = scmp.ge.s32.totalorder %s4943_s18, 1  ;;  %s4943_s18 = sphi %s5041_s18, %s25_s18  }
   0x2   : > { %p438_p1 = scmp.lt.s32.totalorder %s4943_s18, 3 }
   0x4   : > { %p439_p2 = pnand %p4132_p0, %p438_p1 }
   0x5   : > { %s4133_s20 = sshll.u32 (!%p439_p2), %s4128_s19, 3  ;;  %s4945_s23 = smov (!%p439_p2), 96  }
   0x6   : > { %442 = sbr.rel (%p439_p2) target bundleno = 3889 (0xf31), region = 80  ;;  %p487_p3 = scmp.lt.s32.totalorder (!%p439_p2), %s4133_s20, 15 }
   0x7   : > { %s4947_s22 = smov (!%p439_p2), 64   ;;  %s4949_s25 = smov (!%p439_p2), 120  }
   0x8   : > { %s4951_s26 = smov (!%p439_p2), 56   ;;  %s4952_s27 = smov (!%p439_p2), 80  }
   0x9   : > { %s4953_s17 = smov (!%p439_p2), 112   ;;  %s4954_s19 = smov (!%p439_p2), 48  }
   0xa   : > { %s4956_s30 = smov (!%p439_p2), 104   ;;  %s4958_s28 = smov (!%p439_p2), 8  }
   0xb   : > { %s6150_s20 = smov (!%p487_p3, %s4133_s20), 15  ;;  %vm507_vm0 = vcmask 261120   ;;  %v4731_v32 = vld [vmem:[%s6136_s3 + $0x8] sm:$0xff]   ;;  %v4732_v33 = vld [vmem:[%s6136_s3] sm:$0xff]   ;;  %vm785_vm1 = vcmask 64512   ;;  %vm1144_vm2 = vcmask 130048  }
   0xc   : > { %s4134_s21 = sshll.u32 %s6150_s20, 3  ;;  %4379 = vmatprep.subr.bf16.mxu1 %v4731_v32  ;;  %vm4950_vm3 = vmmov 0   ;;  %s4959_s29 = smov 16   ;;  %vm3501_vm4 = vcmask 195584  }
   0xd   : > { %s5057_s24 = scalar_lea.vmem %s6133_s0, %s4134_s21  ;;  %4380 = vmatpush3.bf16.msra.mxu1 %v4731_v32  ;;  %s496_s16 = scalar_lea.vmem %s6148_s15, %s4134_s21 }
   0xe   : > { %v5060_v0 = vld [vmem:[%s5057_s24 + $0x10] sm:$0xff]  ;;  %v5063_v1 = vld [vmem:[%s5057_s24] sm:$0xff]  ;;  %v5066_v2 = vld [vmem:[%s5057_s24 + $0x18] sm:$0xff]  ;;  %4381 = vmatprep.subr.bf16.mxu1 %v4732_v33 }
   0xf   : > { %v514_v3 = vsel %vm507_vm0, %v5060_v0, 0.0  ;;  %v508_v4 = vsel %vm507_vm0, %v5063_v1, 0.0  ;;  %v5073_v5 = vld [vmem:[%s5057_s24 + $0x8] sm:$0xff]  ;;  %v517_v6 = vsel %vm507_vm0, %v5066_v2, 0.0  ;;  %v541_v9 = vmul.f32 %v5063_v1, %v5063_v1  ;;  %v5095_v17 = vld [vmem:[%s5057_s24 + $0x20] sm:$0xff]  ;;  %v5102_v20 = vld [vmem:[%s5057_s24 + $0x38] sm:$0xff] }
  0x10   : > { %515 = vadd.xlane.f32.xlu1 %v514_v3  ;;  %509 = vadd.xlane.f32.xlu0 %v508_v4  ;;  %v511_v7 = vsel %vm507_vm0, %v5073_v5, 0.0  ;;  %v542_v8 = vmul.f32 %v5073_v5, %v5073_v5  ;;  %v544_v12 = vmul.f32 %v5066_v2, %v5066_v2  ;;  %v543_v13 = vmul.f32 %v5060_v0, %v5060_v0  ;;  %v5092_v16 = vld [vmem:[%s5057_s24 + $0x28] sm:$0xff]  ;;  %v5105_v21 = vld [vmem:[%s5057_s24 + $0x30] sm:$0xff] }
  0x11   : > { %v549_v11 = vsel %vm507_vm0, %v541_v9, 0.0  ;;  %v523_v18 = vsel %vm507_vm0, %v5092_v16, 0.0  ;;  %v520_v19 = vsel %vm507_vm0, %v5095_v17, 0.0  ;;  %v529_v22 = vsel %vm507_vm0, %v5102_v20, 0.0  ;;  %4382 = vmatpush3.bf16.msra.mxu1 %v4732_v33 }
  0x12   : > { %v552_v10 = vsel %vm507_vm0, %v542_v8, 0.0  ;;  %v558_v14 = vsel %vm507_vm0, %v544_v12, 0.0  ;;  %v555_v15 = vsel %vm507_vm0, %v543_v13, 0.0  ;;  %v526_v23 = vsel %vm507_vm0, %v5105_v21, 0.0 }
  0x13   : > { %v546_v24 = vmul.f32 %v5092_v16, %v5092_v16  ;;  %v545_v25 = vmul.f32 %v5095_v17, %v5095_v17  ;;  %v548_v28 = vmul.f32 %v5102_v20, %v5102_v20  ;;  %v547_v29 = vmul.f32 %v5105_v21, %v5105_v21 }
  0x14   : > { %518 = vadd.xlane.f32.xlu1 %v517_v6  ;;  %512 = vadd.xlane.f32.xlu0 %v511_v7 }
  0x15   : > { %v564_v26 = vsel %vm507_vm0, %v546_v24, 0.0  ;;  %v561_v27 = vsel %vm507_vm0, %v545_v25, 0.0  ;;  %v570_v30 = vsel %vm507_vm0, %v548_v28, 0.0  ;;  %v567_v31 = vsel %vm507_vm0, %v547_v29, 0.0  ;;  %v4137_v29 = vld [vmem:[%s6140_s7] ss:$0 sm:$0xff] }
  0x18   : > { %553 = vadd.xlane.f32.xlu1 %v552_v10  ;;  %550 = vadd.xlane.f32.xlu0 %v549_v11 }
  0x1c   : > { %559 = vadd.xlane.f32.xlu1 %v558_v14  ;;  %556 = vadd.xlane.f32.xlu0 %v555_v15 }
  0x20   : > { %524 = vadd.xlane.f32.xlu1 %v523_v18  ;;  %521 = vadd.xlane.f32.xlu0 %v520_v19 }
  0x24   : > { %530 = vadd.xlane.f32.xlu1 %v529_v22  ;;  %527 = vadd.xlane.f32.xlu0 %v526_v23 }
  0x28   : > { %565 = vadd.xlane.f32.xlu1 %v564_v26  ;;  %562 = vadd.xlane.f32.xlu0 %v561_v27 }
  0x2c   : > { %571 = vadd.xlane.f32.xlu1 %v570_v30  ;;  %568 = vadd.xlane.f32.xlu0 %v567_v31 }
  0x99   : > { %v516_v34 = vpop.xlane.xlu1 %515  ;;  %v510_v35 = vpop.xlane.xlu0 %509 }
  0x9a   : > { %v533_v38 = vmul.f32 0.03125, %v510_v35  ;;  %v5129_v40 = vmul.f32 0.03125, %v516_v34 }
  0x9c   : > { %v589_v44 = vmul.f32 %v533_v38, %v533_v38  ;;  %v591_v50 = vmul.f32 %v5129_v40, %v5129_v40  ;;  %v581_v23 = vsub.f32 %v5063_v1, %v533_v38  ;;  %v4138_v38 = vld [vmem:[%s6141_s8] ss:$0 sm:$0xff] }
  0x9d   : > { %v519_v36 = vpop.xlane.xlu1 %518  ;;  %v513_v37 = vpop.xlane.xlu0 %512 }
  0x9e   : > { %v534_v39 = vmul.f32 0.03125, %v513_v37  ;;  %v5131_v41 = vmul.f32 0.03125, %v519_v36 }
  0xa0   : > { %v590_v45 = vmul.f32 %v534_v39, %v534_v39  ;;  %v592_v51 = vmul.f32 %v5131_v41, %v5131_v41  ;;  %v582_v24 = vsub.f32 %v5073_v5, %v534_v39  ;;  %v584_v5 = vsub.f32 %v5066_v2, %v5131_v41 }
  0xa1   : > { %v554_v42 = vpop.xlane.xlu1 %553  ;;  %v551_v43 = vpop.xlane.xlu0 %550 }
  0xa2   : > { %v574_v46 = vmul.f32 0.03125, %v554_v42  ;;  %v573_v47 = vmul.f32 0.03125, %v551_v43  ;;  %v583_v42 = vsub.f32 %v5060_v0, %v5129_v40 }
  0xa4   : > { %v598_v48 = vsub.f32 %v574_v46, %v590_v45  ;;  %v597_v49 = vsub.f32 %v573_v47, %v589_v44 }
  0xa5   : > { %v560_v52 = vpop.xlane.xlu1 %559  ;;  %v557_v53 = vpop.xlane.xlu0 %556 }
  0xa6   : > { %v606_v54 = vadd.f32 1e-05, %v598_v48  ;;  %v605_v55 = vadd.f32 1e-05, %v597_v49  ;;  %v576_v56 = vmul.f32 0.03125, %v560_v52  ;;  %v575_v57 = vmul.f32 0.03125, %v557_v53 }
  0xa8   : > { %4745 = vrsqrt.f32 %v606_v54  ;;  %v600_v58 = vsub.f32 %v576_v56, %v592_v51  ;;  %v599_v59 = vsub.f32 %v575_v57, %v591_v50 }
  0xa9   : > { %4747 = vrsqrt.f32 %v605_v55  ;;  %v525_v60 = vpop.xlane.xlu1 %524  ;;  %v522_v61 = vpop.xlane.xlu0 %521 }
  0xaa   : > { %v608_v62 = vadd.f32 1e-05, %v600_v58  ;;  %v607_v63 = vadd.f32 1e-05, %v599_v59  ;;  %v538_v6 = vmul.f32 0.03125, %v525_v60  ;;  %v537_v7 = vmul.f32 0.03125, %v522_v61 }
  0xac   : > { %4749 = vrsqrt.f32 %v608_v62  ;;  %v594_v12 = vmul.f32 %v538_v6, %v538_v6  ;;  %v593_v13 = vmul.f32 %v537_v7, %v537_v7  ;;  %v586_v40 = vsub.f32 %v5092_v16, %v538_v6 }
  0xad   : > { %4751 = vrsqrt.f32 %v607_v63  ;;  %v531_v3 = vpop.xlane.xlu1 %530  ;;  %v528_v4 = vpop.xlane.xlu0 %527  ;;  %v585_v56 = vsub.f32 %v5095_v17, %v537_v7 }
  0xae   : > { %v5137_v8 = vmul.f32 0.03125, %v531_v3  ;;  %v5139_v9 = vmul.f32 0.03125, %v528_v4 }
  0xb0   : > { %v596_v25 = vmul.f32 %v5137_v8, %v5137_v8  ;;  %v595_v26 = vmul.f32 %v5139_v9, %v5139_v9  ;;  %v588_v60 = vsub.f32 %v5102_v20, %v5137_v8  ;;  %v587_v63 = vsub.f32 %v5105_v21, %v5139_v9  ;;  %v4139_v21 = vld [vmem:[%s6137_s4] ss:$0 sm:$0xff] }
  0xb1   : > { %v566_v10 = vpop.xlane.xlu1 %565  ;;  %v563_v11 = vpop.xlane.xlu0 %562 }
  0xb2   : > { %v578_v14 = vmul.f32 0.03125, %v566_v10  ;;  %v577_v15 = vmul.f32 0.03125, %v563_v11 }
  0xb4   : > { %v602_v18 = vsub.f32 %v578_v14, %v594_v12  ;;  %v601_v19 = vsub.f32 %v577_v15, %v593_v13 }
  0xb5   : > { %v4746_v22 = vpop.eup %4745  ;;  %v572_v27 = vpop.xlane.xlu1 %571 }
  0xb6   : > { %v569_v28 = vpop.xlane.xlu0 %568  ;;  %v4748_v30 = vpop.eup %4747  ;;  %v610_v31 = vadd.f32 1e-05, %v602_v18  ;;  %v609_v32 = vadd.f32 1e-05, %v601_v19  ;;  %v580_v33 = vmul.f32 0.03125, %v572_v27  ;;  %v622_v35 = vmul.f32 %v4746_v22, %v582_v24 }
  0xb7   : > { %v579_v34 = vmul.f32 0.03125, %v569_v28  ;;  %v621_v1 = vmul.f32 %v4748_v30, %v581_v23 }
  0xb8   : > { %4753 = vrsqrt.f32 %v610_v31  ;;  %v604_v36 = vsub.f32 %v580_v33, %v596_v25  ;;  %v637_v44 = vmul.f32 %v4137_v29, %v622_v35 }
  0xb9   : > { %v603_v37 = vsub.f32 %v579_v34, %v595_v26  ;;  %v4750_v39 = vpop.eup %4749  ;;  %4755 = vrsqrt.f32 %v609_v32  ;;  %v636_v43 = vmul.f32 %v4137_v29, %v621_v1 }
  0xba   : > { %v4752_v45 = vpop.eup %4751  ;;  %v612_v46 = vadd.f32 1e-05, %v604_v36  ;;  %v624_v48 = vmul.f32 %v4750_v39, %v584_v5  ;;  %v652_v2 = vadd.f32 %v4138_v38, %v637_v44  ;;  %v764_v39 = vld [vmem:[%s6135_s2 + $0x8] sm:$0xff] }
  0xbb   : > { %v611_v47 = vadd.f32 1e-05, %v603_v37  ;;  %v651_v49 = vadd.f32 %v4138_v38, %v636_v43  ;;  %v623_v41 = vmul.f32 %v4752_v45, %v583_v42  ;;  %v763_v43 = vld [vmem:[%s6135_s2] sm:$0xff]  ;;  %v5235_v44 = vld [vmem:[%s6134_s1 + $0x8] sm:$0xff] }
  0xbc   : > { %4757 = vrsqrt.f32 %v612_v46  ;;  %v639_v50 = vmul.f32 %v4137_v29, %v624_v48 }
  0xbd   : > { %4759 = vrsqrt.f32 %v611_v47  ;;  %v659_v51 = vpack.c.bf16 %v652_v2, %v651_v49  ;;  %v638_v52 = vmul.f32 %v4137_v29, %v623_v41  ;;  %v5240_v47 = vld [vmem:[%s6134_s1] sm:$0xff] }
  0xbe   : > { %v654_v53 = vadd.f32 %v4138_v38, %v639_v50 }
  0xbf   : > { %4383 = vmatprep.mubr.msk.bf16.mxu1 %vm507_vm0, %v659_v51  ;;  %v653_v54 = vadd.f32 %v4138_v38, %v638_v52  ;;  %v5255_v52 = vld [vmem:[%s6134_s1 + $0x18] sm:$0xff] }
  0xc1   : > { %v660_v0 = vpack.c.bf16 %v654_v53, %v653_v54 }
  0xc3   : > { %4384 = vmatmul.mubr.msk.bf16.vlgmr.msra.gmra.mxu1 %vm507_vm0, %v660_v0  ;;  %v5260_v0 = vld [vmem:[%s6134_s1 + $0x10] sm:$0xff] }
  0xc5   : > { %v4754_v55 = vpop.eup %4753 }
  0xc6   : > { %v4756_v57 = vpop.eup %4755  ;;  %v626_v58 = vmul.f32 %v4754_v55, %v586_v40 }
  0xc7   : > { %v625_v59 = vmul.f32 %v4756_v57, %v585_v56 }
  0xc8   : > { %v641_v61 = vmul.f32 %v4137_v29, %v626_v58 }
  0xc9   : > { %v4758_v62 = vpop.eup %4757  ;;  %v640_v3 = vmul.f32 %v4137_v29, %v625_v59 }
  0xca   : > { %v4760_v4 = vpop.eup %4759  ;;  %v656_v10 = vadd.f32 %v4138_v38, %v641_v61  ;;  %v628_v11 = vmul.f32 %v4758_v62, %v588_v60  ;;  %v5268_v60 = vld [vmem:[%s6134_s1 + $0x28] sm:$0xff] }
  0xcb   : > { %v655_v12 = vadd.f32 %v4138_v38, %v640_v3  ;;  %v627_v16 = vmul.f32 %v4760_v4, %v587_v63 }
  0xcc   : > { %v643_v6 = vmul.f32 %v4137_v29, %v628_v11  ;;  %v5279_v11 = vld [vmem:[%s6134_s1 + $0x38] sm:$0xff] }
  0xcd   : > { %v661_v13 = vpack.c.bf16 %v656_v10, %v655_v12  ;;  %v642_v17 = vmul.f32 %v4137_v29, %v627_v16  ;;  %v5274_v10 = vld [vmem:[%s6134_s1 + $0x20] sm:$0xff] }
  0xce   : > { %v658_v7 = vadd.f32 %v4138_v38, %v643_v6 }
  0xcf   : > { %4387 = vmatprep.mubr.msk.bf16.mxu1 %vm507_vm0, %v661_v13  ;;  %v657_v14 = vadd.f32 %v4138_v38, %v642_v17  ;;  %v5285_v13 = vld [vmem:[%s6134_s1 + $0x30] sm:$0xff] }
  0xd1   : > { %v662_v15 = vpack.c.bf16 %v658_v7, %v657_v14 }
  0xd3   : > { %4388 = vmatmul.mubr.msk.bf16.gmra.mxu1 %vm507_vm0, %v662_v15 }
 0x183   : > { %v4385_v20 = vpop.f32.mrf.mxu1 }
 0x184   : > { %v5181_v24 = vadd.f32 %v4385_v20, %v4139_v21 }
 0x185   : > { %v732_v8 = vpop.f32.mrf.mxu1 }
 0x186   : > { %v5170_v9 = vadd.f32 %v4139_v21, %v732_v8 }
 0x187   : > { %v4386_v18 = vpop.f32.mrf.mxu1 }
 0x188   : > { %781 = vrot.lane.b32.xlu1 %v5170_v9, %s4945_s23  ;;  %4395 = vmatprep.mubr.msk.f32.mxu1 %vm785_vm1, %v5170_v9  ;;  %v5175_v22 = vadd.f32 %v4386_v18, %v4139_v21  ;;  %v4946_v18 = vmov 0.0  }
 0x189   : > { %v735_v19 = vpop.f32.mrf.mxu1 }
 0x18a   : > { %v5177_v23 = vadd.f32 %v4139_v21, %v735_v19  ;;  %v5301_v19 = vpack.c.bf16 %v5175_v22, %v5181_v24 }
 0x18c   : > { %783 = vrot.lane.b32.xlu0 %v5177_v23, %s4945_s23  ;;  %873 = vrot.lane.b32.xlu1 %v5175_v22, %s4945_s23 }
 0x190   : > { %871 = vrot.lane.b32.xlu1 %v5181_v24, %s4945_s23 }
 0x193   : > { %v4389_v25 = vpop.f32.mrf.mxu1 }
 0x194   : > { %v5193_v32 = vadd.f32 %v4389_v25, %v4139_v21 }
 0x195   : > { %v748_v26 = vpop.f32.mrf.mxu1 }
 0x196   : > { %v5184_v27 = vadd.f32 %v4139_v21, %v748_v26  ;;  %v5311_v26 = vpack.c.bf16 %v5177_v23, %v5170_v9 }
 0x197   : > { %v4390_v28 = vpop.f32.mrf.mxu1 }
 0x198   : > { %v5186_v29 = vadd.f32 %v4390_v28, %v4139_v21  ;;  %4409 = vmatprep.mubr.msk.f32.mxu0 %vm785_vm1, %v5184_v27 }
 0x199   : > { %v751_v30 = vpop.f32.mrf.mxu1 }
 0x19a   : > { %v5190_v31 = vadd.f32 %v4139_v21, %v751_v30  ;;  %1051 = vrot.lane.b32.xlu1 %v5186_v29, %s4945_s23  ;;  %v5315_v28 = vpack.c.bf16 %v5186_v29, %v5193_v32 }
 0x19c   : > { %962 = vrot.lane.b32.xlu0 %v5190_v31, %s4945_s23  ;;  %v5306_v25 = vpack.c.bf16 %v5190_v31, %v5184_v27 }
 0x19e   : > { %1049 = vrot.lane.b32.xlu1 %v5193_v32, %s4945_s23 }
 0x1a0   : > { %960 = vrot.lane.b32.xlu0 %v5184_v27, %s4945_s23  ;;  %s4948_s23 = smov 88  }
 0x1fa   : > { %v782_v33 = vpop.permute.xlu1 %781 }
 0x1fe   : > { %v784_v34 = vpop.permute.xlu0 %783  ;;  %v874_v1 = vpop.permute.xlu1 %873 }
 0x1ff   : > { %4391 = vmatprep.subr.msk.mxu1 %vm785_vm1, %v784_v34 }
 0x200   : > { %4392 = vmatpush3.xpose.msk.msra.mxu1 %vm785_vm1, %v784_v34 }
 0x201   : > { %4393 = vmatprep.subr.msk.mxu1 %vm785_vm1, %v782_v33 }
 0x202   : > { %v872_v35 = vpop.permute.xlu1 %871 }
 0x204   : > { %4394 = vmatpush3.xpose.msk.msra.mxu1 %vm785_vm1, %v782_v33 }
 0x205   : > { %4398 = vmatprep.subr.msk.mxu1 %vm785_vm1, %v874_v1 }
 0x207   : > { %4396 = vmatmul.mubr.msk.f32.vlgmr.msra.gmra.mxu1 %vm785_vm1, %v5177_v23 }
 0x208   : > { %4399 = vmatpush3.xpose.msk.msra.mxu1 %vm785_vm1, %v874_v1  ;;  %4402 = vmatprep.mubr.msk.f32.mxu1 %vm785_vm1, %v5181_v24 }
 0x209   : > { %4400 = vmatprep.subr.msk.mxu1 %vm785_vm1, %v872_v35 }
 0x20c   : > { %v1052_v5 = vpop.permute.xlu1 %1051  ;;  %4401 = vmatpush3.xpose.msk.msra.mxu1 %vm785_vm1, %v872_v35 }
 0x20d   : > { %4412 = vmatprep.subr.msk.mxu1 %vm785_vm1, %v1052_v5 }
 0x20e   : > { %v963_v36 = vpop.permute.xlu0 %962 }
 0x20f   : > { %4403 = vmatmul.mubr.msk.f32.vlgmr.msra.gmra.mxu1 %vm785_vm1, %v5175_v22  ;;  %4405 = vmatprep.subr.msk.mxu0 %vm785_vm1, %v963_v36 }
 0x210   : > { %v1050_v37 = vpop.permute.xlu1 %1049  ;;  %4406 = vmatpush3.xpose.msk.msra.mxu0 %vm785_vm1, %v963_v36  ;;  %4413 = vmatpush3.xpose.msk.msra.mxu1 %vm785_vm1, %v1052_v5 }
 0x211   : > { %4416 = vmatprep.mubr.msk.f32.mxu1 %vm785_vm1, %v5193_v32  ;;  %4414 = vmatprep.subr.msk.mxu1 %vm785_vm1, %v1050_v37 }
 0x212   : > { %v961_v38 = vpop.permute.xlu0 %960 }
 0x213   : > { %4407 = vmatprep.subr.msk.mxu0 %vm785_vm1, %v961_v38 }
 0x214   : > { %4408 = vmatpush3.xpose.msk.msra.mxu0 %vm785_vm1, %v961_v38  ;;  %4415 = vmatpush3.xpose.msk.msra.mxu1 %vm785_vm1, %v1050_v37 }
 0x215   : > { %4425 = vmatprep.subr.bf16.mxu1 %v4946_v18  ;;  %4419 = vmatprep.subr.bf16.mxu0 %v4946_v18 }
 0x217   : > { %4410 = vmatmul.mubr.msk.f32.vlgmr.msra.gmra.mxu0 %vm785_vm1, %v5190_v31  ;;  %4417 = vmatmul.mubr.msk.f32.vlgmr.msra.gmra.mxu1 %vm785_vm1, %v5186_v29 }
 0x218   : > { %4421 = vmatprep.mubr.msk.bf16.mxu0 %vm4950_vm3, %v4946_v18  ;;  %4427 = vmatprep.mubr.msk.bf16.mxu1 %vm4950_vm3, %v4946_v18 }
 0x2c7   : > { %v4397_v42 = vpop.f32.mrf.mxu1 }
 0x2c8   : > { %v866_v45 = vadd.f32 %v4397_v42, %v764_v39 }
 0x2c9   : > { %v860_v46 = vpop.f32.mrf.mxu1 }
 0x2ca   : > { %v861_v48 = vadd.f32 %v860_v46, %v763_v43  ;;  %v5243_v49 = vadd.f32 %v866_v45, %v5235_v44 }
 0x2cc   : > { %v1148_v2 = vsel %vm1144_vm2, %v5243_v49, -inf  ;;  %v5248_v41 = vadd.f32 %v861_v48, %v5240_v47 }
 0x2cd   : > { %1149 = vmax.xlane.f32.xlu1 %v1148_v2 }
 0x2ce   : > { %v1145_v50 = vsel %vm1144_vm2, %v5248_v41, -inf }
 0x2cf   : > { %v4404_v51 = vpop.f32.mrf.mxu1  ;;  %1146 = vmax.xlane.f32.xlu0 %v1145_v50 }
 0x2d0   : > { %v955_v53 = vadd.f32 %v4404_v51, %v764_v39 }
 0x2d1   : > { %v949_v54 = vpop.f32.mrf.mxu1 }
 0x2d2   : > { %v950_v40 = vadd.f32 %v949_v54, %v763_v43  ;;  %v1139_v55 = vadd.f32 %v955_v53, %v5255_v52 }
 0x2d4   : > { %v1154_v56 = vsel %vm1144_vm2, %v1139_v55, -inf  ;;  %v1138_v57 = vadd.f32 %v950_v40, %v5260_v0 }
 0x2d5   : > { %1155 = vmax.xlane.f32.xlu0 %v1154_v56 }
 0x2d6   : > { %v1151_v63 = vsel %vm1144_vm2, %v1138_v57, -inf }
 0x2d7   : > { %v4411_v58 = vpop.f32.mrf.mxu0  ;;  %v4418_v59 = vpop.f32.mrf.mxu1 }
 0x2d8   : > { %v1044_v61 = vadd.f32 %v4411_v58, %v764_v39  ;;  %v1133_v62 = vadd.f32 %v4418_v59, %v764_v39 }
 0x2d9   : > { %v1127_v3 = vpop.f32.mrf.mxu1  ;;  %1152 = vmax.xlane.f32.xlu0 %v1151_v63  ;;  %v1038_v4 = vpop.f32.mrf.mxu0 }
 0x2da   : > { %v1128_v12 = vadd.f32 %v1127_v3, %v763_v43  ;;  %v1039_v16 = vadd.f32 %v1038_v4, %v763_v43  ;;  %v1141_v6 = vadd.f32 %v1044_v61, %v5268_v60  ;;  %v1143_v14 = vadd.f32 %v1133_v62, %v5279_v11 }
 0x2dc   : > { %v1160_v17 = vsel %vm1144_vm2, %v1141_v6, -inf  ;;  %v1140_v7 = vadd.f32 %v1039_v16, %v5274_v10  ;;  %v5292_v20 = vadd.f32 %v1128_v12, %v5285_v13  ;;  %v1166_v21 = vsel %vm1144_vm2, %v1143_v14, -inf }
 0x2dd   : > { %1161 = vmax.xlane.f32.xlu1 %v1160_v17 }
 0x2de   : > { %v1157_v15 = vsel %vm1144_vm2, %v1140_v7, -inf  ;;  %v1163_v8 = vsel %vm1144_vm2, %v5292_v20, -inf }
 0x2df   : > { %1158 = vmax.xlane.f32.xlu0 %v1157_v15 }
 0x2e1   : > { %1167 = vmax.xlane.f32.xlu1 %v1166_v21 }
 0x2e3   : > { %1164 = vmax.xlane.f32.xlu0 %v1163_v8 }
 0x2f2   : > { %1290 = vrot.lane.b32.xlu1 %v5301_v19, %s4947_s22 }
 0x2f6   : > { %1338 = vrot.lane.b32.xlu1 %v5306_v25, %s4947_s22 }
 0x2f9   : > { %1242 = vrot.lane.b32.xlu0 %v5311_v26, %s4947_s22 }
 0x2fa   : > { %1386 = vrot.lane.b32.xlu1 %v5315_v28, %s4947_s22  ;;  %s4955_s22 = smov 72  }
 0x2fd   : > { %1439 = vrot.lane.b32.xlu0 %v5177_v23, %s4948_s23 }
 0x2fe   : > { %1530 = vrot.lane.b32.xlu1 %v5175_v22, %s4948_s23 }
 0x301   : > { %1437 = vrot.lane.b32.xlu0 %v5170_v9, %s4948_s23 }
 0x302   : > { %1528 = vrot.lane.b32.xlu1 %v5181_v24, %s4948_s23 }
 0x305   : > { %1433 = vrot.lane.b32.xlu0 %v5170_v9, %s4949_s25 }
 0x306   : > { %1435 = vrot.lane.b32.xlu1 %v5177_v23, %s4949_s25 }
 0x356   : > { %v1150_v30 = vpop.xlane.xlu1 %1149 }
 0x357   : > { %v1170_v33 = vsub.f32 %v5243_v49, %v1150_v30 }
 0x358   : > { %v1147_v34 = vpop.xlane.xlu0 %1146 }
 0x359   : > { %v1179_v1 = vmul.f32 1.442695, %v1170_v33  ;;  %v1169_v35 = vsub.f32 %v5248_v41, %v1147_v34 }
 0x35b   : > { %4761 = vpow2.f32 %v1179_v1  ;;  %v1177_v5 = vmul.f32 1.442695, %v1169_v35 }
 0x35d   : > { %4763 = vpow2.f32 %v1177_v5 }
 0x35e   : > { %v1156_v36 = vpop.xlane.xlu0 %1155 }
 0x35f   : > { %v1172_v37 = vsub.f32 %v1139_v55, %v1156_v36 }
 0x361   : > { %v1183_v38 = vmul.f32 1.442695, %v1172_v37 }
 0x362   : > { %v1153_v39 = vpop.xlane.xlu0 %1152 }
 0x363   : > { %4765 = vpow2.f32 %v1183_v38  ;;  %v1171_v42 = vsub.f32 %v1138_v57, %v1153_v39 }
 0x365   : > { %v1181_v43 = vmul.f32 1.442695, %v1171_v42 }
 0x366   : > { %v1162_v45 = vpop.xlane.xlu1 %1161 }
 0x367   : > { %4767 = vpow2.f32 %v1181_v43  ;;  %v1174_v46 = vsub.f32 %v1141_v6, %v1162_v45 }
 0x368   : > { %v5333_v48 = vpop.eup %4761  ;;  %v1159_v49 = vpop.xlane.xlu0 %1158 }
 0x369   : > { %v1187_v2 = vmul.f32 1.442695, %v1174_v46  ;;  %v1173_v50 = vsub.f32 %v1140_v7, %v1159_v49  ;;  %v1196_v41 = vsel %vm1144_vm2, %v5333_v48, 0.0 }
 0x36a   : > { %v5337_v51 = vpop.eup %4763  ;;  %1197 = vadd.xlane.f32.xlu1 %v1196_v41  ;;  %v1168_v53 = vpop.xlane.xlu1 %1167 }
 0x36b   : > { %4769 = vpow2.f32 %v1187_v2  ;;  %v1185_v54 = vmul.f32 1.442695, %v1173_v50  ;;  %v1176_v40 = vsub.f32 %v1143_v14, %v1168_v53  ;;  %v1193_v55 = vsel %vm1144_vm2, %v5337_v51, 0.0 }
 0x36c   : > { %1194 = vadd.xlane.f32.xlu0 %v1193_v55  ;;  %v1165_v56 = vpop.xlane.xlu0 %1164 }
 0x36d   : > { %4771 = vpow2.f32 %v1185_v54  ;;  %v1191_v57 = vmul.f32 1.442695, %v1176_v40  ;;  %v1175_v58 = vsub.f32 %v5292_v20, %v1165_v56 }
 0x36e   : > { %v1291_v59 = vpop.permute.xlu1 %1290 }
 0x36f   : > { %4773 = vpow2.f32 %v1191_v57  ;;  %v1189_v61 = vmul.f32 1.442695, %v1175_v58  ;;  %4426 = vmatpush3.bf16.msra.mxu1 %v1291_v59 }
 0x370   : > { %v5342_v62 = vpop.eup %4765  ;;  %v1243_v63 = vpop.permute.xlu0 %1242  ;;  %4437 = vmatprep.subr.bf16.mxu1 %v4946_v18 }
 0x371   : > { %4775 = vpow2.f32 %v1189_v61  ;;  %4420 = vmatpush3.bf16.msra.mxu0 %v1243_v63  ;;  %v1202_v3 = vsel %vm1144_vm2, %v5342_v62, 0.0 }
 0x372   : > { %1203 = vadd.xlane.f32.xlu1 %v1202_v3  ;;  %4431 = vmatprep.subr.bf16.mxu0 %v4946_v18  ;;  %v1339_v8 = vpop.permute.xlu1 %1338 }
 0x374   : > { %v5348_v4 = vpop.eup %4767  ;;  %v1440_v34 = vpop.permute.xlu0 %1439 }
 0x375   : > { %v1199_v12 = vsel %vm1144_vm2, %v5348_v4, 0.0 }
 0x376   : > { %1200 = vadd.xlane.f32.xlu0 %v1199_v12  ;;  %v1387_v30 = vpop.permute.xlu1 %1386 }
 0x378   : > { %v5352_v16 = vpop.eup %4769  ;;  %v1438_v35 = vpop.permute.xlu0 %1437 }
 0x379   : > { %v1208_v6 = vsel %vm1144_vm2, %v5352_v16, 0.0 }
 0x37a   : > { %v5356_v17 = vpop.eup %4771  ;;  %1209 = vadd.xlane.f32.xlu1 %v1208_v6  ;;  %v5400_v33 = vpop.permute.xlu1 %1530 }
 0x37b   : > { %v1205_v7 = vsel %vm1144_vm2, %v5356_v17, 0.0 }
 0x37c   : > { %v5360_v14 = vpop.eup %4773  ;;  %1206 = vadd.xlane.f32.xlu0 %v1205_v7  ;;  %v1434_v36 = vpop.permute.xlu0 %1433 }
 0x37d   : > { %v1214_v15 = vsel %vm1144_vm2, %v5360_v14, 0.0 }
 0x37e   : > { %v5364_v20 = vpop.eup %4775  ;;  %1215 = vadd.xlane.f32.xlu1 %v1214_v15  ;;  %v5402_v1 = vpop.permute.xlu1 %1528 }
 0x37f   : > { %v1211_v21 = vsel %vm1144_vm2, %v5364_v20, 0.0 }
 0x380   : > { %1212 = vadd.xlane.f32.xlu0 %v1211_v21 }
 0x382   : > { %v5404_v5 = vpop.permute.xlu1 %1435 }
 0x38f   : > { %1621 = vrot.lane.b32.xlu1 %v5190_v31, %s4948_s23 }
 0x393   : > { %1712 = vrot.lane.b32.xlu1 %v5186_v29, %s4948_s23 }
 0x396   : > { %1524 = vrot.lane.b32.xlu0 %v5181_v24, %s4949_s25 }
 0x397   : > { %1710 = vrot.lane.b32.xlu1 %v5193_v32, %s4948_s23 }
 0x39a   : > { %1526 = vrot.lane.b32.xlu0 %v5175_v22, %s4949_s25 }
 0x39b   : > { %1617 = vrot.lane.b32.xlu1 %v5190_v31, %s4949_s25 }
 0x39e   : > { %1619 = vrot.lane.b32.xlu0 %v5184_v27, %s4948_s23 }
 0x39f   : > { %1708 = vrot.lane.b32.xlu1 %v5186_v29, %s4949_s25 }
 0x3a2   : > { %1615 = vrot.lane.b32.xlu0 %v5184_v27, %s4949_s25 }
 0x3a3   : > { %1944 = vrot.lane.b32.xlu1 %v5301_v19, %s4951_s26 }
 0x3a6   : > { %1706 = vrot.lane.b32.xlu0 %v5193_v32, %s4949_s25 }
 0x3a7   : > { %1991 = vrot.lane.b32.xlu1 %v5306_v25, %s4951_s26 }
 0x3aa   : > { %1897 = vrot.lane.b32.xlu0 %v5311_v26, %s4951_s26 }
 0x3ab   : > { %2038 = vrot.lane.b32.xlu1 %v5315_v28, %s4951_s26 }
 0x3ae   : > { %2091 = vrot.lane.b32.xlu0 %v5177_v23, %s4952_s27 }
 0x3af   : > { %2182 = vrot.lane.b32.xlu1 %v5175_v22, %s4952_s27 }
 0x3f3   : > { %v1198_v37 = vpop.xlane.xlu1 %1197 }
 0x3f4   : > { %4777 = vrcp.f32 %v1198_v37 }
 0x3f5   : > { %v1195_v38 = vpop.xlane.xlu0 %1194 }
 0x3f6   : > { %4779 = vrcp.f32 %v1195_v38 }
 0x3fb   : > { %v1204_v39 = vpop.xlane.xlu1 %1203 }
 0x3fc   : > { %4781 = vrcp.f32 %v1204_v39 }
 0x3ff   : > { %v1201_v42 = vpop.xlane.xlu0 %1200 }
 0x400   : > { %4783 = vrcp.f32 %v1201_v42 }
 0x401   : > { %v4778_v43 = vpop.eup %4777 }
 0x402   : > { %v1226_v2 = vmul.f32 %v4778_v43, %v5333_v48 }
 0x403   : > { %v4780_v45 = vpop.eup %4779  ;;  %v1210_v46 = vpop.xlane.xlu1 %1209 }
 0x404   : > { %4785 = vrcp.f32 %v1210_v46  ;;  %v1225_v49 = vmul.f32 %v4780_v45, %v5337_v51 }
 0x405   : > { %v1207_v50 = vpop.xlane.xlu0 %1206 }
 0x406   : > { %4787 = vrcp.f32 %v1207_v50  ;;  %v1233_v41 = vpack.c.bf16 %v1226_v2, %v1225_v49 }
 0x407   : > { %v1216_v53 = vpop.xlane.xlu1 %1215 }
 0x408   : > { %4789 = vrcp.f32 %v1216_v53  ;;  %4422 = vmatmul.mubr.msk.bf16.vlgmr.msra.gmra.mxu0 %vm1144_vm2, %v1233_v41  ;;  %v766_v53 = vld [vmem:[%s6135_s2 + $0x18] sm:$0xff] }
 0x409   : > { %4432 = vmatpush3.bf16.msra.mxu0 %v1339_v8  ;;  %v1213_v54 = vpop.xlane.xlu0 %1212  ;;  %4433 = vmatprep.mubr.msk.bf16.mxu0 %vm4950_vm3, %v4946_v18  ;;  %v4782_v40 = vpop.eup %4781 }
 0x40a   : > { %4443 = vmatprep.subr.msk.mxu0 %vm785_vm1, %v1440_v34  ;;  %4791 = vrcp.f32 %v1213_v54  ;;  %v1228_v57 = vmul.f32 %v4782_v40, %v5342_v62 }
 0x40b   : > { %v1622_v56 = vpop.permute.xlu1 %1621 }
 0x40d   : > { %v4784_v55 = vpop.eup %4783  ;;  %v1525_v51 = vpop.permute.xlu0 %1524 }
 0x40e   : > { %v1227_v48 = vmul.f32 %v4784_v55, %v5348_v4  ;;  %v765_v55 = vld [vmem:[%s6135_s2 + $0x10] sm:$0xff] }
 0x40f   : > { %v1713_v3 = vpop.permute.xlu1 %1712 }
 0x410   : > { %v1234_v58 = vpack.c.bf16 %v1228_v57, %v1227_v48 }
 0x411   : > { %v4786_v59 = vpop.eup %4785  ;;  %v1527_v61 = vpop.permute.xlu0 %1526 }
 0x412   : > { %4428 = vmatmul.mubr.msk.bf16.vlgmr.msra.gmra.mxu1 %vm1144_vm2, %v1234_v58  ;;  %v1230_v4 = vmul.f32 %v4786_v59, %v5352_v16 }
 0x413   : > { %v4788_v63 = vpop.eup %4787  ;;  %4438 = vmatpush3.bf16.msra.mxu1 %v1387_v30  ;;  %4439 = vmatprep.mubr.msk.bf16.mxu1 %vm4950_vm3, %v4946_v18  ;;  %v1711_v30 = vpop.permute.xlu1 %1710 }
 0x414   : > { %4450 = vmatprep.subr.msk.mxu1 %vm785_vm1, %v5400_v33  ;;  %v1229_v12 = vmul.f32 %v4788_v63, %v5356_v17 }
 0x415   : > { %v4790_v6 = vpop.eup %4789  ;;  %v1620_v62 = vpop.permute.xlu0 %1619 }
 0x416   : > { %v1235_v7 = vpack.c.bf16 %v1230_v4, %v1229_v12  ;;  %v1232_v8 = vmul.f32 %v4790_v6, %v5360_v14 }
 0x417   : > { %v4792_v15 = vpop.eup %4791  ;;  %v1618_v16 = vpop.permute.xlu1 %1617 }
 0x418   : > { %4434 = vmatmul.mubr.msk.bf16.vlgmr.msra.gmra.mxu0 %vm1144_vm2, %v1235_v7  ;;  %v1231_v21 = vmul.f32 %v4792_v15, %v5364_v20 }
 0x419   : > { %4444 = vmatpush3.xpose.msk.msra.mxu0 %vm785_vm1, %v1440_v34  ;;  %4447 = vmatprep.mubr.msk.f32.mxu0 %vm785_vm1, %v1434_v36  ;;  %v1616_v37 = vpop.permute.xlu0 %1615 }
 0x41a   : > { %4445 = vmatprep.subr.msk.mxu0 %vm785_vm1, %v1438_v35  ;;  %v1236_v17 = vpack.c.bf16 %v1232_v8, %v1231_v21 }
 0x41b   : > { %v1709_v20 = vpop.permute.xlu1 %1708 }
 0x41c   : > { %4440 = vmatmul.mubr.msk.bf16.vlgmr.msra.gmra.mxu1 %vm1144_vm2, %v1236_v17 }
 0x41d   : > { %4446 = vmatpush3.xpose.msk.msra.mxu0 %vm785_vm1, %v1438_v35  ;;  %4451 = vmatpush3.xpose.msk.msra.mxu1 %vm785_vm1, %v5400_v33  ;;  %v1707_v14 = vpop.permute.xlu0 %1706 }
 0x41e   : > { %4452 = vmatprep.subr.msk.mxu1 %vm785_vm1, %v5402_v1  ;;  %4454 = vmatprep.mubr.msk.f32.mxu1 %vm785_vm1, %v1525_v51 }
 0x41f   : > { %4457 = vmatprep.subr.msk.mxu0 %vm785_vm1, %v1622_v56  ;;  %v1945_v34 = vpop.permute.xlu1 %1944 }
 0x420   : > { %4448 = vmatmul.mubr.msk.f32.vlgmr.msra.gmra.mxu0 %vm785_vm1, %v5404_v5 }
 0x421   : > { %4453 = vmatpush3.xpose.msk.msra.mxu1 %vm785_vm1, %v5402_v1  ;;  %4458 = vmatpush3.xpose.msk.msra.mxu0 %vm785_vm1, %v1622_v56  ;;  %v1898_v33 = vpop.permute.xlu0 %1897 }
 0x422   : > { %4459 = vmatprep.subr.msk.mxu0 %vm785_vm1, %v1620_v62  ;;  %4461 = vmatprep.mubr.msk.f32.mxu0 %vm785_vm1, %v1616_v37 }
 0x423   : > { %4464 = vmatprep.subr.msk.mxu1 %vm785_vm1, %v1713_v3 }
 0x424   : > { %4455 = vmatmul.mubr.msk.f32.vlgmr.msra.gmra.mxu1 %vm785_vm1, %v1527_v61 }
 0x425   : > { %4460 = vmatpush3.xpose.msk.msra.mxu0 %vm785_vm1, %v1620_v62  ;;  %4465 = vmatpush3.xpose.msk.msra.mxu1 %vm785_vm1, %v1713_v3 }
 0x426   : > { %4466 = vmatprep.subr.msk.mxu1 %vm785_vm1, %v1711_v30  ;;  %4468 = vmatprep.mubr.msk.f32.mxu1 %vm785_vm1, %v1707_v14 }
 0x427   : > { %4471 = vmatprep.subr.bf16.mxu0 %v4946_v18 }
 0x428   : > { %4462 = vmatmul.mubr.msk.f32.vlgmr.msra.gmra.mxu0 %vm785_vm1, %v1618_v16 }
 0x429   : > { %4467 = vmatpush3.xpose.msk.msra.mxu1 %vm785_vm1, %v1711_v30  ;;  %4472 = vmatpush3.bf16.msra.mxu0 %v1898_v33 }
 0x42a   : > { %4477 = vmatprep.subr.bf16.mxu1 %v4946_v18  ;;  %4473 = vmatprep.mubr.msk.bf16.mxu0 %vm4950_vm3, %v4946_v18 }
 0x42b   : > { %4483 = vmatprep.subr.bf16.mxu0 %v4946_v18 }
 0x42c   : > { %4469 = vmatmul.mubr.msk.f32.vlgmr.msra.gmra.mxu1 %vm785_vm1, %v1709_v20 }
 0x42d   : > { %4478 = vmatpush3.bf16.msra.mxu1 %v1945_v34  ;;  %4479 = vmatprep.mubr.msk.bf16.mxu1 %vm4950_vm3, %v4946_v18 }
 0x42e   : > { %4489 = vmatprep.subr.bf16.mxu1 %v4946_v18 }
 0x4c8   : > { %v5459_v1 = vpop.f32.mrf.mxu0 }
 0x4ca   : > { %v4423_v35 = vpop.f32.mrf.mxu0 }
 0x4cc   : > { %v5461_v5 = vpop.f32.mrf.mxu0 }
 0x4ce   : > { %v4424_v36 = vpop.f32.mrf.mxu0 }
 0x4d2   : > { %v5463_v38 = vpop.f32.mrf.mxu1 }
 0x4d4   : > { %v4429_v39 = vpop.f32.mrf.mxu1 }
 0x4d6   : > { %v5465_v42 = vpop.f32.mrf.mxu1 }
 0x4d8   : > { %v4430_v43 = vpop.f32.mrf.mxu1  ;;  %v5467_v45 = vpop.f32.mrf.mxu0 }
 0x4da   : > { %v4435_v46 = vpop.f32.mrf.mxu0 }
 0x4dc   : > { %v5469_v49 = vpop.f32.mrf.mxu0  ;;  %v5471_v2 = vpop.f32.mrf.mxu1 }
 0x4de   : > { %v4436_v50 = vpop.f32.mrf.mxu0  ;;  %v4441_v41 = vpop.f32.mrf.mxu1 }
 0x4e0   : > { %v5476_v54 = vpop.f32.mrf.mxu1  ;;  %v4449_v40 = vpop.f32.mrf.mxu0 }
 0x4e1   : > { %v1521_v51 = vadd.f32 %v4449_v40, %v766_v53 }
 0x4e2   : > { %v4442_v56 = vpop.f32.mrf.mxu1  ;;  %v1515_v48 = vpop.f32.mrf.mxu0 }
 0x4e3   : > { %v1516_v57 = vadd.f32 %v1515_v48, %v765_v55  ;;  %v1798_v58 = vadd.f32 %v1521_v51, %v5235_v44 }
 0x4e4   : > { %v4456_v59 = vpop.f32.mrf.mxu1 }
 0x4e5   : > { %v1612_v61 = vadd.f32 %v4456_v59, %v766_v53  ;;  %v1808_v63 = vsel %vm1144_vm2, %v1798_v58, -inf  ;;  %v1797_v3 = vadd.f32 %v1516_v57, %v5240_v47 }
 0x4e6   : > { %1809 = vmax.xlane.f32.xlu1 %v1808_v63  ;;  %v1606_v6 = vpop.f32.mrf.mxu1 }
 0x4e7   : > { %v1805_v12 = vsel %vm1144_vm2, %v1797_v3, -inf  ;;  %v1800_v4 = vadd.f32 %v1612_v61, %v5255_v52  ;;  %v1607_v21 = vadd.f32 %v1606_v6, %v765_v55 }
 0x4e8   : > { %v4463_v62 = vpop.f32.mrf.mxu0  ;;  %1806 = vmax.xlane.f32.xlu0 %v1805_v12 }
 0x4e9   : > { %v1703_v7 = vadd.f32 %v4463_v62, %v766_v53  ;;  %v1814_v30 = vsel %vm1144_vm2, %v1800_v4, -inf  ;;  %v1799_v39 = vadd.f32 %v1607_v21, %v5260_v0  ;;  %v5504_v0 = vpop.permute.xlu1 %1991 }
 0x4ea   : > { %v1697_v15 = vpop.f32.mrf.mxu0 }
 0x4eb   : > { %v1698_v8 = vadd.f32 %v1697_v15, %v765_v55  ;;  %v1802_v17 = vadd.f32 %v1703_v7, %v5268_v60  ;;  %v1811_v46 = vsel %vm1144_vm2, %v1799_v39, -inf }
 0x4ec   : > { %v4470_v37 = vpop.f32.mrf.mxu1  ;;  %1815 = vmax.xlane.f32.xlu0 %v1814_v30 }
 0x4ed   : > { %v1794_v16 = vadd.f32 %v4470_v37, %v766_v53  ;;  %v1820_v14 = vsel %vm1144_vm2, %v1802_v17, -inf  ;;  %v1801_v20 = vadd.f32 %v1698_v8, %v5274_v10  ;;  %v5506_v53 = vpop.permute.xlu1 %2038 }
 0x4ee   : > { %1821 = vmax.xlane.f32.xlu1 %v1820_v14  ;;  %v1788_v33 = vpop.f32.mrf.mxu1 }
 0x4ef   : > { %v1789_v34 = vadd.f32 %v1788_v33, %v765_v55  ;;  %v1817_v35 = vsel %vm1144_vm2, %v1801_v20, -inf  ;;  %v5492_v36 = vadd.f32 %v1794_v16, %v5279_v11  ;;  %v5510_v55 = vpop.permute.xlu0 %2091 }
 0x4f0   : > { %1818 = vmax.xlane.f32.xlu0 %v1817_v35 }
 0x4f1   : > { %v1826_v43 = vsel %vm1144_vm2, %v5492_v36, -inf  ;;  %v1803_v50 = vadd.f32 %v1789_v34, %v5285_v13  ;;  %v5508_v40 = vpop.permute.xlu1 %2182 }
 0x4f2   : > { %1827 = vmax.xlane.f32.xlu1 %v1826_v43 }
 0x4f3   : > { %v1823_v41 = vsel %vm1144_vm2, %v1803_v50, -inf }
 0x4f4   : > { %1812 = vmax.xlane.f32.xlu0 %v1811_v46 }
 0x4f8   : > { %1824 = vmax.xlane.f32.xlu0 %v1823_v41 }
 0x503   : > { %2180 = vrot.lane.b32.xlu1 %v5181_v24, %s4952_s27 }
 0x50e   : > { %2089 = vrot.lane.b32.xlu0 %v5170_v9, %s4952_s27 }
 0x56f   : > { %v1810_v51 = vpop.xlane.xlu1 %1809 }
 0x570   : > { %v1830_v56 = vsub.f32 %v1798_v58, %v1810_v51 }
 0x571   : > { %v1807_v48 = vpop.xlane.xlu0 %1806 }
 0x572   : > { %v1839_v57 = vmul.f32 1.442695, %v1830_v56  ;;  %v1829_v59 = vsub.f32 %v1797_v3, %v1807_v48 }
 0x574   : > { %4793 = vpow2.f32 %v1839_v57  ;;  %v1837_v61 = vmul.f32 1.442695, %v1829_v59 }
 0x575   : > { %v1816_v63 = vpop.xlane.xlu0 %1815 }
 0x576   : > { %4795 = vpow2.f32 %v1837_v61  ;;  %v1832_v12 = vsub.f32 %v1800_v4, %v1816_v63 }
 0x577   : > { %v1822_v6 = vpop.xlane.xlu1 %1821 }
 0x578   : > { %v1834_v62 = vsub.f32 %v1802_v17, %v1822_v6  ;;  %v1843_v7 = vmul.f32 1.442695, %v1832_v12 }
 0x579   : > { %v1819_v15 = vpop.xlane.xlu0 %1818 }
 0x57a   : > { %v1847_v21 = vmul.f32 1.442695, %v1834_v62  ;;  %v1833_v8 = vsub.f32 %v1801_v20, %v1819_v15 }
 0x57b   : > { %v1828_v51 = vpop.xlane.xlu1 %1827 }
 0x57c   : > { %4797 = vpow2.f32 %v1847_v21  ;;  %v1845_v30 = vmul.f32 1.442695, %v1833_v8  ;;  %v1836_v48 = vsub.f32 %v5492_v36, %v1828_v51 }
 0x57d   : > { %4799 = vpow2.f32 %v1843_v7  ;;  %v1813_v37 = vpop.xlane.xlu0 %1812 }
 0x57e   : > { %4801 = vpow2.f32 %v1845_v30  ;;  %v1831_v58 = vsub.f32 %v1799_v39, %v1813_v37  ;;  %v1851_v59 = vmul.f32 1.442695, %v1836_v48 }
 0x57f   : > { %v5569_v36 = vpop.permute.xlu1 %2180 }
 0x580   : > { %v1841_v16 = vmul.f32 1.442695, %v1831_v58 }
 0x581   : > { %v5512_v14 = vpop.eup %4793  ;;  %v1825_v56 = vpop.xlane.xlu0 %1824 }
 0x582   : > { %4803 = vpow2.f32 %v1841_v16  ;;  %v1856_v3 = vsel %vm1144_vm2, %v5512_v14, 0.0  ;;  %v1835_v57 = vsub.f32 %v1803_v50, %v1825_v56 }
 0x583   : > { %v5516_v4 = vpop.eup %4795  ;;  %1857 = vadd.xlane.f32.xlu1 %v1856_v3  ;;  %4805 = vpow2.f32 %v1851_v59 }
 0x584   : > { %v1853_v17 = vsel %vm1144_vm2, %v5516_v4, 0.0  ;;  %v1849_v61 = vmul.f32 1.442695, %v1835_v57 }
 0x585   : > { %1854 = vadd.xlane.f32.xlu0 %v1853_v17  ;;  %v2090_v50 = vpop.permute.xlu0 %2089 }
 0x586   : > { %4807 = vpow2.f32 %v1849_v61 }
 0x589   : > { %v5520_v20 = vpop.eup %4797 }
 0x58a   : > { %v5522_v33 = vpop.eup %4799  ;;  %v1868_v34 = vsel %vm1144_vm2, %v5520_v20, 0.0 }
 0x58b   : > { %v5526_v35 = vpop.eup %4801  ;;  %1869 = vadd.xlane.f32.xlu1 %v1868_v34  ;;  %v1862_v43 = vsel %vm1144_vm2, %v5522_v33, 0.0 }
 0x58c   : > { %v1865_v39 = vsel %vm1144_vm2, %v5526_v35, 0.0 }
 0x58d   : > { %1866 = vadd.xlane.f32.xlu0 %v1865_v39 }
 0x58f   : > { %v5532_v46 = vpop.eup %4803  ;;  %1863 = vadd.xlane.f32.xlu1 %v1862_v43 }
 0x590   : > { %v1859_v41 = vsel %vm1144_vm2, %v5532_v46, 0.0  ;;  %v5539_v63 = vpop.eup %4805 }
 0x591   : > { %1860 = vadd.xlane.f32.xlu0 %v1859_v41  ;;  %v1874_v6 = vsel %vm1144_vm2, %v5539_v63, 0.0 }
 0x593   : > { %v5541_v12 = vpop.eup %4807 }
 0x594   : > { %v1871_v62 = vsel %vm1144_vm2, %v5541_v12, 0.0 }
 0x5a0   : > { %2087 = vrot.lane.b32.xlu1 %v5177_v23, %s4953_s17 }
 0x5a7   : > { %2085 = vrot.lane.b32.xlu0 %v5170_v9, %s4953_s17 }
 0x5c4   : > { %1875 = vadd.xlane.f32.xlu1 %v1874_v6 }
 0x5c6   : > { %1872 = vadd.xlane.f32.xlu0 %v1871_v62 }
 0x5d5   : > { %2273 = vrot.lane.b32.xlu1 %v5190_v31, %s4952_s27 }
 0x5d9   : > { %2364 = vrot.lane.b32.xlu1 %v5186_v29, %s4952_s27 }
 0x5dc   : > { %2176 = vrot.lane.b32.xlu0 %v5181_v24, %s4953_s17 }
 0x5dd   : > { %2362 = vrot.lane.b32.xlu1 %v5193_v32, %s4952_s27 }
 0x5e0   : > { %2178 = vrot.lane.b32.xlu0 %v5175_v22, %s4953_s17 }
 0x5e1   : > { %2269 = vrot.lane.b32.xlu1 %v5190_v31, %s4953_s17 }
 0x5e4   : > { %2271 = vrot.lane.b32.xlu0 %v5184_v27, %s4952_s27  ;;  %s4957_s27 = smov 40  }
 0x5e5   : > { %2360 = vrot.lane.b32.xlu1 %v5186_v29, %s4953_s17 }
 0x5e8   : > { %2267 = vrot.lane.b32.xlu0 %v5184_v27, %s4953_s17 }
 0x5e9   : > { %2596 = vrot.lane.b32.xlu1 %v5301_v19, %s4954_s19 }
 0x5ec   : > { %2358 = vrot.lane.b32.xlu0 %v5193_v32, %s4953_s17 }
 0x5ed   : > { %2643 = vrot.lane.b32.xlu1 %v5306_v25, %s4954_s19 }
 0x5f0   : > { %2549 = vrot.lane.b32.xlu0 %v5311_v26, %s4954_s19 }
 0x5f1   : > { %2690 = vrot.lane.b32.xlu1 %v5315_v28, %s4954_s19 }
 0x5f4   : > { %2743 = vrot.lane.b32.xlu0 %v5177_v23, %s4955_s22 }
 0x5f5   : > { %2834 = vrot.lane.b32.xlu1 %v5175_v22, %s4955_s22 }
 0x60c   : > { %v1858_v7 = vpop.xlane.xlu1 %1857 }
 0x60d   : > { %4809 = vrcp.f32 %v1858_v7 }
 0x60e   : > { %v1855_v15 = vpop.xlane.xlu0 %1854 }
 0x60f   : > { %4811 = vrcp.f32 %v1855_v15 }
 0x614   : > { %v1870_v21 = vpop.xlane.xlu1 %1869 }
 0x615   : > { %4813 = vrcp.f32 %v1870_v21 }
 0x616   : > { %v1867_v8 = vpop.xlane.xlu0 %1866 }
 0x617   : > { %4815 = vrcp.f32 %v1867_v8 }
 0x618   : > { %v1864_v30 = vpop.xlane.xlu1 %1863 }
 0x619   : > { %4817 = vrcp.f32 %v1864_v30 }
 0x61a   : > { %v4810_v37 = vpop.eup %4809  ;;  %v1861_v58 = vpop.xlane.xlu0 %1860 }
 0x61b   : > { %4819 = vrcp.f32 %v1861_v58  ;;  %v1886_v17 = vmul.f32 %v4810_v37, %v5512_v14 }
 0x61c   : > { %v4812_v16 = vpop.eup %4811 }
 0x61d   : > { %v1885_v3 = vmul.f32 %v4812_v16, %v5516_v4 }
 0x61e   : > { %v2086_v48 = vpop.permute.xlu0 %2085 }
 0x61f   : > { %v1893_v34 = vpack.c.bf16 %v1886_v17, %v1885_v3 }
 0x621   : > { %4474 = vmatmul.mubr.msk.bf16.vlgmr.msra.gmra.mxu0 %vm1144_vm2, %v1893_v34 }
 0x622   : > { %v4814_v39 = vpop.eup %4813  ;;  %4484 = vmatpush3.bf16.msra.mxu0 %v5504_v0  ;;  %4485 = vmatprep.mubr.msk.bf16.mxu0 %vm4950_vm3, %v4946_v18 }
 0x623   : > { %4495 = vmatprep.subr.msk.mxu0 %vm785_vm1, %v5510_v55  ;;  %v1890_v51 = vmul.f32 %v4814_v39, %v5520_v20  ;;  %v2088_v20 = vpop.permute.xlu1 %2087 }
 0x624   : > { %v4816_v43 = vpop.eup %4815 }
 0x625   : > { %v1889_v41 = vmul.f32 %v4816_v43, %v5526_v35 }
 0x626   : > { %v4818_v4 = vpop.eup %4817 }
 0x627   : > { %v1895_v56 = vpack.c.bf16 %v1890_v51, %v1889_v41  ;;  %v1888_v0 = vmul.f32 %v4818_v4, %v5522_v33 }
 0x628   : > { %v4820_v14 = vpop.eup %4819 }
 0x629   : > { %4486 = vmatmul.mubr.msk.bf16.vlgmr.msra.gmra.mxu0 %vm1144_vm2, %v1895_v56  ;;  %v1887_v57 = vmul.f32 %v4820_v14, %v5532_v46 }
 0x62a   : > { %4496 = vmatpush3.xpose.msk.msra.mxu0 %vm785_vm1, %v5510_v55  ;;  %4499 = vmatprep.mubr.msk.f32.mxu0 %vm785_vm1, %v2086_v48  ;;  %v768_v48 = vld [vmem:[%s6135_s2 + $0x28] sm:$0xff] }
 0x62b   : > { %4497 = vmatprep.subr.msk.mxu0 %vm785_vm1, %v2090_v50  ;;  %v1894_v35 = vpack.c.bf16 %v1888_v0, %v1887_v57 }
 0x62d   : > { %4480 = vmatmul.mubr.msk.bf16.vlgmr.msra.gmra.mxu1 %vm1144_vm2, %v1894_v35  ;;  %v767_v35 = vld [vmem:[%s6135_s2 + $0x20] sm:$0xff] }
 0x62e   : > { %4490 = vmatpush3.bf16.msra.mxu1 %v5506_v53  ;;  %4498 = vmatpush3.xpose.msk.msra.mxu0 %vm785_vm1, %v2090_v50 }
 0x62f   : > { %4502 = vmatprep.subr.msk.mxu1 %vm785_vm1, %v5508_v40  ;;  %4491 = vmatprep.mubr.msk.bf16.mxu1 %vm4950_vm3, %v4946_v18 }
 0x631   : > { %4500 = vmatmul.mubr.msk.f32.vlgmr.msra.gmra.mxu0 %vm785_vm1, %v2088_v20 }
 0x64d   : > { %v1876_v55 = vpop.xlane.xlu1 %1875 }
 0x64e   : > { %4821 = vrcp.f32 %v1876_v55 }
 0x64f   : > { %v1873_v33 = vpop.xlane.xlu0 %1872 }
 0x650   : > { %4823 = vrcp.f32 %v1873_v33 }
 0x651   : > { %v2274_v46 = vpop.permute.xlu1 %2273 }
 0x652   : > { %4509 = vmatprep.subr.msk.mxu0 %vm785_vm1, %v2274_v46 }
 0x653   : > { %4510 = vmatpush3.xpose.msk.msra.mxu0 %vm785_vm1, %v2274_v46  ;;  %v2177_v53 = vpop.permute.xlu0 %2176 }
 0x655   : > { %v2365_v59 = vpop.permute.xlu1 %2364 }
 0x657   : > { %v2179_v61 = vpop.permute.xlu0 %2178 }
 0x659   : > { %v2363_v6 = vpop.permute.xlu1 %2362 }
 0x65b   : > { %v4822_v62 = vpop.eup %4821  ;;  %v2272_v50 = vpop.permute.xlu0 %2271 }
 0x65c   : > { %4511 = vmatprep.subr.msk.mxu0 %vm785_vm1, %v2272_v50  ;;  %v1892_v21 = vmul.f32 %v4822_v62, %v5539_v63 }
 0x65d   : > { %v4824_v7 = vpop.eup %4823  ;;  %4512 = vmatpush3.xpose.msk.msra.mxu0 %vm785_vm1, %v2272_v50  ;;  %v2270_v30 = vpop.permute.xlu1 %2269 }
 0x65e   : > { %v1891_v15 = vmul.f32 %v4824_v7, %v5541_v12  ;;  %4523 = vmatprep.subr.bf16.mxu0 %v4946_v18 }
 0x65f   : > { %v2268_v8 = vpop.permute.xlu0 %2267 }
 0x660   : > { %4513 = vmatprep.mubr.msk.f32.mxu0 %vm785_vm1, %v2268_v8  ;;  %v1896_v37 = vpack.c.bf16 %v1892_v21, %v1891_v15 }
 0x661   : > { %4514 = vmatmul.mubr.msk.f32.vlgmr.msra.gmra.mxu0 %vm785_vm1, %v2270_v30 }
 0x662   : > { %4492 = vmatmul.mubr.msk.bf16.vlgmr.msra.gmra.mxu1 %vm1144_vm2, %v1896_v37  ;;  %4525 = vmatprep.mubr.msk.bf16.mxu0 %vm4950_vm3, %v4946_v18 }
 0x663   : > { %4503 = vmatpush3.xpose.msk.msra.mxu1 %vm785_vm1, %v5508_v40  ;;  %4506 = vmatprep.mubr.msk.f32.mxu1 %vm785_vm1, %v2177_v53  ;;  %v2359_v63 = vpop.permute.xlu0 %2358  ;;  %v2361_v40 = vpop.permute.xlu1 %2360 }
 0x664   : > { %4504 = vmatprep.subr.msk.mxu1 %vm785_vm1, %v5569_v36 }
 0x667   : > { %4505 = vmatpush3.xpose.msk.msra.mxu1 %vm785_vm1, %v5569_v36  ;;  %v2550_v12 = vpop.permute.xlu0 %2549  ;;  %v2597_v36 = vpop.permute.xlu1 %2596 }
 0x668   : > { %4516 = vmatprep.subr.msk.mxu1 %vm785_vm1, %v2365_v59  ;;  %4524 = vmatpush3.bf16.msra.mxu0 %v2550_v12 }
 0x669   : > { %4535 = vmatprep.subr.bf16.mxu0 %v4946_v18 }
 0x66a   : > { %4507 = vmatmul.mubr.msk.f32.vlgmr.msra.gmra.mxu1 %vm785_vm1, %v2179_v61 }
 0x66b   : > { %4517 = vmatpush3.xpose.msk.msra.mxu1 %vm785_vm1, %v2365_v59  ;;  %4520 = vmatprep.mubr.msk.f32.mxu1 %vm785_vm1, %v2359_v63 }
 0x66c   : > { %4518 = vmatprep.subr.msk.mxu1 %vm785_vm1, %v2363_v6 }
 0x66f   : > { %4519 = vmatpush3.xpose.msk.msra.mxu1 %vm785_vm1, %v2363_v6 }
 0x670   : > { %4529 = vmatprep.subr.bf16.mxu1 %v4946_v18 }
 0x672   : > { %4521 = vmatmul.mubr.msk.f32.vlgmr.msra.gmra.mxu1 %vm785_vm1, %v2361_v40 }
 0x673   : > { %4530 = vmatpush3.bf16.msra.mxu1 %v2597_v36  ;;  %4531 = vmatprep.mubr.msk.bf16.mxu1 %vm4950_vm3, %v4946_v18 }
 0x674   : > { %4541 = vmatprep.subr.bf16.mxu1 %v4946_v18 }
 0x6e1   : > { %v5627_v58 = vpop.f32.mrf.mxu0 }
 0x6e3   : > { %v4475_v16 = vpop.f32.mrf.mxu0 }
 0x6e5   : > { %v5629_v3 = vpop.f32.mrf.mxu0 }
 0x6e6   : > { %v4671_v17 = vpack.i.bf16 %v5629_v3, %v5627_v58 }
 0x6e7   : > { %v4476_v34 = vpop.f32.mrf.mxu0 }
 0x6e9   : > { %v5633_v39 = vpop.f32.mrf.mxu0 }
 0x6eb   : > { %v4487_v43 = vpop.f32.mrf.mxu0 }
 0x6ed   : > { %v5635_v41 = vpop.f32.mrf.mxu1  ;;  %v5637_v51 = vpop.f32.mrf.mxu0 }
 0x6ee   : > { %v4691_v4 = vpack.i.bf16 %v5637_v51, %v5633_v39 }
 0x6ef   : > { %v4481_v56 = vpop.f32.mrf.mxu1  ;;  %v4488_v14 = vpop.f32.mrf.mxu0 }
 0x6f1   : > { %v5644_v57 = vpop.f32.mrf.mxu1  ;;  %v4501_v0 = vpop.f32.mrf.mxu0 }
 0x6f2   : > { %v4676_v20 = vpack.i.bf16 %v5644_v57, %v5635_v41  ;;  %v2173_v55 = vadd.f32 %v4501_v0, %v768_v48  ;;  %v5669_v0 = vld [vmem:[%s6134_s1 + $0x10] sm:$0xff] }
 0x6f3   : > { %v4482_v33 = vpop.f32.mrf.mxu1  ;;  %v2167_v46 = vpop.f32.mrf.mxu0 }
 0x6f4   : > { %v2450_v53 = vadd.f32 %v2173_v55, %v5235_v44  ;;  %v2168_v59 = vadd.f32 %v2167_v46, %v767_v35 }
 0x6f6   : > { %v2449_v61 = vadd.f32 %v2168_v59, %v5240_v47  ;;  %v2460_v6 = vsel %vm1144_vm2, %v2450_v53, -inf }
 0x6f7   : > { %2461 = vmax.xlane.f32.xlu1 %v2460_v6 }
 0x6f8   : > { %v2457_v62 = vsel %vm1144_vm2, %v2449_v61, -inf }
 0x6f9   : > { %2458 = vmax.xlane.f32.xlu0 %v2457_v62 }
 0x721   : > { %v4515_v50 = vpop.f32.mrf.mxu0 }
 0x722   : > { %v2355_v7 = vadd.f32 %v4515_v50, %v768_v48  ;;  %v5655_v15 = vpop.f32.mrf.mxu1 }
 0x723   : > { %v2349_v37 = vpop.f32.mrf.mxu0 }
 0x724   : > { %v2454_v21 = vadd.f32 %v2355_v7, %v5268_v60  ;;  %v4493_v8 = vpop.f32.mrf.mxu1  ;;  %v2350_v40 = vadd.f32 %v2349_v37, %v767_v35 }
 0x726   : > { %v5658_v30 = vpop.f32.mrf.mxu1  ;;  %v2472_v44 = vsel %vm1144_vm2, %v2454_v21, -inf  ;;  %v2453_v43 = vadd.f32 %v2350_v40, %v5274_v10 }
 0x727   : > { %v4696_v47 = vpack.i.bf16 %v5658_v30, %v5655_v15  ;;  %2473 = vmax.xlane.f32.xlu1 %v2472_v44 }
 0x728   : > { %v4494_v63 = vpop.f32.mrf.mxu1  ;;  %v2469_v46 = vsel %vm1144_vm2, %v2453_v43, -inf }
 0x72a   : > { %v4508_v12 = vpop.f32.mrf.mxu1 }
 0x72b   : > { %v2264_v36 = vadd.f32 %v4508_v12, %v768_v48 }
 0x72c   : > { %v2258_v16 = vpop.f32.mrf.mxu1 }
 0x72d   : > { %v2452_v34 = vadd.f32 %v2264_v36, %v5255_v52  ;;  %v2259_v60 = vadd.f32 %v2258_v16, %v767_v35 }
 0x72f   : > { %v2466_v56 = vsel %vm1144_vm2, %v2452_v34, -inf  ;;  %v2451_v55 = vadd.f32 %v5669_v0, %v2259_v60 }
 0x730   : > { %2467 = vmax.xlane.f32.xlu0 %v2466_v56 }
 0x731   : > { %v2463_v50 = vsel %vm1144_vm2, %v2451_v55, -inf }
 0x732   : > { %v4522_v14 = vpop.f32.mrf.mxu1 }
 0x733   : > { %v2446_v33 = vadd.f32 %v4522_v14, %v768_v48 }
 0x734   : > { %v2440_v59 = vpop.f32.mrf.mxu1  ;;  %2470 = vmax.xlane.f32.xlu0 %v2469_v46 }
 0x735   : > { %v2456_v52 = vadd.f32 %v2446_v33, %v5279_v11  ;;  %v2441_v10 = vadd.f32 %v2440_v59, %v767_v35  ;;  %v5685_v11 = vpop.permute.xlu1 %2643  ;;  %v5691_v35 = vpop.permute.xlu0 %2743 }
 0x737   : > { %v5675_v6 = vadd.f32 %v2441_v10, %v5285_v13  ;;  %v2478_v62 = vsel %vm1144_vm2, %v2456_v52, -inf }
 0x738   : > { %2479 = vmax.xlane.f32.xlu1 %v2478_v62  ;;  %2464 = vmax.xlane.f32.xlu0 %v2463_v50 }
 0x739   : > { %v2475_v7 = vsel %vm1144_vm2, %v5675_v6, -inf  ;;  %v5687_v13 = vpop.permute.xlu1 %2690 }
 0x73c   : > { %2476 = vmax.xlane.f32.xlu0 %v2475_v7 }
 0x73d   : > { %v5689_v48 = vpop.permute.xlu1 %2834 }
 0x749   : > { %2832 = vrot.lane.b32.xlu1 %v5181_v24, %s4955_s22 }
 0x752   : > { %2741 = vrot.lane.b32.xlu0 %v5170_v9, %s4955_s22 }
 0x780   : > { %v2462_v8 = vpop.xlane.xlu1 %2461 }
 0x781   : > { %v2482_v44 = vsub.f32 %v2450_v53, %v2462_v8 }
 0x782   : > { %v2459_v37 = vpop.xlane.xlu0 %2458 }
 0x783   : > { %v2491_v63 = vmul.f32 1.442695, %v2482_v44  ;;  %v2481_v12 = vsub.f32 %v2449_v61, %v2459_v37 }
 0x785   : > { %4825 = vpow2.f32 %v2491_v63  ;;  %v2489_v40 = vmul.f32 1.442695, %v2481_v12 }
 0x787   : > { %4827 = vpow2.f32 %v2489_v40 }
 0x792   : > { %v5693_v36 = vpop.eup %4825 }
 0x793   : > { %v2508_v16 = vsel %vm1144_vm2, %v5693_v36, 0.0 }
 0x794   : > { %v5697_v60 = vpop.eup %4827  ;;  %2509 = vadd.xlane.f32.xlu1 %v2508_v16 }
 0x795   : > { %v2505_v56 = vsel %vm1144_vm2, %v5697_v60, 0.0 }
 0x796   : > { %2506 = vadd.xlane.f32.xlu0 %v2505_v56 }
 0x7b0   : > { %v2474_v14 = vpop.xlane.xlu1 %2473 }
 0x7b1   : > { %v2486_v53 = vsub.f32 %v2454_v21, %v2474_v14 }
 0x7b3   : > { %v2499_v33 = vmul.f32 1.442695, %v2486_v53 }
 0x7b5   : > { %4829 = vpow2.f32 %v2499_v33 }
 0x7b9   : > { %v2468_v61 = vpop.xlane.xlu0 %2467 }
 0x7ba   : > { %v2484_v46 = vsub.f32 %v2452_v34, %v2468_v61 }
 0x7bc   : > { %v2495_v59 = vmul.f32 1.442695, %v2484_v46 }
 0x7bd   : > { %v2471_v10 = vpop.xlane.xlu0 %2470 }
 0x7be   : > { %4831 = vpow2.f32 %v2495_v59  ;;  %v2485_v62 = vsub.f32 %v2453_v43, %v2471_v10 }
 0x7c0   : > { %v2497_v50 = vmul.f32 1.442695, %v2485_v62 }
 0x7c1   : > { %v2465_v7 = vpop.xlane.xlu0 %2464  ;;  %v2480_v16 = vpop.xlane.xlu1 %2479 }
 0x7c2   : > { %v5701_v8 = vpop.eup %4829  ;;  %4833 = vpow2.f32 %v2497_v50  ;;  %v2483_v44 = vsub.f32 %v2451_v55, %v2465_v7  ;;  %v2488_v56 = vsub.f32 %v2456_v52, %v2480_v16 }
 0x7c3   : > { %v2520_v37 = vsel %vm1144_vm2, %v5701_v8, 0.0 }
 0x7c4   : > { %v2493_v63 = vmul.f32 1.442695, %v2483_v44  ;;  %2521 = vadd.xlane.f32.xlu1 %v2520_v37  ;;  %v2503_v14 = vmul.f32 1.442695, %v2488_v56 }
 0x7c5   : > { %v2477_v53 = vpop.xlane.xlu0 %2476 }
 0x7c6   : > { %4835 = vpow2.f32 %v2493_v63  ;;  %v2487_v33 = vsub.f32 %v5675_v6, %v2477_v53 }
 0x7c7   : > { %4837 = vpow2.f32 %v2503_v14 }
 0x7c8   : > { %v2501_v61 = vmul.f32 1.442695, %v2487_v33 }
 0x7c9   : > { %v2742_v52 = vpop.permute.xlu0 %2741 }
 0x7ca   : > { %4839 = vpow2.f32 %v2501_v61 }
 0x7cb   : > { %v5705_v21 = vpop.eup %4831 }
 0x7cc   : > { %v2514_v34 = vsel %vm1144_vm2, %v5705_v21, 0.0 }
 0x7cd   : > { %2515 = vadd.xlane.f32.xlu1 %v2514_v34 }
 0x7cf   : > { %v4834_v12 = vpop.eup %4833 }
 0x7d0   : > { %v2517_v43 = vsel %vm1144_vm2, %v4834_v12, 0.0 }
 0x7d1   : > { %2518 = vadd.xlane.f32.xlu0 %v2517_v43 }
 0x7d3   : > { %v5710_v40 = vpop.eup %4835 }
 0x7d4   : > { %v2511_v55 = vsel %vm1144_vm2, %v5710_v40, 0.0  ;;  %v5719_v46 = vpop.eup %4837 }
 0x7d5   : > { %2512 = vadd.xlane.f32.xlu0 %v2511_v55  ;;  %v2526_v59 = vsel %vm1144_vm2, %v5719_v46, 0.0 }
 0x7d7   : > { %v5723_v10 = vpop.eup %4839 }
 0x7de   : > { %2739 = vrot.lane.b32.xlu1 %v5177_v23, %s4956_s30  ;;  %v2523_v23 = vsel %vm1144_vm2, %v5723_v10, 0.0 }
 0x7eb   : > { %2737 = vrot.lane.b32.xlu0 %v5170_v9, %s4956_s30  ;;  %v5731_v9 = vpop.permute.xlu1 %2832 }
 0x802   : > { %2527 = vadd.xlane.f32.xlu1 %v2526_v59 }
 0x80a   : > { %2524 = vadd.xlane.f32.xlu0 %v2523_v23 }
 0x813   : > { %2925 = vrot.lane.b32.xlu1 %v5190_v31, %s4955_s22 }
 0x817   : > { %3016 = vrot.lane.b32.xlu1 %v5186_v29, %s4955_s22 }
 0x81b   : > { %3014 = vrot.lane.b32.xlu1 %v5193_v32, %s4955_s22 }
 0x81d   : > { %v2510_v6 = vpop.xlane.xlu1 %2509 }
 0x81e   : > { %4841 = vrcp.f32 %v2510_v6 }
 0x81f   : > { %2921 = vrot.lane.b32.xlu1 %v5190_v31, %s4956_s30  ;;  %v2507_v62 = vpop.xlane.xlu0 %2506 }
 0x820   : > { %4843 = vrcp.f32 %v2507_v62  ;;  %2828 = vrot.lane.b32.xlu0 %v5181_v24, %s4956_s30 }
 0x823   : > { %3012 = vrot.lane.b32.xlu1 %v5186_v29, %s4956_s30 }
 0x824   : > { %2830 = vrot.lane.b32.xlu0 %v5175_v22, %s4956_s30 }
 0x828   : > { %2923 = vrot.lane.b32.xlu0 %v5184_v27, %s4955_s22  ;;  %s4960_s22 = smov 24  }
 0x82b   : > { %v4842_v50 = vpop.eup %4841 }
 0x82c   : > { %2919 = vrot.lane.b32.xlu0 %v5184_v27, %s4956_s30  ;;  %v2538_v44 = vmul.f32 %v4842_v50, %v5693_v36 }
 0x82d   : > { %v4844_v7 = vpop.eup %4843 }
 0x82e   : > { %v2537_v31 = vmul.f32 %v4844_v7, %v5697_v60 }
 0x830   : > { %v2545_v37 = vpack.c.bf16 %v2538_v44, %v2537_v31  ;;  %3010 = vrot.lane.b32.xlu0 %v5193_v32, %s4956_s30 }
 0x832   : > { %4526 = vmatmul.mubr.msk.bf16.vlgmr.msra.gmra.mxu0 %vm1144_vm2, %v2545_v37 }
 0x833   : > { %4536 = vmatpush3.bf16.msra.mxu0 %v5685_v11  ;;  %4537 = vmatprep.mubr.msk.bf16.mxu0 %vm4950_vm3, %v4946_v18 }
 0x834   : > { %4547 = vmatprep.subr.msk.mxu0 %vm785_vm1, %v5691_v35 }
 0x84d   : > { %v2522_v22 = vpop.xlane.xlu1 %2521 }
 0x84e   : > { %4845 = vrcp.f32 %v2522_v22 }
 0x856   : > { %v2516_v27 = vpop.xlane.xlu1 %2515 }
 0x85a   : > { %v2519_v24 = vpop.xlane.xlu0 %2518 }
 0x85b   : > { %4847 = vrcp.f32 %v2519_v24  ;;  %v4846_v36 = vpop.eup %4845 }
 0x85c   : > { %4849 = vrcp.f32 %v2516_v27  ;;  %v2542_v63 = vmul.f32 %v4846_v36, %v5701_v8  ;;  %v2740_v8 = vpop.permute.xlu1 %2739 }
 0x85e   : > { %v2513_v29 = vpop.xlane.xlu0 %2512 }
 0x85f   : > { %4851 = vrcp.f32 %v2513_v29 }
 0x862   : > { %v2738_v55 = vpop.permute.xlu0 %2737 }
 0x868   : > { %v4848_v32 = vpop.eup %4847 }
 0x869   : > { %v2541_v60 = vmul.f32 %v4848_v32, %v4834_v12  ;;  %v4850_v11 = vpop.eup %4849 }
 0x86a   : > { %v2540_v56 = vmul.f32 %v4850_v11, %v5705_v21 }
 0x86b   : > { %v2547_v34 = vpack.c.bf16 %v2542_v63, %v2541_v60  ;;  %v770_v60 = vld [vmem:[%s6135_s2 + $0x38] sm:$0xff] }
 0x86c   : > { %v4852_v43 = vpop.eup %4851 }
 0x86d   : > { %4538 = vmatmul.mubr.msk.bf16.vlgmr.msra.gmra.mxu0 %vm1144_vm2, %v2547_v34  ;;  %v2539_v16 = vmul.f32 %v4852_v43, %v5710_v40  ;;  %v769_v34 = vld [vmem:[%s6135_s2 + $0x30] sm:$0xff] }
 0x86e   : > { %4548 = vmatpush3.xpose.msk.msra.mxu0 %vm785_vm1, %v5691_v35  ;;  %4551 = vmatprep.mubr.msk.f32.mxu0 %vm785_vm1, %v2738_v55 }
 0x86f   : > { %4549 = vmatprep.subr.msk.mxu0 %vm785_vm1, %v2742_v52  ;;  %v2546_v12 = vpack.c.bf16 %v2540_v56, %v2539_v16 }
 0x871   : > { %4532 = vmatmul.mubr.msk.bf16.vlgmr.msra.gmra.mxu1 %vm1144_vm2, %v2546_v12  ;;  %v4922_v12 = vld [vmem:[%s6134_s1 + $0x8] sm:$0xff] }
 0x872   : > { %4550 = vmatpush3.xpose.msk.msra.mxu0 %vm785_vm1, %v2742_v52  ;;  %4542 = vmatpush3.bf16.msra.mxu1 %v5687_v13 }
 0x873   : > { %4543 = vmatprep.mubr.msk.bf16.mxu1 %vm4950_vm3, %v4946_v18  ;;  %4554 = vmatprep.subr.msk.mxu1 %vm785_vm1, %v5689_v48 }
 0x875   : > { %4552 = vmatmul.mubr.msk.f32.vlgmr.msra.gmra.mxu0 %vm785_vm1, %v2740_v8 }
 0x88b   : > { %v2528_v35 = vpop.xlane.xlu1 %2527 }
 0x88c   : > { %4853 = vrcp.f32 %v2528_v35 }
 0x88f   : > { %v2926_v21 = vpop.permute.xlu1 %2925 }
 0x890   : > { %4561 = vmatprep.subr.msk.mxu0 %vm785_vm1, %v2926_v21 }
 0x891   : > { %4562 = vmatpush3.xpose.msk.msra.mxu0 %vm785_vm1, %v2926_v21 }
 0x893   : > { %v2525_v40 = vpop.xlane.xlu0 %2524  ;;  %v3017_v13 = vpop.permute.xlu1 %3016 }
 0x894   : > { %4855 = vrcp.f32 %v2525_v40  ;;  %v4923_v40 = vld [vmem:[%s6134_s1] sm:$0xff] }
 0x897   : > { %v2829_v14 = vpop.permute.xlu0 %2828  ;;  %v3015_v33 = vpop.permute.xlu1 %3014 }
 0x899   : > { %v4854_v61 = vpop.eup %4853 }
 0x89a   : > { %v2544_v6 = vmul.f32 %v4854_v61, %v5719_v46 }
 0x89b   : > { %v2831_v53 = vpop.permute.xlu0 %2830  ;;  %v2922_v50 = vpop.permute.xlu1 %2921 }
 0x89f   : > { %v2924_v59 = vpop.permute.xlu0 %2923 }
 0x8a0   : > { %4563 = vmatprep.subr.msk.mxu0 %vm785_vm1, %v2924_v59 }
 0x8a1   : > { %v4856_v23 = vpop.eup %4855  ;;  %4564 = vmatpush3.xpose.msk.msra.mxu0 %vm785_vm1, %v2924_v59 }
 0x8a2   : > { %v2543_v52 = vmul.f32 %v4856_v23, %v5723_v10  ;;  %4575 = vmatprep.subr.bf16.mxu0 %v4946_v18  ;;  %v4924_v23 = vld [vmem:[%s6134_s1 + $0x28] sm:$0xff] }
 0x8a3   : > { %v2920_v62 = vpop.permute.xlu0 %2919 }
 0x8a4   : > { %4565 = vmatprep.mubr.msk.f32.mxu0 %vm785_vm1, %v2920_v62  ;;  %v2548_v7 = vpack.c.bf16 %v2544_v6, %v2543_v52 }
 0x8a5   : > { %4566 = vmatmul.mubr.msk.f32.vlgmr.msra.gmra.mxu0 %vm785_vm1, %v2922_v50 }
 0x8a6   : > { %4544 = vmatmul.mubr.msk.bf16.vlgmr.msra.gmra.mxu1 %vm1144_vm2, %v2548_v7  ;;  %4577 = vmatprep.mubr.msk.bf16.mxu0 %vm4950_vm3, %v4946_v18 }
 0x8a7   : > { %4555 = vmatpush3.xpose.msk.msra.mxu1 %vm785_vm1, %v5689_v48  ;;  %4558 = vmatprep.mubr.msk.f32.mxu1 %vm785_vm1, %v2829_v14  ;;  %v3011_v46 = vpop.permute.xlu0 %3010  ;;  %v3013_v48 = vpop.permute.xlu1 %3012 }
 0x8a8   : > { %4556 = vmatprep.subr.msk.mxu1 %vm785_vm1, %v5731_v9 }
 0x8ab   : > { %4557 = vmatpush3.xpose.msk.msra.mxu1 %vm785_vm1, %v5731_v9 }
 0x8ac   : > { %4568 = vmatprep.subr.msk.mxu1 %vm785_vm1, %v3017_v13 }
 0x8ae   : > { %4559 = vmatmul.mubr.msk.f32.vlgmr.msra.gmra.mxu1 %vm785_vm1, %v2831_v53 }
 0x8af   : > { %4569 = vmatpush3.xpose.msk.msra.mxu1 %vm785_vm1, %v3017_v13  ;;  %4572 = vmatprep.mubr.msk.f32.mxu1 %vm785_vm1, %v3011_v46 }
 0x8b0   : > { %4570 = vmatprep.subr.msk.mxu1 %vm785_vm1, %v3015_v33 }
 0x8b3   : > { %4571 = vmatpush3.xpose.msk.msra.mxu1 %vm785_vm1, %v3015_v33 }
 0x8b4   : > { %4581 = vmatprep.subr.bf16.mxu1 %v4946_v18 }
 0x8b6   : > { %4573 = vmatmul.mubr.msk.f32.vlgmr.msra.gmra.mxu1 %vm785_vm1, %v3013_v48 }
 0x8b7   : > { %4583 = vmatprep.mubr.msk.bf16.mxu1 %vm4950_vm3, %v4946_v18 }
 0x8f2   : > { %v5802_v10 = vpop.f32.mrf.mxu0 }
 0x8f4   : > { %v4527_v9 = vpop.f32.mrf.mxu0 }
 0x8f6   : > { %v5804_v31 = vpop.f32.mrf.mxu0 }
 0x8f7   : > { %v4681_v44 = vpack.i.bf16 %v5804_v31, %v5802_v10 }
 0x8f8   : > { %v4528_v37 = vpop.f32.mrf.mxu0 }
 0x92d   : > { %v5808_v22 = vpop.f32.mrf.mxu0 }
 0x92f   : > { %v4539_v24 = vpop.f32.mrf.mxu0 }
 0x931   : > { %v5810_v27 = vpop.f32.mrf.mxu0  ;;  %v5812_v29 = vpop.f32.mrf.mxu1 }
 0x932   : > { %v4706_v36 = vpack.i.bf16 %v5810_v27, %v5808_v22 }
 0x933   : > { %v4540_v32 = vpop.f32.mrf.mxu0  ;;  %v4533_v63 = vpop.f32.mrf.mxu1 }
 0x934   : > { %v4925_v32 = vld [vmem:[%s6134_s1 + $0x18] sm:$0xff] }
 0x935   : > { %v4553_v11 = vpop.f32.mrf.mxu0  ;;  %v5822_v43 = vpop.f32.mrf.mxu1 }
 0x936   : > { %v2825_v55 = vadd.f32 %v4553_v11, %v770_v60  ;;  %v4686_v16 = vpack.i.bf16 %v5822_v43, %v5812_v29 }
 0x937   : > { %v2819_v56 = vpop.f32.mrf.mxu0  ;;  %v4534_v35 = vpop.f32.mrf.mxu1 }
 0x938   : > { %v3102_v8 = vadd.f32 %v4922_v12, %v2825_v55  ;;  %v2820_v21 = vadd.f32 %v2819_v56, %v769_v34 }
 0x93a   : > { %v3101_v14 = vadd.f32 %v4923_v40, %v2820_v21  ;;  %v3112_v13 = vsel %vm1144_vm2, %v3102_v8, -inf  ;;  %v4926_v21 = vld [vmem:[%s6134_s1 + $0x20] sm:$0xff] }
 0x93b   : > { %3113 = vmax.xlane.f32.xlu1 %v3112_v13 }
 0x93c   : > { %v3109_v53 = vsel %vm1144_vm2, %v3101_v14, -inf }
 0x93d   : > { %3110 = vmax.xlane.f32.xlu0 %v3109_v53 }
 0x965   : > { %v4567_v33 = vpop.f32.mrf.mxu0 }
 0x966   : > { %v3007_v61 = vadd.f32 %v4567_v33, %v770_v60  ;;  %v5834_v59 = vpop.f32.mrf.mxu1 }
 0x967   : > { %v3001_v37 = vpop.f32.mrf.mxu0 }
 0x968   : > { %v3106_v52 = vadd.f32 %v4924_v23, %v3007_v61  ;;  %v4545_v6 = vpop.f32.mrf.mxu1  ;;  %v3002_v55 = vadd.f32 %v3001_v37, %v769_v34  ;;  %v4927_v61 = vld [vmem:[%s6134_s1 + $0x38] sm:$0xff] }
 0x969   : > { %v4928_v6 = vld [vmem:[%s6134_s1 + $0x30] sm:$0xff] }
 0x96a   : > { %v5839_v62 = vpop.f32.mrf.mxu1  ;;  %v3124_v50 = vsel %vm1144_vm2, %v3106_v52, -inf  ;;  %v3105_v40 = vadd.f32 %v4926_v21, %v3002_v55 }
 0x96b   : > { %v4716_v7 = vpack.i.bf16 %v5839_v62, %v5834_v59  ;;  %3125 = vmax.xlane.f32.xlu1 %v3124_v50 }
 0x96c   : > { %v4546_v46 = vpop.f32.mrf.mxu1 }
 0x96e   : > { %v4560_v48 = vpop.f32.mrf.mxu1 }
 0x96f   : > { %v2916_v9 = vadd.f32 %v4560_v48, %v770_v60  ;;  %v3121_v48 = vsel %vm1144_vm2, %v3105_v40, -inf }
 0x970   : > { %v2910_v24 = vpop.f32.mrf.mxu1 }
 0x971   : > { %v3104_v63 = vadd.f32 %v4925_v32, %v2916_v9  ;;  %v2911_v11 = vadd.f32 %v2910_v24, %v769_v34 }
 0x973   : > { %v3103_v56 = vadd.f32 %v5669_v0, %v2911_v11  ;;  %v3118_v12 = vsel %vm1144_vm2, %v3104_v63, -inf }
 0x974   : > { %3119 = vmax.xlane.f32.xlu0 %v3118_v12 }
 0x975   : > { %v3115_v53 = vsel %vm1144_vm2, %v3103_v56, -inf }
 0x976   : > { %v4574_v35 = vpop.f32.mrf.mxu1 }
 0x977   : > { %v3098_v13 = vadd.f32 %v4574_v35, %v770_v60 }
 0x978   : > { %v3092_v33 = vpop.f32.mrf.mxu1  ;;  %3116 = vmax.xlane.f32.xlu0 %v3115_v53 }
 0x979   : > { %v3108_v23 = vadd.f32 %v4927_v61, %v3098_v13  ;;  %v3093_v0 = vadd.f32 %v3092_v33, %v769_v34 }
 0x97b   : > { %v3107_v50 = vadd.f32 %v4928_v6, %v3093_v0  ;;  %v3130_v46 = vsel %vm1144_vm2, %v3108_v23, -inf }
 0x97c   : > { %3131 = vmax.xlane.f32.xlu1 %v3130_v46  ;;  %3122 = vmax.xlane.f32.xlu0 %v3121_v48 }
 0x97d   : > { %v3127_v60 = vsel %vm1144_vm2, %v3107_v50, -inf }
 0x980   : > { %3128 = vmax.xlane.f32.xlu0 %v3127_v60 }
 0x9c4   : > { %v3114_v9 = vpop.xlane.xlu1 %3113 }
 0x9c5   : > { %v3134_v37 = vsub.f32 %v3102_v8, %v3114_v9 }
 0x9c6   : > { %v3111_v24 = vpop.xlane.xlu0 %3110 }
 0x9c7   : > { %v3143_v32 = vmul.f32 1.442695, %v3134_v37  ;;  %v3133_v11 = vsub.f32 %v3101_v14, %v3111_v24 }
 0x9c9   : > { %4857 = vpow2.f32 %v3143_v32  ;;  %v3141_v34 = vmul.f32 1.442695, %v3133_v11 }
 0x9cb   : > { %4859 = vpow2.f32 %v3141_v34 }
 0x9d6   : > { %v5862_v55 = vpop.eup %4857 }
 0x9d7   : > { %v3160_v12 = vsel %vm1144_vm2, %v5862_v55, 0.0 }
 0x9d8   : > { %v5866_v35 = vpop.eup %4859  ;;  %3161 = vadd.xlane.f32.xlu1 %v3160_v12 }
 0x9d9   : > { %v3157_v21 = vsel %vm1144_vm2, %v5866_v35, 0.0 }
 0x9da   : > { %3158 = vadd.xlane.f32.xlu0 %v3157_v21 }
 0x9f4   : > { %v3126_v13 = vpop.xlane.xlu1 %3125 }
 0x9f5   : > { %v3138_v8 = vsub.f32 %v3106_v52, %v3126_v13 }
 0x9f7   : > { %v3151_v53 = vmul.f32 1.442695, %v3138_v8 }
 0x9f9   : > { %4861 = vpow2.f32 %v3151_v53 }
 0x9fd   : > { %v3120_v14 = vpop.xlane.xlu0 %3119 }
 0x9fe   : > { %v3136_v33 = vsub.f32 %v3104_v63, %v3120_v14 }
 0xa00   : > { %v3147_v61 = vmul.f32 1.442695, %v3136_v33 }
 0xa01   : > { %v3117_v0 = vpop.xlane.xlu0 %3116 }
 0xa02   : > { %4863 = vpow2.f32 %v3147_v61  ;;  %v3135_v6 = vsub.f32 %v3103_v56, %v3117_v0 }
 0xa04   : > { %v3145_v52 = vmul.f32 1.442695, %v3135_v6 }
 0xa05   : > { %v3132_v46 = vpop.xlane.xlu1 %3131  ;;  %v3123_v48 = vpop.xlane.xlu0 %3122 }
 0xa06   : > { %v5870_v60 = vpop.eup %4861  ;;  %v3140_v9 = vsub.f32 %v3108_v23, %v3132_v46  ;;  %v3137_v37 = vsub.f32 %v3105_v40, %v3123_v48 }
 0xa07   : > { %v3172_v24 = vsel %vm1144_vm2, %v5870_v60, 0.0 }
 0xa08   : > { %v3155_v32 = vmul.f32 1.442695, %v3140_v9  ;;  %v3149_v11 = vmul.f32 1.442695, %v3137_v37  ;;  %3173 = vadd.xlane.f32.xlu1 %v3172_v24 }
 0xa09   : > { %v3129_v34 = vpop.xlane.xlu0 %3128 }
 0xa0a   : > { %4865 = vpow2.f32 %v3155_v32  ;;  %v3139_v63 = vsub.f32 %v3107_v50, %v3129_v34 }
 0xa0b   : > { %4867 = vpow2.f32 %v3149_v11  ;;  %v4734_v11 = vld [vmem:[%s6138_s5] sm:$0xff]  }
 0xa0c   : > { %4869 = vpow2.f32 %v3145_v52  ;;  %v3153_v12 = vmul.f32 1.442695, %v3139_v63 }
 0xa0e   : > { %4871 = vpow2.f32 %v3153_v12 }
 0xa0f   : > { %v5874_v56 = vpop.eup %4863 }
 0xa10   : > { %v3166_v21 = vsel %vm1144_vm2, %v5874_v56, 0.0 }
 0xa11   : > { %3167 = vadd.xlane.f32.xlu1 %v3166_v21 }
 0xa17   : > { %v5878_v40 = vpop.eup %4865 }
 0xa18   : > { %v4868_v23 = vpop.eup %4867  ;;  %v3178_v13 = vsel %vm1144_vm2, %v5878_v40, 0.0 }
 0xa19   : > { %3179 = vadd.xlane.f32.xlu1 %v3178_v13  ;;  %v3169_v8 = vsel %vm1144_vm2, %v4868_v23, 0.0  ;;  %v4870_v50 = vpop.eup %4869 }
 0xa1a   : > { %3170 = vadd.xlane.f32.xlu0 %v3169_v8  ;;  %v3163_v53 = vsel %vm1144_vm2, %v4870_v50, 0.0 }
 0xa1b   : > { %v5884_v14 = vpop.eup %4871 }
 0xa1c   : > { %v3175_v33 = vsel %vm1144_vm2, %v5884_v14, 0.0 }
 0xa1e   : > { %3164 = vadd.xlane.f32.xlu0 %v3163_v53 }
 0xa22   : > { %3176 = vadd.xlane.f32.xlu0 %v3175_v33 }
 0xa2a   : > { %3248 = vrot.lane.b32.xlu1 %v5301_v19, %s4957_s27 }
 0xa2e   : > { %3295 = vrot.lane.b32.xlu1 %v5306_v25, %s4957_s27 }
 0xa32   : > { %3342 = vrot.lane.b32.xlu1 %v5315_v28, %s4957_s27 }
 0xa36   : > { %4677 = vrot.lane.b32.xlu1 %v4676_v20, %s4958_s28 }
 0xa38   : > { %3201 = vrot.lane.b32.xlu0 %v5311_v26, %s4957_s27 }
 0xa3a   : > { %4687 = vrot.lane.b32.xlu1 %v4686_v16, %s4959_s29 }
 0xa3c   : > { %4672 = vrot.lane.b32.xlu0 %v4671_v17, %s4958_s28 }
 0xa3e   : > { %4697 = vrot.lane.b32.xlu1 %v4696_v47, %s4958_s28 }
 0xa40   : > { %4682 = vrot.lane.b32.xlu0 %v4681_v44, %s4959_s29 }
 0xa44   : > { %4692 = vrot.lane.b32.xlu0 %v4691_v4, %s4958_s28 }
 0xa61   : > { %v3162_v19 = vpop.xlane.xlu1 %3161 }
 0xa63   : > { %v3159_v25 = vpop.xlane.xlu0 %3158 }
 0xa64   : > { %4873 = vrcp.f32 %v3159_v25 }
 0xa65   : > { %4875 = vrcp.f32 %v3162_v19 }
 0xa71   : > { %v4874_v57 = vpop.eup %4873 }
 0xa72   : > { %v4876_v51 = vpop.eup %4875  ;;  %v3189_v4 = vmul.f32 %v4874_v57, %v5866_v35 }
 0xa73   : > { %v3190_v15 = vmul.f32 %v4876_v51, %v5862_v55 }
 0xa75   : > { %v3197_v30 = vpack.c.bf16 %v3190_v15, %v3189_v4 }
 0xa91   : > { %v3174_v26 = vpop.xlane.xlu1 %3173 }
 0xa9a   : > { %v3168_v28 = vpop.xlane.xlu1 %3167 }
 0xaa2   : > { %v3180_v58 = vpop.xlane.xlu1 %3179 }
 0xaa3   : > { %v3171_v3 = vpop.xlane.xlu0 %3170 }
 0xaa4   : > { %4877 = vrcp.f32 %v3171_v3 }
 0xaa5   : > { %4879 = vrcp.f32 %v3168_v28 }
 0xaa6   : > { %v3249_v17 = vpop.permute.xlu1 %3248  ;;  %4881 = vrcp.f32 %v3174_v26 }
 0xaa7   : > { %4582 = vmatpush3.bf16.msra.mxu1 %v3249_v17  ;;  %v3165_v41 = vpop.xlane.xlu0 %3164 }
 0xaa8   : > { %4883 = vrcp.f32 %v3165_v41  ;;  %4593 = vmatprep.subr.bf16.mxu1 %v4946_v18 }
 0xaaa   : > { %v3296_v31 = vpop.permute.xlu1 %3295 }
 0xaab   : > { %v3177_v39 = vpop.xlane.xlu0 %3176 }
 0xaac   : > { %4885 = vrcp.f32 %v3177_v39 }
 0xaad   : > { %4887 = vrcp.f32 %v3180_v58 }
 0xaae   : > { %v3343_v46 = vpop.permute.xlu1 %3342 }
 0xaaf   : > { %v3202_v20 = vpop.permute.xlu0 %3201 }
 0xab0   : > { %4576 = vmatpush3.bf16.msra.mxu0 %v3202_v20 }
 0xab1   : > { %4587 = vmatprep.subr.bf16.mxu0 %v4946_v18  ;;  %v4878_v47 = vpop.eup %4877 }
 0xab2   : > { %v4880_v10 = vpop.eup %4879  ;;  %v3193_v43 = vmul.f32 %v4878_v47, %v4868_v23 }
 0xab3   : > { %4578 = vmatmul.mubr.msk.bf16.vlgmr.msra.gmra.mxu0 %vm1144_vm2, %v3197_v30  ;;  %v4882_v44 = vpop.eup %4881  ;;  %v3192_v35 = vmul.f32 %v4880_v10, %v5874_v56  ;;  %v4673_v22 = vpop.permute.xlu0 %4672 }
 0xab4   : > { %4588 = vmatpush3.bf16.msra.mxu0 %v3296_v31  ;;  %4589 = vmatprep.mubr.msk.bf16.mxu0 %vm4950_vm3, %v4946_v18  ;;  %v3194_v55 = vmul.f32 %v4882_v44, %v5870_v60  ;;  %v4733_v60 = vld [vmem:[%s6138_s5 + $0x8] sm:$0xff]   ;;  %v4675_v3 = vunpack.i.h.bf16 %v4673_v22  ;;  %v4674_v17 = vunpack.i.l.bf16 %v4673_v22 }
 0xab5   : > { %v4884_v29 = vpop.eup %4883  ;;  %4599 = vmatprep.subr.bf16.mxu0 %v4733_v60 }
 0xab6   : > { %v3191_v16 = vmul.f32 %v4884_v29, %v4870_v50  ;;  %v3199_v6 = vpack.c.bf16 %v3194_v55, %v3193_v43  ;;  %v3486_v4 = vsel %vm785_vm1, %v5461_v5, %v4675_v3  ;;  %v3485_v59 = vsel %vm785_vm1, %v5459_v1, %v4674_v17  ;;  %v4929_v3 = vld [vmem:[%s5057_s24 + $0x10] sm:$0xff] }
 0xab7   : > { %v4683_v27 = vpop.permute.xlu0 %4682 }
 0xab8   : > { %v3198_v61 = vpack.c.bf16 %v3192_v35, %v3191_v16  ;;  %v4685_v57 = vunpack.i.h.bf16 %v4683_v27  ;;  %v4684_v39 = vunpack.i.l.bf16 %v4683_v27 }
 0xab9   : > { %v4886_v0 = vpop.eup %4885 }
 0xaba   : > { %4584 = vmatmul.mubr.msk.bf16.vlgmr.msra.gmra.mxu1 %vm1144_vm2, %v3198_v61  ;;  %v4888_v48 = vpop.eup %4887  ;;  %v3195_v9 = vmul.f32 %v4886_v0, %v5884_v14  ;;  %v3493_v20 = vsel %vm1144_vm2, %v3485_v59, %v4684_v39  ;;  %v3494_v15 = vsel %vm1144_vm2, %v3486_v4, %v4685_v57  ;;  %v4930_v39 = vld [vmem:[%s5057_s24] sm:$0xff] }
 0xabb   : > { %4594 = vmatpush3.bf16.msra.mxu1 %v3343_v46  ;;  %4590 = vmatmul.mubr.msk.bf16.vlgmr.msra.gmra.mxu0 %vm1144_vm2, %v3199_v6  ;;  %v3196_v37 = vmul.f32 %v4888_v48, %v5878_v40  ;;  %v4693_v58 = vpop.permute.xlu0 %4692 }
 0xabc   : > { %4595 = vmatprep.mubr.msk.bf16.mxu1 %vm4950_vm3, %v4946_v18  ;;  %4600 = vmatpush3.bf16.msra.mxu0 %v4733_v60  ;;  %v4695_v35 = vunpack.i.h.bf16 %v4693_v58  ;;  %v4694_v55 = vunpack.i.l.bf16 %v4693_v58 }
 0xabd   : > { %v3200_v24 = vpack.c.bf16 %v3196_v37, %v3195_v9  ;;  %4601 = vmatprep.subr.bf16.mxu0 %v4734_v11 }
 0xac0   : > { %4602 = vmatpush3.bf16.msra.mxu0 %v4734_v11  ;;  %v3489_v11 = vsel %vm785_vm1, %v5467_v45, %v4694_v55 }
 0xac2   : > { %4596 = vmatmul.mubr.msk.bf16.vlgmr.msra.gmra.mxu1 %vm1144_vm2, %v3200_v24 }
 0xb73   : > { %v3241_v32 = vpop.f32.mrf.mxu0 }
 0xb75   : > { %v4579_v52 = vpop.f32.mrf.mxu0 }
 0xb77   : > { %v3244_v18 = vpop.f32.mrf.mxu0 }
 0xb78   : > { %v4701_v34 = vpack.i.bf16 %v3244_v18, %v3241_v32  ;;  %v3490_v32 = vsel %vm785_vm1, %v5469_v49, %v4695_v35 }
 0xb79   : > { %v4580_v63 = vpop.f32.mrf.mxu0 }
 0xb7a   : > { %v3288_v12 = vpop.f32.mrf.mxu1  ;;  %4702 = vrot.lane.b32.xlu0 %v4701_v34, %s4960_s22 }
 0xb7b   : > { %v3335_v56 = vpop.f32.mrf.mxu0 }
 0xb7c   : > { %v4585_v21 = vpop.f32.mrf.mxu1 }
 0xb7d   : > { %v4591_v40 = vpop.f32.mrf.mxu0 }
 0xb7e   : > { %v3291_v23 = vpop.f32.mrf.mxu1  ;;  %4707 = vrot.lane.b32.xlu0 %v4706_v36, %s4959_s29  ;;  %v4678_v36 = vpop.permute.xlu1 %4677 }
 0xb7f   : > { %v4711_v13 = vpack.i.bf16 %v3291_v23, %v3288_v12  ;;  %v3338_v8 = vpop.f32.mrf.mxu0  ;;  %v4680_v30 = vunpack.i.h.bf16 %v4678_v36  ;;  %v4679_v47 = vunpack.i.l.bf16 %v4678_v36 }
 0xb80   : > { %v4721_v50 = vpack.i.bf16 %v3338_v8, %v3335_v56  ;;  %v4586_v53 = vpop.f32.mrf.mxu1 }
 0xb81   : > { %4712 = vrot.lane.b32.xlu1 %v4711_v13, %s4960_s22  ;;  %v4592_v14 = vpop.f32.mrf.mxu0  ;;  %v3488_v0 = vsel %vm785_vm1, %v5465_v42, %v4680_v30  ;;  %v3487_v6 = vsel %vm785_vm1, %v5463_v38, %v4679_v47  ;;  %v4932_v47 = vld [vmem:[%s5057_s24 + $0x8] sm:$0xff] }
 0xb82   : > { %v3382_v33 = vpop.f32.mrf.mxu1  ;;  %4722 = vrot.lane.b32.xlu0 %v4721_v50, %s4960_s22  ;;  %v4688_v41 = vpop.permute.xlu1 %4687 }
 0xb83   : > { %v4690_v29 = vunpack.i.h.bf16 %v4688_v41  ;;  %v4689_v43 = vunpack.i.l.bf16 %v4688_v41 }
 0xb84   : > { %v4597_v19 = vpop.f32.mrf.mxu1 }
 0xb85   : > { %4717 = vrot.lane.b32.xlu1 %v4716_v7, %s4959_s29  ;;  %v3495_v48 = vsel %vm1144_vm2, %v3487_v6, %v4689_v43  ;;  %v3496_v9 = vsel %vm1144_vm2, %v3488_v0, %v4690_v29 }
 0xb86   : > { %v3385_v25 = vpop.f32.mrf.mxu1  ;;  %v4698_v10 = vpop.permute.xlu1 %4697 }
 0xb87   : > { %v4726_v26 = vpack.i.bf16 %v3385_v25, %v3382_v33  ;;  %v4700_v49 = vunpack.i.h.bf16 %v4698_v10  ;;  %v4699_v23 = vunpack.i.l.bf16 %v4698_v10 }
 0xb88   : > { %v4598_v28 = vpop.f32.mrf.mxu1 }
 0xb89   : > { %4727 = vrot.lane.b32.xlu1 %v4726_v26, %s4960_s22  ;;  %v3492_v53 = vsel %vm785_vm1, %v5476_v54, %v4700_v49  ;;  %v3491_v14 = vsel %vm785_vm1, %v5471_v2, %v4699_v23  ;;  %v4226_v54 = vld [vmem:[%s6139_s6] ss:$0 sm:$0xff] }
 0xbec   : > { %v4703_v51 = vpop.permute.xlu0 %4702 }
 0xbed   : > { %v4705_v62 = vunpack.i.h.bf16 %v4703_v51  ;;  %v4704_v7 = vunpack.i.l.bf16 %v4703_v51 }
 0xbef   : > { %v3502_v31 = vsel %vm3501_vm4, %v3493_v20, %v4704_v7  ;;  %v3503_v44 = vsel %vm3501_vm4, %v3494_v15, %v4705_v62  ;;  %v4931_v7 = vld [vmem:[%s5057_s24 + $0x18] sm:$0xff] }
 0xbf0   : > { %v3510_v16 = vpack.c.bf16 %v3503_v44, %v3502_v31  ;;  %v4708_v5 = vpop.permute.xlu0 %4707 }
 0xbf1   : > { %v4710_v1 = vunpack.i.h.bf16 %v4708_v5  ;;  %v4709_v61 = vunpack.i.l.bf16 %v4708_v5 }
 0xbf2   : > { %4603 = vmatprep.mubr.msk.bf16.mxu0 %vm507_vm0, %v3510_v16 }
 0xbf3   : > { %v4713_v46 = vpop.permute.xlu1 %4712  ;;  %v3497_v42 = vsel %vm1144_vm2, %v3489_v11, %v4709_v61  ;;  %v3498_v38 = vsel %vm1144_vm2, %v3490_v32, %v4710_v1  ;;  %v4934_v32 = vld [vmem:[%s5057_s24 + $0x30] sm:$0xff] }
 0xbf4   : > { %v4715_v37 = vunpack.i.h.bf16 %v4713_v46  ;;  %v4714_v24 = vunpack.i.l.bf16 %v4713_v46  ;;  %v4723_v60 = vpop.permute.xlu0 %4722 }
 0xbf5   : > { %v4725_v52 = vunpack.i.h.bf16 %v4723_v60  ;;  %v4724_v18 = vunpack.i.l.bf16 %v4723_v60 }
 0xbf6   : > { %v3505_v34 = vsel %vm3501_vm4, %v3496_v9, %v4715_v37  ;;  %v3504_v63 = vsel %vm3501_vm4, %v3495_v48, %v4714_v24  ;;  %v4933_v9 = vld [vmem:[%s5057_s24 + $0x38] sm:$0xff] }
 0xbf7   : > { %v3511_v12 = vpack.c.bf16 %v3505_v34, %v3504_v63  ;;  %v3506_v56 = vsel %vm3501_vm4, %v3497_v42, %v4724_v18  ;;  %v3507_v21 = vsel %vm3501_vm4, %v3498_v38, %v4725_v52  ;;  %v4718_v40 = vpop.permute.xlu1 %4717  ;;  %v4935_v42 = vld [vmem:[%s5057_s24 + $0x28] sm:$0xff]  ;;  %v4936_v63 = vld [vmem:[%s5057_s24 + $0x20] sm:$0xff] }
 0xbf8   : > { %v3512_v13 = vpack.c.bf16 %v3507_v21, %v3506_v56  ;;  %v4720_v45 = vunpack.i.h.bf16 %v4718_v40  ;;  %v4719_v8 = vunpack.i.l.bf16 %v4718_v40 }
 0xbf9   : > { %4604 = vmatmul.mubr.msk.bf16.vlgmr.msra.gmra.mxu0 %vm507_vm0, %v3511_v12 }
 0xbfa   : > { %4607 = vmatprep.mubr.msk.bf16.mxu0 %vm507_vm0, %v3512_v13  ;;  %v3500_v25 = vsel %vm1144_vm2, %v3492_v53, %v4720_v45  ;;  %v3499_v26 = vsel %vm1144_vm2, %v3491_v14, %v4719_v8 }
 0xbfb   : > { %v4728_v50 = vpop.permute.xlu1 %4727 }
 0xbfc   : > { %v4730_v33 = vunpack.i.h.bf16 %v4728_v50  ;;  %v4729_v19 = vunpack.i.l.bf16 %v4728_v50 }
 0xbfe   : > { %v3509_v28 = vsel %vm3501_vm4, %v3500_v25, %v4730_v33  ;;  %v3508_v22 = vsel %vm3501_vm4, %v3499_v26, %v4729_v19  ;;  %v4735_v33 = vld [vmem:[%s6144_s11 + $0x8] sm:$0xff]   ;;  %v4736_v19 = vld [vmem:[%s6144_s11] sm:$0xff]  }
 0xbff   : > { %v3513_v27 = vpack.c.bf16 %v3509_v28, %v3508_v22  ;;  %4611 = vmatprep.subr.bf16.mxu1 %v4735_v33 }
 0xc00   : > { %4612 = vmatpush3.bf16.msra.mxu1 %v4735_v33 }
 0xc01   : > { %4608 = vmatmul.mubr.msk.bf16.gmra.mxu0 %vm507_vm0, %v3513_v27  ;;  %4613 = vmatprep.subr.bf16.mxu1 %v4736_v19 }
 0xc04   : > { %4614 = vmatpush3.bf16.msra.mxu1 %v4736_v19 }
 0xcb9   : > { %v4605_v2 = vpop.f32.mrf.mxu0 }
 0xcba   : > { %v3592_v36 = vadd.f32 %v4605_v2, %v4226_v54 }
 0xcbb   : > { %v3583_v58 = vpop.f32.mrf.mxu0 }
 0xcbc   : > { %v5982_v17 = vadd.f32 %v4929_v3, %v3592_v36  ;;  %v3584_v41 = vadd.f32 %v4226_v54, %v3583_v58 }
 0xcbd   : > { %v4606_v57 = vpop.f32.mrf.mxu0 }
 0xcbe   : > { %v5985_v51 = vadd.f32 %v4930_v39, %v3584_v41  ;;  %v3595_v4 = vadd.f32 %v4606_v57, %v4226_v54  ;;  %v3628_v59 = vsel %vm507_vm0, %v5982_v17, 0.0  ;;  %v3656_v44 = vmul.f32 %v5982_v17, %v5982_v17 }
 0xcbf   : > { %3629 = vadd.xlane.f32.xlu0 %v3628_v59  ;;  %v3586_v62 = vpop.f32.mrf.mxu0 }
 0xcc0   : > { %v5990_v20 = vadd.f32 %v4931_v7, %v3595_v4  ;;  %v3587_v15 = vadd.f32 %v4226_v54, %v3586_v62  ;;  %v3622_v31 = vsel %vm507_vm0, %v5985_v51, 0.0  ;;  %v3668_v35 = vsel %vm507_vm0, %v3656_v44, 0.0 }
 0xcc1   : > { %v4609_v30 = vpop.f32.mrf.mxu0  ;;  %v3654_v48 = vmul.f32 %v5985_v51, %v5985_v51 }
 0xcc2   : > { %v5993_v10 = vadd.f32 %v4932_v47, %v3587_v15  ;;  %v3657_v16 = vmul.f32 %v5990_v20, %v5990_v20  ;;  %v3608_v6 = vadd.f32 %v4609_v30, %v4226_v54  ;;  %v3631_v46 = vsel %vm507_vm0, %v5990_v20, 0.0 }
 0xcc3   : > { %v3599_v29 = vpop.f32.mrf.mxu0  ;;  %3623 = vadd.xlane.f32.xlu0 %v3622_v31  ;;  %v3662_v18 = vsel %vm507_vm0, %v3654_v48, 0.0 }
 0xcc4   : > { %v3625_v43 = vsel %vm507_vm0, %v5993_v10, 0.0  ;;  %v3671_v1 = vsel %vm507_vm0, %v3657_v16, 0.0  ;;  %v3655_v61 = vmul.f32 %v5993_v10, %v5993_v10  ;;  %v6016_v11 = vadd.f32 %v4934_v32, %v3608_v6 }
 0xcc5   : > { %v4610_v5 = vpop.f32.mrf.mxu0  ;;  %3626 = vadd.xlane.f32.xlu1 %v3625_v43  ;;  %v3600_v52 = vadd.f32 %v4226_v54, %v3599_v29 }
 0xcc6   : > { %v3611_v55 = vadd.f32 %v4610_v5, %v4226_v54  ;;  %v3665_v60 = vsel %vm507_vm0, %v3655_v61, 0.0  ;;  %v3640_v56 = vsel %vm507_vm0, %v6016_v11, 0.0  ;;  %v3660_v50 = vmul.f32 %v6016_v11, %v6016_v11 }
 0xcc7   : > { %3669 = vadd.xlane.f32.xlu0 %v3668_v35  ;;  %v3602_v0 = vpop.f32.mrf.mxu0  ;;  %v6025_v12 = vadd.f32 %v4936_v63, %v3600_v52 }
 0xcc8   : > { %v6012_v37 = vadd.f32 %v4933_v9, %v3611_v55  ;;  %v3603_v24 = vadd.f32 %v4226_v54, %v3602_v0  ;;  %v3680_v14 = vsel %vm507_vm0, %v3660_v50, 0.0 }
 0xcc9   : > { %3672 = vadd.xlane.f32.xlu1 %v3671_v1  ;;  %v3634_v49 = vsel %vm507_vm0, %v6025_v12, 0.0  ;;  %v3658_v23 = vmul.f32 %v6025_v12, %v6025_v12 }
 0xcca   : > { %v6020_v38 = vadd.f32 %v4935_v42, %v3603_v24  ;;  %v3643_v34 = vsel %vm507_vm0, %v6012_v37, 0.0  ;;  %v3661_v45 = vmul.f32 %v6012_v37, %v6012_v37 }
 0xccb   : > { %3632 = vadd.xlane.f32.xlu0 %v3631_v46  ;;  %v3674_v8 = vsel %vm507_vm0, %v3658_v23, 0.0 }
 0xccc   : > { %v3637_v21 = vsel %vm507_vm0, %v6020_v38, 0.0  ;;  %v3659_v40 = vmul.f32 %v6020_v38, %v6020_v38  ;;  %v3683_v53 = vsel %vm507_vm0, %v3661_v45, 0.0 }
 0xccd   : > { %3666 = vadd.xlane.f32.xlu1 %v3665_v60 }
 0xcce   : > { %v3677_v13 = vsel %vm507_vm0, %v3659_v40, 0.0 }
 0xccf   : > { %3663 = vadd.xlane.f32.xlu0 %v3662_v18 }
 0xcd1   : > { %3644 = vadd.xlane.f32.xlu1 %v3643_v34 }
 0xcd3   : > { %3641 = vadd.xlane.f32.xlu0 %v3640_v56 }
 0xcd5   : > { %3638 = vadd.xlane.f32.xlu1 %v3637_v21 }
 0xcd7   : > { %3635 = vadd.xlane.f32.xlu0 %v3634_v49 }
 0xcd9   : > { %3678 = vadd.xlane.f32.xlu1 %v3677_v13 }
 0xcdb   : > { %3675 = vadd.xlane.f32.xlu0 %v3674_v8 }
 0xcdd   : > { %3684 = vadd.xlane.f32.xlu1 %v3683_v53 }
 0xcdf   : > { %3681 = vadd.xlane.f32.xlu0 %v3680_v14 }
 0xd48   : > { %v3630_v25 = vpop.xlane.xlu0 %3629 }
 0xd49   : > { %v3648_v28 = vmul.f32 0.03125, %v3630_v25 }
 0xd4b   : > { %v3704_v54 = vmul.f32 %v3648_v28, %v3648_v28  ;;  %v3696_v45 = vsub.f32 %v5982_v17, %v3648_v28  ;;  %v4233_v28 = vld [vmem:[%s6142_s9] ss:$0 sm:$0xff] }
 0xd4c   : > { %v3624_v26 = vpop.xlane.xlu0 %3623 }
 0xd4d   : > { %v6053_v57 = vmul.f32 0.03125, %v3624_v26 }
 0xd4e   : > { %v3627_v22 = vpop.xlane.xlu1 %3626 }
 0xd4f   : > { %v6051_v58 = vmul.f32 0.03125, %v3627_v22  ;;  %v3702_v31 = vmul.f32 %v6053_v57, %v6053_v57 }
 0xd50   : > { %v3670_v27 = vpop.xlane.xlu0 %3669 }
 0xd51   : > { %v3688_v2 = vmul.f32 0.03125, %v3670_v27  ;;  %v3703_v62 = vmul.f32 %v6051_v58, %v6051_v58  ;;  %v3695_v19 = vsub.f32 %v5993_v10, %v6051_v58 }
 0xd52   : > { %v3673_v36 = vpop.xlane.xlu1 %3672 }
 0xd53   : > { %v3712_v3 = vsub.f32 %v3688_v2, %v3704_v54  ;;  %v3689_v7 = vmul.f32 0.03125, %v3673_v36  ;;  %v3694_v54 = vsub.f32 %v5985_v51, %v6053_v57  ;;  %v4234_v57 = vld [vmem:[%s6143_s10] ss:$0 sm:$0xff] }
 0xd54   : > { %v3633_v41 = vpop.xlane.xlu0 %3632 }
 0xd55   : > { %v3649_v39 = vmul.f32 0.03125, %v3633_v41  ;;  %v3720_v4 = vadd.f32 1e-05, %v3712_v3 }
 0xd56   : > { %v3667_v59 = vpop.xlane.xlu1 %3666 }
 0xd57   : > { %v3705_v15 = vmul.f32 %v3649_v39, %v3649_v39  ;;  %v3687_v30 = vmul.f32 0.03125, %v3667_v59  ;;  %4889 = vrsqrt.f32 %v3720_v4  ;;  %v3697_v50 = vsub.f32 %v5990_v20, %v3649_v39 }
 0xd58   : > { %v3664_v47 = vpop.xlane.xlu0 %3663 }
 0xd59   : > { %v3713_v44 = vsub.f32 %v3689_v7, %v3705_v15  ;;  %v3711_v29 = vsub.f32 %v3687_v30, %v3703_v62  ;;  %v3686_v43 = vmul.f32 0.03125, %v3664_v47 }
 0xd5a   : > { %v3645_v16 = vpop.xlane.xlu1 %3644 }
 0xd5b   : > { %v3721_v5 = vadd.f32 1e-05, %v3713_v44  ;;  %v3719_v35 = vadd.f32 1e-05, %v3711_v29  ;;  %v3710_v55 = vsub.f32 %v3686_v43, %v3702_v31  ;;  %v3653_v24 = vmul.f32 0.03125, %v3645_v16 }
 0xd5c   : > { %v3642_v1 = vpop.xlane.xlu0 %3641 }
 0xd5d   : > { %4891 = vrsqrt.f32 %v3721_v5  ;;  %v3718_v61 = vadd.f32 1e-05, %v3710_v55  ;;  %v3652_v63 = vmul.f32 0.03125, %v3642_v1  ;;  %v3709_v40 = vmul.f32 %v3653_v24, %v3653_v24 }
 0xd5e   : > { %4893 = vrsqrt.f32 %v3719_v35  ;;  %v3639_v0 = vpop.xlane.xlu1 %3638 }
 0xd5f   : > { %4895 = vrsqrt.f32 %v3718_v61  ;;  %v3651_v6 = vmul.f32 0.03125, %v3639_v0  ;;  %v3708_v26 = vmul.f32 %v3652_v63, %v3652_v63  ;;  %v3701_v61 = vsub.f32 %v6012_v37, %v3653_v24  ;;  %v4737_v24 = vld [vmem:[%s6146_s13 + $0x38] sm:$0xff]  }
 0xd60   : > { %v3636_v46 = vpop.xlane.xlu0 %3635  ;;  %4623 = vmatprep.subr.bf16.mxu0 %v4737_v24 }
 0xd61   : > { %v3650_v48 = vmul.f32 0.03125, %v3636_v46  ;;  %v3707_v60 = vmul.f32 %v3651_v6, %v3651_v6  ;;  %v3699_v16 = vsub.f32 %v6020_v38, %v3651_v6  ;;  %4624 = vmatpush3.bf16.msra.mxu0 %v4737_v24 }
 0xd62   : > { %v3679_v9 = vpop.xlane.xlu1 %3678 }
 0xd63   : > { %v3691_v32 = vmul.f32 0.03125, %v3679_v9  ;;  %v3706_v18 = vmul.f32 %v3650_v48, %v3650_v48  ;;  %v3698_v35 = vsub.f32 %v6025_v12, %v3650_v48 }
 0xd64   : > { %v3676_v52 = vpop.xlane.xlu0 %3675  ;;  %v4890_v21 = vpop.eup %4889 }
 0xd65   : > { %v3715_v42 = vsub.f32 %v3691_v32, %v3707_v60  ;;  %v3690_v34 = vmul.f32 0.03125, %v3676_v52  ;;  %v3736_v25 = vmul.f32 %v4890_v21, %v3696_v45  ;;  %v3700_v52 = vsub.f32 %v6016_v11, %v3652_v63  ;;  %v4738_v63 = vld [vmem:[%s6146_s13 + $0x30] sm:$0xff]   ;;  %v4740_v45 = vld [vmem:[%s6146_s13 + $0x20] sm:$0xff]  }
 0xd66   : > { %v3685_v56 = vpop.xlane.xlu1 %3684  ;;  %4625 = vmatprep.subr.bf16.mxu0 %v4738_v63 }
 0xd67   : > { %v3723_v49 = vadd.f32 1e-05, %v3715_v42  ;;  %v3714_v23 = vsub.f32 %v3690_v34, %v3706_v18  ;;  %v3693_v13 = vmul.f32 0.03125, %v3685_v56  ;;  %v3751_v59 = vmul.f32 %v4233_v28, %v3736_v25  ;;  %4626 = vmatpush3.bf16.msra.mxu0 %v4738_v63 }
 0xd68   : > { %v3682_v8 = vpop.xlane.xlu0 %3681 }
 0xd69   : > { %4897 = vrsqrt.f32 %v3723_v49  ;;  %v3722_v53 = vadd.f32 1e-05, %v3714_v23  ;;  %v3717_v14 = vsub.f32 %v3693_v13, %v3709_v40  ;;  %v3692_v22 = vmul.f32 0.03125, %v3682_v8  ;;  %v4739_v13 = vld [vmem:[%s6146_s13 + $0x28] sm:$0xff]   ;;  %v4741_v8 = vld [vmem:[%s6146_s13 + $0x18] sm:$0xff]  }
 0xd6a   : > { %v4892_v33 = vpop.eup %4891  ;;  %v3766_v44 = vadd.f32 %v4234_v57, %v3751_v59  ;;  %4627 = vmatprep.subr.bf16.mxu0 %v4739_v13 }
 0xd6b   : > { %v4894_v27 = vpop.eup %4893  ;;  %v3737_v2 = vmul.f32 %v4892_v33, %v3697_v50  ;;  %4899 = vrsqrt.f32 %v3722_v53  ;;  %v3725_v36 = vadd.f32 1e-05, %v3717_v14  ;;  %v3716_v41 = vsub.f32 %v3692_v22, %v3708_v26  ;;  %4628 = vmatpush3.bf16.msra.mxu0 %v4739_v13  ;;  %v4742_v50 = vld [vmem:[%s6146_s13 + $0x10] sm:$0xff]   ;;  %v4743_v53 = vld [vmem:[%s6146_s13 + $0x8] sm:$0xff]   ;;  %v4744_v14 = vld [vmem:[%s6146_s13] sm:$0xff]  }
 0xd6c   : > { %v4896_v3 = vpop.eup %4895  ;;  %v3735_v39 = vmul.f32 %v4894_v27, %v3695_v19  ;;  %4629 = vmatprep.subr.bf16.mxu0 %v4740_v45  ;;  %v4235_v33 = vld [vmem:[%s6145_s12] ss:$0 sm:$0xff] }
 0xd6d   : > { %v3752_v4 = vmul.f32 %v4233_v28, %v3737_v2  ;;  %4901 = vrsqrt.f32 %v3725_v36  ;;  %v3734_v58 = vmul.f32 %v4896_v3, %v3694_v54  ;;  %v3724_v62 = vadd.f32 1e-05, %v3716_v41 }
 0xd6e   : > { %v3750_v7 = vmul.f32 %v4233_v28, %v3735_v39 }
 0xd6f   : > { %v3749_v15 = vmul.f32 %v4233_v28, %v3734_v58  ;;  %v3767_v30 = vadd.f32 %v4234_v57, %v3752_v4  ;;  %4903 = vrsqrt.f32 %v3724_v62  ;;  %4630 = vmatpush3.bf16.msra.mxu0 %v4740_v45 }
 0xd70   : > { %v3765_v31 = vadd.f32 %v4234_v57, %v3750_v7  ;;  %4631 = vmatprep.subr.bf16.mxu0 %v4741_v8 }
 0xd71   : > { %v3764_v47 = vadd.f32 %v4234_v57, %v3749_v15  ;;  %v3773_v43 = vpack.c.bf16 %v3767_v30, %v3766_v44 }
 0xd73   : > { %v3772_v29 = vpack.c.bf16 %v3765_v31, %v3764_v47  ;;  %4632 = vmatpush3.bf16.msra.mxu0 %v4741_v8 }
 0xd74   : > { %4633 = vmatprep.subr.bf16.mxu0 %v4742_v50 }
 0xd75   : > { %4615 = vmatprep.mubr.msk.bf16.mxu1 %vm507_vm0, %v3772_v29 }
 0xd76   : > { %v4898_v5 = vpop.eup %4897  ;;  %4616 = vmatmul.mubr.msk.bf16.vlgmr.msra.gmra.mxu1 %vm507_vm0, %v3773_v43 }
 0xd77   : > { %v3739_v55 = vmul.f32 %v4898_v5, %v3699_v16  ;;  %4634 = vmatpush3.bf16.msra.mxu0 %v4742_v50 }
 0xd78   : > { %v4900_v1 = vpop.eup %4899  ;;  %4635 = vmatprep.subr.bf16.mxu0 %v4743_v53 }
 0xd79   : > { %v3738_v0 = vmul.f32 %v4900_v1, %v3698_v35  ;;  %v3754_v46 = vmul.f32 %v4233_v28, %v3739_v55 }
 0xd7a   : > { %v4902_v9 = vpop.eup %4901 }
 0xd7b   : > { %v3753_v60 = vmul.f32 %v4233_v28, %v3738_v0  ;;  %v3741_v32 = vmul.f32 %v4902_v9, %v3701_v61  ;;  %v3769_v42 = vadd.f32 %v4234_v57, %v3754_v46  ;;  %4636 = vmatpush3.bf16.msra.mxu0 %v4743_v53 }
 0xd7c   : > { %v4904_v18 = vpop.eup %4903  ;;  %4637 = vmatprep.subr.bf16.mxu0 %v4744_v14 }
 0xd7d   : > { %v3768_v6 = vadd.f32 %v4234_v57, %v3753_v60  ;;  %v3740_v34 = vmul.f32 %v4904_v18, %v3700_v52  ;;  %v3756_v56 = vmul.f32 %v4233_v28, %v3741_v32 }
 0xd7f   : > { %v3774_v21 = vpack.c.bf16 %v3769_v42, %v3768_v6  ;;  %v3755_v40 = vmul.f32 %v4233_v28, %v3740_v34  ;;  %v3771_v49 = vadd.f32 %v4234_v57, %v3756_v56  ;;  %4638 = vmatpush3.bf16.msra.mxu0 %v4744_v14 }
 0xd81   : > { %4619 = vmatprep.mubr.msk.bf16.mxu1 %vm507_vm0, %v3774_v21  ;;  %v3770_v48 = vadd.f32 %v4234_v57, %v3755_v40 }
 0xd83   : > { %v3775_v23 = vpack.c.bf16 %v3771_v49, %v3770_v48 }
 0xd85   : > { %4620 = vmatmul.mubr.msk.bf16.gmra.mxu1 %vm507_vm0, %v3775_v23 }
 0xe36   : > { %v4617_v19 = vpop.f32.mrf.mxu1 }
 0xe37   : > { %v3854_v25 = vadd.f32 %v4617_v19, %v4235_v33 }
 0xe38   : > { %v3845_v26 = vpop.f32.mrf.mxu1 }
 0xe39   : > { %v3846_v22 = vadd.f32 %v4235_v33, %v3845_v26  ;;  %v3886_v27 = vmul.f32 0.70710677, %v3854_v25  ;;  %v3878_v32 = vmul.f32 0.5, %v3854_v25 }
 0xe3a   : > { %v4618_v54 = vpop.f32.mrf.mxu1 }
 0xe3b   : > { %v3884_v28 = vmul.f32 0.70710677, %v3846_v22  ;;  %v3857_v2 = vadd.f32 %v4618_v54, %v4235_v33  ;;  %v3876_v0 = vmul.f32 0.5, %v3846_v22 }
 0xe3c   : > { %v3848_v36 = vpop.f32.mrf.mxu1 }
 0xe3d   : > { %4905 = verf.f32 %v3884_v28  ;;  %v3887_v3 = vmul.f32 0.70710677, %v3857_v2  ;;  %v3849_v41 = vadd.f32 %v4235_v33, %v3848_v36  ;;  %v3879_v1 = vmul.f32 0.5, %v3857_v2 }
 0xe3e   : > { %4907 = verf.f32 %v3886_v27  ;;  %v4242_v27 = vld [vmem:[%s6147_s14] ss:$0 sm:$0xff] }
 0xe3f   : > { %4909 = verf.f32 %v3887_v3  ;;  %v3885_v39 = vmul.f32 0.70710677, %v3849_v41  ;;  %v3877_v46 = vmul.f32 0.5, %v3849_v41 }
 0xe41   : > { %4911 = verf.f32 %v3885_v39 }
 0xe45   : > { %v4621_v4 = vpop.f32.mrf.mxu1 }
 0xe46   : > { %v3870_v58 = vadd.f32 %v4621_v4, %v4235_v33 }
 0xe47   : > { %v3861_v59 = vpop.f32.mrf.mxu1 }
 0xe48   : > { %v3890_v62 = vmul.f32 0.70710677, %v3870_v58  ;;  %v3862_v7 = vadd.f32 %v4235_v33, %v3861_v59  ;;  %v3882_v53 = vmul.f32 0.5, %v3870_v58 }
 0xe49   : > { %v4622_v15 = vpop.f32.mrf.mxu1 }
 0xe4a   : > { %v4906_v57 = vpop.eup %4905  ;;  %v3888_v31 = vmul.f32 0.70710677, %v3862_v7  ;;  %v3873_v44 = vadd.f32 %v4622_v15, %v4235_v33  ;;  %4913 = verf.f32 %v3890_v62  ;;  %v3880_v45 = vmul.f32 0.5, %v3862_v7 }
 0xe4b   : > { %v4908_v30 = vpop.eup %4907  ;;  %v3864_v29 = vpop.f32.mrf.mxu1  ;;  %v3900_v43 = vadd.f32 1.0, %v4906_v57 }
 0xe4c   : > { %v4910_v47 = vpop.eup %4909  ;;  %v3865_v5 = vadd.f32 %v4235_v33, %v3864_v29  ;;  %v3902_v55 = vadd.f32 1.0, %v4908_v30  ;;  %4915 = verf.f32 %v3888_v31  ;;  %v3891_v61 = vmul.f32 0.70710677, %v3873_v44 }
 0xe4d   : > { %v3903_v16 = vadd.f32 1.0, %v4910_v47  ;;  %v3908_v18 = vmul.f32 %v3900_v43, %v3876_v0  ;;  %v3883_v63 = vmul.f32 0.5, %v3873_v44 }
 0xe4e   : > { %v4912_v35 = vpop.eup %4911  ;;  %v3889_v60 = vmul.f32 0.70710677, %v3865_v5  ;;  %4917 = verf.f32 %v3891_v61  ;;  %v3910_v42 = vmul.f32 %v3902_v55, %v3878_v32  ;;  %v3881_v8 = vmul.f32 0.5, %v3865_v5 }
 0xe4f   : > { %v3901_v9 = vadd.f32 1.0, %v4912_v35  ;;  %v3911_v52 = vmul.f32 %v3903_v16, %v3879_v1 }
 0xe50   : > { %4919 = verf.f32 %v3889_v60 }
 0xe51   : > { %v3909_v6 = vmul.f32 %v3901_v9, %v3877_v46  ;;  %v3917_v56 = vpack.c.bf16 %v3911_v52, %v3910_v42 }
 0xe53   : > { %v3916_v34 = vpack.c.bf16 %v3909_v6, %v3908_v18 }
 0xe55   : > { %4639 = vmatprep.mubr.bf16.mxu0 %v3916_v34 }
 0xe56   : > { %4640 = vmatmul.mubr.bf16.vlgmr.msra.gmra.mxu0 %v3917_v56 }
 0xe57   : > { %v4914_v21 = vpop.eup %4913 }
 0xe58   : > { %v3906_v24 = vadd.f32 1.0, %v4914_v21 }
 0xe59   : > { %v4916_v40 = vpop.eup %4915 }
 0xe5a   : > { %v3904_v49 = vadd.f32 1.0, %v4916_v40  ;;  %v3914_v25 = vmul.f32 %v3906_v24, %v3882_v53 }
 0xe5b   : > { %v4918_v48 = vpop.eup %4917 }
 0xe5c   : > { %v3907_v13 = vadd.f32 1.0, %v4918_v48  ;;  %v3912_v33 = vmul.f32 %v3904_v49, %v3880_v45 }
 0xe5d   : > { %v4920_v23 = vpop.eup %4919 }
 0xe5e   : > { %v3905_v50 = vadd.f32 1.0, %v4920_v23  ;;  %v3915_v14 = vmul.f32 %v3907_v13, %v3883_v63 }
 0xe60   : > { %v3913_v19 = vmul.f32 %v3905_v50, %v3881_v8  ;;  %v3919_v22 = vpack.c.bf16 %v3915_v14, %v3914_v25 }
 0xe62   : > { %v3918_v26 = vpack.c.bf16 %v3913_v19, %v3912_v33 }
 0xe64   : > { %4643 = vmatprep.mubr.bf16.mxu0 %v3918_v26 }
 0xe65   : > { %4644 = vmatmul.mubr.bf16.gmra.mxu0 %v3919_v22 }
 0xf16   : > { %v4641_v54 = vpop.f32.mrf.mxu0 }
 0xf17   : > { %v4034_v28 = vadd.f32 %v4641_v54, %v4242_v27 }
 0xf18   : > { %v4025_v2 = vpop.f32.mrf.mxu0 }
 0xf19   : > { %v4058_v36 = vadd.f32 %v4034_v28, %v5982_v17  ;;  %v4026_v3 = vadd.f32 %v4242_v27, %v4025_v2 }
 0xf1a   : > { %v4642_v41 = vpop.f32.mrf.mxu0 }
 0xf1b   : > { %4066 = vst.msk [vmem:[%s496_s16 + $0x10] sm:$0xff] %vm507_vm0, %v4058_v36  ;;  %v4056_v39 = vadd.f32 %v4026_v3, %v5985_v51  ;;  %v4037_v4 = vadd.f32 %v4642_v41, %v4242_v27 }
 0xf1c   : > { %v4028_v58 = vpop.f32.mrf.mxu0 }
 0xf1d   : > { %4064 = vst.msk [vmem:[%s496_s16] sm:$0xff] %vm507_vm0, %v4056_v39  ;;  %v4059_v59 = vadd.f32 %v4037_v4, %v5990_v20  ;;  %v4029_v62 = vadd.f32 %v4242_v27, %v4028_v58 }
 0xf1f   : > { %4067 = vst.msk [vmem:[%s496_s16 + $0x18] sm:$0xff] %vm507_vm0, %v4059_v59  ;;  %v4057_v7 = vadd.f32 %v4029_v62, %v5993_v10 }
 0xf21   : > { %4065 = vst.msk [vmem:[%s496_s16 + $0x8] sm:$0xff] %vm507_vm0, %v4057_v7 }
 0xf25   : > { %v4645_v17 = vpop.f32.mrf.mxu0 }
 0xf26   : > { %v4050_v57 = vadd.f32 %v4645_v17, %v4242_v27 }
 0xf27   : > { %v4041_v15 = vpop.f32.mrf.mxu0 }
 0xf28   : > { %v4062_v30 = vadd.f32 %v4050_v57, %v6016_v11  ;;  %v4042_v47 = vadd.f32 %v4242_v27, %v4041_v15 }
 0xf29   : > { %v4646_v51 = vpop.f32.mrf.mxu0 }
 0xf2a   : > { %4070 = vst.msk [vmem:[%s496_s16 + $0x30] sm:$0xff] %vm507_vm0, %v4062_v30  ;;  %v4060_v31 = vadd.f32 %v4042_v47, %v6025_v12  ;;  %v4053_v44 = vadd.f32 %v4646_v51, %v4242_v27 }
 0xf2b   : > { %v4044_v20 = vpop.f32.mrf.mxu0 }
 0xf2c   : > { %4068 = vst.msk [vmem:[%s496_s16 + $0x20] sm:$0xff] %vm507_vm0, %v4060_v31  ;;  %v4063_v29 = vadd.f32 %v4053_v44, %v6012_v37  ;;  %v4045_v10 = vadd.f32 %v4242_v27, %v4044_v20 }
 0xf2e   : > { %4071 = vst.msk [vmem:[%s496_s16 + $0x38] sm:$0xff] %vm507_vm0, %v4063_v29  ;;  %v4061_v43 = vadd.f32 %v4045_v10, %v6020_v38 }
 0xf30   : > { %4069 = vst.msk [vmem:[%s496_s16 + $0x28] sm:$0xff] %vm507_vm0, %v4061_v43 }
 0xf31 PF: > { %s25_s18 = sadd.s32 1, %s4943_s18  }
 0xf32   : > { %p22_p4 = scmp.ge.s32.totalorder %s25_s18, 4  }
 0xf34   :  { %24 = sbr.rel (!%p22_p4) target bundleno = 1 (0x1), region = 110 }

</bundles_post_ra>
